<compile_context>
chip_gen: v6e
topology: v6e:2x2x1
jax: 0.10.0
libtpu: 0.0.40
codegen_flags: <defaults>
</compile_context>

<pallas_src>
import functools
import math

import numpy as np
import jax
import jax.numpy as jnp
from jax.experimental import pallas as pl
from jax.experimental.pallas import tpu as pltpu


_CP_ARBITRARY = pltpu.CompilerParams(dimension_semantics=("arbitrary",))
_CP_PARALLEL = pltpu.CompilerParams(dimension_semantics=("parallel",))   # v7x: shard grid over 2 TCs


# ----------------------------------------------------------------------------
# In-kernel math helpers
# ----------------------------------------------------------------------------
def _recip(x):
    # route the divide to the EUP slot; fall back to a plain divide if unavailable
    if hasattr(pl, "reciprocal"):
        return pl.reciprocal(x, approx=True)
    return 1.0 / x


def _resblock_math(x, w13, b13, w2, b2, hidden):
    """Fused ResBlock: LN(relu(x@W1+b1)@W2+b2 + x@W3+b3).
    W1/W3 are pre-concatenated into w13 (Din, hidden+Dout) so x is pushed to the MXU once.
    LayerNorm weight=1 / bias=0 (matches reference __init__), eps=1e-5.  f32 throughout."""
    h13 = jnp.dot(x, w13, preferred_element_type=jnp.float32) + b13
    h = jnp.maximum(h13[:, :hidden], 0.0)
    skip = h13[:, hidden:]
    out = jnp.dot(h, w2, preferred_element_type=jnp.float32) + b2 + skip
    mu = jnp.mean(out, axis=-1, keepdims=True)
    var = jnp.mean((out - mu) ** 2, axis=-1, keepdims=True)
    return (out - mu) * jax.lax.rsqrt(var + 1e-5)


# ----------------------------------------------------------------------------
# Pallas kernels
# ----------------------------------------------------------------------------
def _linear_kernel(x_ref, w_ref, b_ref, o_ref):
    o_ref[...] = jnp.dot(x_ref[...], w_ref[...],
                         preferred_element_type=jnp.float32) + b_ref[...]


def _resblock_chain_kernel(*refs, hdims):
    """Chain of fused ResBlocks, activations resident in VMEM across layers."""
    x_ref, o_ref = refs[0], refs[-1]
    h = x_ref[...]
    for li, hd in enumerate(hdims):
        h = _resblock_math(h, refs[1 + 4 * li][...], refs[2 + 4 * li][...],
                           refs[3 + 4 * li][...], refs[4 + 4 * li][...], hd)
    o_ref[...] = h


def _trunk_kernel(*refs, hdims):
    """encoders + decoders ResBlock chain + residual projection, one pallas_call."""
    n = len(hdims)
    hidden_ref, xn_ref = refs[0], refs[1]
    wrefs = refs[2:2 + 4 * n]
    wres_ref, bres_ref = refs[2 + 4 * n], refs[3 + 4 * n]
    o_dec_ref, o_res_ref = refs[4 + 4 * n], refs[5 + 4 * n]
    h = hidden_ref[...]
    for li, hd in enumerate(hdims):
        h = _resblock_math(h, wrefs[4 * li][...], wrefs[4 * li + 1][...],
                           wrefs[4 * li + 2][...], wrefs[4 * li + 3][...], hd)
    o_dec_ref[...] = h
    o_res_ref[...] = jnp.dot(xn_ref[...], wres_ref[...],
                             preferred_element_type=jnp.float32) + bres_ref[...]


def _feature_attn_kernel(x_ref, w13_ref, b13_ref, w2_ref, b2_ref,
                         wqkv_ref, wproj_ref, bproj_ref, o_ref, *, num_heads, hidden):
    """Fused feature-encoder ResBlock + multi-head self-attention for one batch element."""
    x = x_ref[0]                                                      # (L, Din)
    feat = _resblock_math(x, w13_ref[...], b13_ref[...], w2_ref[...], b2_ref[...], hidden)
    C = feat.shape[-1]
    hd = C // num_heads
    scale = float(hd) ** -0.5
    qkv = jnp.dot(feat, wqkv_ref[...], preferred_element_type=jnp.float32)   # (L, 3C)
    heads = []
    for h in range(num_heads):   # num_heads=2, hd=1 -> unrolled; batching buys nothing here
        q = qkv[:, h * hd:(h + 1) * hd]
        k = qkv[:, C + h * hd:C + (h + 1) * hd]
        v = qkv[:, 2 * C + h * hd:2 * C + (h + 1) * hd]
        s = jax.lax.dot_general(q, k, (((1,), (1,)), ((), ())),
                                preferred_element_type=jnp.float32) * scale  # (L, L)
        m = jnp.max(s, axis=-1, keepdims=True)
        e = jnp.exp(s - m)
        attn = e * _recip(jnp.sum(e, axis=-1, keepdims=True))
        heads.append(jnp.dot(attn, v, preferred_element_type=jnp.float32))
    out = jnp.concatenate(heads, axis=-1)                             # (L, C)
    o_ref[0] = jnp.dot(out, wproj_ref[...], preferred_element_type=jnp.float32) + bproj_ref[...]


# ----------------------------------------------------------------------------
# Pallas wrappers (full-array blocks; shapes are tiny so one grid step suffices).
# TODO(synk): if seq_len/d_model/batch scale up, add >=512-row M tiling (+K reduction grid
# with a VMEM accumulator) instead of full-array blocks, esp. for v7x's 64 MiB VMEM.
# ----------------------------------------------------------------------------
def _full_spec(a):
    nd = a.ndim
    return pl.BlockSpec(a.shape, lambda i, _nd=nd: (0,) * _nd)


def pallas_linear(x, w, b):
    M, _ = x.shape
    N = w.shape[1]
    b2 = b.reshape(1, N)
    return pl.pallas_call(
        _linear_kernel,
        out_shape=jax.ShapeDtypeStruct((M, N), jnp.float32),
        grid=(1,),
        in_specs=[_full_spec(x), _full_spec(w), _full_spec(b2)],
        out_specs=pl.BlockSpec((M, N), lambda i: (0, 0)),
        compiler_params=_CP_ARBITRARY,
    )(x, w, b2)


def pallas_resblock_chain(x, layers):
    M = x.shape[0]
    Dout = layers[-1]["w2"].shape[1]
    args, hdims = [x], []
    for l in layers:
        args += [l["w13"], l["b13"], l["w2"], l["b2"]]
        hdims.append(l["w2"].shape[0])
    return pl.pallas_call(
        functools.partial(_resblock_chain_kernel, hdims=tuple(hdims)),
        out_shape=jax.ShapeDtypeStruct((M, Dout), jnp.float32),
        grid=(1,),
        in_specs=[_full_spec(a) for a in args],
        out_specs=pl.BlockSpec((M, Dout), lambda i: (0, 0)),
        compiler_params=_CP_ARBITRARY,
    )(*args)


def pallas_trunk(hidden, xn, layers, wres, bres):
    M = hidden.shape[0]
    Ddec = layers[-1]["w2"].shape[1]
    P = wres.shape[1]
    bres2 = bres.reshape(1, P)
    args, hdims = [hidden, xn], []
    for l in layers:
        args += [l["w13"], l["b13"], l["w2"], l["b2"]]
        hdims.append(l["w2"].shape[0])
    args += [wres, bres2]
    return pl.pallas_call(
        functools.partial(_trunk_kernel, hdims=tuple(hdims)),
        out_shape=(jax.ShapeDtypeStruct((M, Ddec), jnp.float32),
                   jax.ShapeDtypeStruct((M, P), jnp.float32)),
        grid=(1,),
        in_specs=[_full_spec(a) for a in args],
        out_specs=(pl.BlockSpec((M, Ddec), lambda i: (0, 0)),
                   pl.BlockSpec((M, P), lambda i: (0, 0))),
        compiler_params=_CP_ARBITRARY,
    )(*args)


def pallas_feature_attn(x, fe_block, wqkv, wproj, bproj, num_heads):
    B, L, Din = x.shape
    C = fe_block["w2"].shape[1]
    bproj2 = bproj.reshape(1, C)
    return pl.pallas_call(
        functools.partial(_feature_attn_kernel, num_heads=num_heads,
                          hidden=fe_block["w2"].shape[0]),
        out_shape=jax.ShapeDtypeStruct((B, L, C), jnp.float32),
        grid=(B,),
        in_specs=[pl.BlockSpec((1, L, Din), lambda b: (b, 0, 0)),
                  pl.BlockSpec(fe_block["w13"].shape, lambda b: (0, 0)),
                  pl.BlockSpec(fe_block["b13"].shape, lambda b: (0, 0)),
                  pl.BlockSpec(fe_block["w2"].shape, lambda b: (0, 0)),
                  pl.BlockSpec(fe_block["b2"].shape, lambda b: (0, 0)),
                  pl.BlockSpec(wqkv.shape, lambda b: (0, 0)),
                  pl.BlockSpec(wproj.shape, lambda b: (0, 0)),
                  pl.BlockSpec(bproj2.shape, lambda b: (0, 0))],
        out_specs=pl.BlockSpec((1, L, C), lambda b: (b, 0, 0)),
        compiler_params=_CP_PARALLEL,
    )(x, fe_block["w13"], fe_block["b13"], fe_block["w2"], fe_block["b2"],
      wqkv, wproj, bproj2)


# ----------------------------------------------------------------------------
# Glue (plain JAX / numpy): decomposition, folding/im2col, host-side period selection
# ----------------------------------------------------------------------------
def series_decomp(x, kernel_size):
    """x: (N, S). Edge-padded moving average (TSLib series_decomp, odd kernel)."""
    pad = (kernel_size - 1) // 2
    xp = jnp.concatenate([jnp.repeat(x[:, :1], pad, axis=1), x,
                          jnp.repeat(x[:, -1:], pad, axis=1)], axis=1)
    S = x.shape[1]
    trend = jnp.mean(jnp.stack([xp[:, i:i + S] for i in range(kernel_size)], axis=0), axis=0)
    return x - trend, trend                                   # (seasonal, trend)


def _series_decomp_np(x, kernel_size):
    pad = (kernel_size - 1) // 2
    xp = np.concatenate([np.repeat(x[:, :1], pad, axis=1), x,
                         np.repeat(x[:, -1:], pad, axis=1)], axis=1)
    S = x.shape[1]
    trend = np.mean(np.stack([xp[:, i:i + S] for i in range(kernel_size)], axis=0), axis=0)
    return x - trend


def _im2col_1ch(x, K):
    """x: (B, H, W) single channel -> (B*H*W, K*K) patches, tap order (kh, kw)."""
    p = (K - 1) // 2
    B, H, W = x.shape
    xp = jnp.pad(x, ((0, 0), (p, p), (p, p)))
    cols = [xp[:, dh:dh + H, dw:dw + W] for dh in range(K) for dw in range(K)]
    return jnp.stack(cols, axis=-1).reshape(B * H * W, K * K)


def _im2col_nhwc(x, K):
    """x: (B, H, W, C) channels-last -> (B*H*W, K*K*C), column order (kh, kw, c)."""
    p = (K - 1) // 2
    B, H, W, C = x.shape
    xp = jnp.pad(x, ((0, 0), (p, p), (p, p), (0, 0)))
    cols = [xp[:, dh:dh + H, dw:dw + W, :] for dh in range(K) for dw in range(K)]
    return jnp.stack(cols, axis=3).reshape(B * H * W, K * K * C)


def _host_periods(cfg, x_enc):
    """One device->host sync; mirrors the reference's fft_period .detach().cpu().numpy(),
    computed once for ALL target features before the jitted device forward."""
    S, P = cfg["seq_len"], cfg["pred_len"]
    L = S + P
    k = cfg["top_k"]
    x = np.asarray(x_enc, dtype=np.float32)                   # (B, S, F) — single sync
    B, _, F = x.shape
    periods, weights = [], np.zeros((F, B, k), np.float32)
    for f in range(F):
        xs = x[:, :, f]
        means = xs.mean(axis=1, keepdims=True)
        xc = xs - means
        stdev = np.sqrt(xc.var(axis=1, keepdims=True) + 1e-5)
        seasonal = _series_decomp_np(xc / stdev, cfg["moving_avg"])
        xe = np.concatenate([seasonal, np.zeros((B, P), np.float32)], axis=1)   # (B, L)
        amp = np.abs(np.fft.rfft(xe, axis=1))
        freq = amp.mean(0).copy()
        freq[0] = 0.0
        top = np.argsort(-freq)[:k]
        top = np.maximum(top, 1)        # guard: never divide by the zeroed DC bin
        periods.append(tuple(int(L // t) for t in top))
        weights[f] = amp[:, top]
    return tuple(periods), jnp.asarray(weights)               # periods static, weights (F,B,k)


def _seasonal_out_all(params, cfg, seasonal_fb, periods, period_weight):
    """seasonal_fb: (F*B, S), rows ordered (feature, batch). Returns (F, B, L, d_model)."""
    S, P = cfg["seq_len"], cfg["pred_len"]
    L = S + P
    dm = cfg["d_model"]
    k = cfg["top_k"]
    K = int(round(math.sqrt(params["inc1_w_sum"].shape[0])))
    F = len(periods)
    B = seasonal_fb.shape[0] // F

    # TODO(synk): PatchEmbedding output is unused in the reference forward; skipped.
    # TODO(synk): reference reshapes assume the seasonal series already spans seq_len+pred_len;
    # we zero-extend the future part to make the folding well-defined.
    x_ext = jnp.concatenate([seasonal_fb, jnp.zeros((F * B, P), seasonal_fb.dtype)], axis=1)
    x_ext = x_ext.reshape(F, B, L)

    # Fold every (feature, period) combination; both inception blocks run as TWO
    # row-concatenated Pallas matmuls total, channels-last (no NCHW transposes).
    # TODO(synk): reference feeds a 1-channel series into d_model-in-channel Inception convs
    # (shape-inconsistent); we tile across d_model channels, realized exactly by summing the
    # first conv's weight over its input channels (single-channel im2col, K*K columns only).
    segs, patches1 = [], []
    for f in range(F):
        for i in range(k):
            p = int(periods[f][i])
            length = L if L % p == 0 else (L // p + 1) * p
            xf = x_ext[f]
            if length != L:
                xf = jnp.concatenate([xf, jnp.zeros((B, length - L), xf.dtype)], axis=1)
            folded = xf.reshape(B, length // p, p)             # (B, H, W), single channel
            segs.append((f, i, length // p, p))
            patches1.append(_im2col_1ch(folded, K))
    rows = [B * h * w for (_, _, h, w) in segs]

    y1 = pallas_linear(jnp.concatenate(patches1, axis=0),
                       params["inc1_w_sum"], params["inc1_b"])          # (R, dm)
    y1 = jax.nn.gelu(y1, approximate=False)                             # exact GELU (nn.GELU)

    # TODO(synk): second conv still materializes an (R, K*K*dm) patch matrix; at scale this
    # should become an in-kernel K-tap shifted-slice accumulation to avoid the HBM blow-up.
    patches2, off = [], 0
    for (f, i, h, w), r in zip(segs, rows):
        patches2.append(_im2col_nhwc(y1[off:off + r].reshape(B, h, w, dm), K))
        off += r
    y2 = pallas_linear(jnp.concatenate(patches2, axis=0),
                       params["inc2_w_flat"], params["inc2_b"])         # (R, dm)

    w_soft = jax.nn.softmax(period_weight, axis=-1)                     # (F, B, k)
    seg_out = [[None] * k for _ in range(F)]
    off = 0
    for (f, i, h, w), r in zip(segs, rows):
        seg_out[f][i] = y2[off:off + r].reshape(B, h * w, dm)[:, :L, :]
        off += r
    outs = []
    for f in range(F):
        res = jnp.stack(seg_out[f], axis=-1)                            # (B, L, dm, k)
        outs.append(jnp.sum(res * w_soft[f][:, None, None, :], axis=-1))
    return jnp.stack(outs, axis=0)                                      # (F, B, L, dm)


# ----------------------------------------------------------------------------
# Device forward (jittable; period-dependent shapes are static Python ints)
# ----------------------------------------------------------------------------
def _device_forward(params, cfg, periods, x_enc, x_mark_enc, batch_y_mark, period_weight):
    S, P = cfg["seq_len"], cfg["pred_len"]
    L = S + P
    fe = cfg["feature_encode_dim"]
    dd = cfg["decode_dim"]
    B, _, F = x_enc.shape

    # ---- covariate + time-embedding path (shared by every target feature) ----
    bym = jnp.concatenate([x_mark_enc, batch_y_mark[:, -P:, :]], axis=1)       # (B, L, feat)
    half = fe // 2
    freqs = jnp.exp(-jnp.arange(half, dtype=jnp.float32) * (math.log(10000.0) / half))
    emb = jnp.arange(L, dtype=jnp.float32)[:, None] * freqs[None, :]
    time_emb = jnp.concatenate([jnp.sin(emb), jnp.cos(emb)], axis=-1)          # (L, fe)
    bym = jnp.concatenate([bym, jnp.broadcast_to(time_emb[None], (B, L, fe))], axis=-1)

    # fused feature-encoder ResBlock + self-attention (1 pallas_call, grid over batch)
    feature = pallas_feature_attn(bym, params["feature_encoder"], params["attn_wqkv"],
                                  params["attn_wproj"], params["attn_bproj"], num_heads=2)
    feature_flat = feature.reshape(B, L * fe)

    # ---- per-target-feature normalization / decomposition, batched over features ----
    x_fb = jnp.transpose(x_enc, (2, 0, 1)).reshape(F * B, S)       # rows ordered (feature, batch)
    means = jnp.mean(x_fb, axis=1, keepdims=True)
    xc = x_fb - means
    stdev = jnp.sqrt(jnp.var(xc, axis=1, keepdims=True) + 1e-5)
    xn = xc / stdev
    seasonal, trend = series_decomp(xn, cfg["moving_avg"])

    seasonal_out = _seasonal_out_all(params, cfg, seasonal, periods, period_weight)  # (F,B,L,dm)

    # TODO(synk): reference cat([trend, seasonal_out, feature_flat]) is shape-inconsistent with
    # flatten_dim; we recombine trend + channel-mean seasonal over the seq_len window instead.
    x_comb = trend + jnp.mean(seasonal_out, axis=-1).reshape(F * B, L)[:, :S]   # (F*B, S)
    hidden = jnp.concatenate([x_comb, jnp.tile(feature_flat, (F, 1))], axis=-1)

    # fused encoders + decoders + residual projection (1 pallas_call, M = F*B rows)
    decoded, res = pallas_trunk(hidden, xn,
                                list(params["encoders"]) + list(params["decoders"]),
                                params["resproj_w"], params["resproj_b"])
    decoded = decoded.reshape(F * B * P, dd)
    feat_fut = jnp.broadcast_to(feature[:, S:, :][None], (F, B, P, fe)).reshape(F * B * P, fe)
    td_in = jnp.concatenate([feat_fut, decoded], axis=-1)
    dec = pallas_resblock_chain(td_in, [params["temporal_decoder"]]).reshape(F * B, P)

    out = (dec + res) * stdev + means                                          # (F*B, P)
    return jnp.transpose(out.reshape(F, B, P), (1, 2, 0))                      # (B, P, F)


_JIT_CACHE = {}


def model_forward(params, cfg, x_enc, x_mark_enc, x_dec, batch_y_mark):
    del x_dec  # unused by the reference forecast path as well
    periods, period_weight = _host_periods(cfg, x_enc)   # single host sync for all features
    key = (tuple(sorted(cfg.items())), periods)
    if key not in _JIT_CACHE:
        cfg_c, periods_c = dict(cfg), periods
        _JIT_CACHE[key] = jax.jit(
            lambda p, xe, xme, bym, pw: _device_forward(p, cfg_c, periods_c, xe, xme, bym, pw))
    return _JIT_CACHE[key](params, x_enc, x_mark_enc, batch_y_mark, period_weight)


# ----------------------------------------------------------------------------
# Parameters (deterministic init from PRNGKey); fused layouts for the Pallas kernels
# ----------------------------------------------------------------------------
def init_params(key, cfg):
    ks = list(jax.random.split(key, 80))
    idx = [0]

    def nk():
        kk = ks[idx[0]]
        idx[0] += 1
        return kk

    def lin(din, dout, bias=True):
        w = jax.random.normal(nk(), (din, dout), jnp.float32) / np.sqrt(din)
        b = jax.random.normal(nk(), (dout,), jnp.float32) * 0.02 if bias \
            else jnp.zeros((dout,), jnp.float32)
        return w, b

    def resblock(din, h, dout):
        w1, b1 = lin(din, h)
        w2, b2 = lin(h, dout)
        w3, b3 = lin(din, dout)
        # fc1 / fc3 share the same input -> concatenate so x hits the MXU once in-kernel.
        return dict(w13=jnp.concatenate([w1, w3], axis=1),
                    b13=jnp.concatenate([b1, b3]).reshape(1, h + dout),
                    w2=w2, b2=b2.reshape(1, dout))

    def inception(cin, cout, nkern):
        # Inception_Block_V1 = mean of odd-sized same-padded convs -> one collapsed KxK conv.
        K = 2 * nkern - 1
        W = jnp.zeros((cout, cin, K, K), jnp.float32)
        b = jnp.zeros((cout,), jnp.float32)
        for i in range(nkern):
            ksz = 2 * i + 1
            Wi = jax.random.normal(nk(), (cout, cin, ksz, ksz), jnp.float32) / np.sqrt(cin * ksz * ksz)
            bi = jax.random.normal(nk(), (cout,), jnp.float32) * 0.02
            pad = (K - ksz) // 2
            W = W + jnp.pad(Wi, ((0, 0), (0, 0), (pad, pad), (pad, pad)))
            b = b + bi
        return W / nkern, b / nkern, K

    fe = cfg["feature_encode_dim"]
    dm = cfg["d_model"]
    S, P = cfg["seq_len"], cfg["pred_len"]
    L = S + P
    flatten_dim = S + L * fe

    params = {}
    params["feature_encoder"] = resblock(cfg["feature_dim"] + fe, dm, fe)
    params["attn_wqkv"], _ = lin(fe, 3 * fe, bias=False)
    params["attn_wproj"], params["attn_bproj"] = lin(fe, fe)
    encs = [resblock(flatten_dim, dm, dm)]
    for _ in range(cfg["e_layers"] - 1):
        encs.append(resblock(dm, dm, dm))
    params["encoders"] = encs
    decs = []
    for _ in range(cfg["d_layers"] - 1):
        decs.append(resblock(dm, dm, dm))
    decs.append(resblock(dm, dm, cfg["decode_dim"] * P))
    params["decoders"] = decs
    params["temporal_decoder"] = resblock(cfg["decode_dim"] + fe, cfg["d_ff"], 1)
    params["resproj_w"], params["resproj_b"] = lin(S, P)

    W1, b1, K = inception(dm, dm, cfg["num_kernels"])
    W2, b2, _ = inception(dm, dm, cfg["num_kernels"])
    # conv1 input is the 1-channel folded series broadcast across d_model channels
    # (documented reinterpretation) -> summing W1 over input channels is identical math
    # and shrinks the im2col to K*K columns. Tap-major layouts match the im2col helpers.
    params["inc1_w_sum"] = jnp.transpose(jnp.sum(W1, axis=1), (1, 2, 0)).reshape(K * K, dm)
    params["inc1_b"] = b1
    params["inc2_w_flat"] = jnp.transpose(W2, (2, 3, 1, 0)).reshape(K * K * dm, dm)
    params["inc2_b"] = b2
    return params


# ----------------------------------------------------------------------------
if __name__ == "__main__":
    cfg = dict(seq_len=16, pred_len=8, d_model=32, d_ff=32, e_layers=2, d_layers=2,
               feature_dim=4,              # freq='h'
               c_out=1, decode_dim=1, moving_avg=5, top_k=2, num_kernels=3,
               feature_encode_dim=2)

    key = jax.random.PRNGKey(0)
    k1, k2, k3, k4, kp = jax.random.split(key, 5)
    B, n_feat = 2, 3
    x_enc = jax.random.normal(k1, (B, cfg["seq_len"], n_feat), jnp.float32)
    x_mark_enc = jax.random.normal(k2, (B, cfg["seq_len"], cfg["feature_dim"]), jnp.float32)
    x_dec = jax.random.normal(k3, (B, cfg["seq_len"] + cfg["pred_len"], n_feat), jnp.float32)
    batch_y_mark = jax.random.normal(k4, (B, cfg["seq_len"] + cfg["pred_len"],
                                          cfg["feature_dim"]), jnp.float32)

    params = init_params(kp, cfg)
    out = model_forward(params, cfg, x_enc, x_mark_enc, x_dec, batch_y_mark)
    out = jax.block_until_ready(out)
    assert out.shape == (B, cfg["pred_len"], n_feat), out.shape
    assert bool(jnp.all(jnp.isfinite(out)))
    print("KERNEL_OK")
</pallas_src>

<mosaic_0001>
module attributes {stable_mosaic.version = 11 : i64} {
  func.func @_linear_kernel(%arg0: i32, %arg1: memref<288x25xf32, #tpu.memory_space<vmem>>, %arg2: memref<25x32xf32, #tpu.memory_space<vmem>>, %arg3: memref<1x32xf32, #tpu.memory_space<vmem>>, %arg4: memref<288x32xf32, #tpu.memory_space<vmem>>) attributes {dimension_semantics = [#tpu.dimension_semantics<arbitrary>], iteration_bounds = array<i64: 1>, scalar_prefetch = 0 : i64, scratch_operands = 0 : i64, tpu.core_type = #tpu.core_type<tc>, window_params = [{pipeline_mode = #tpu.pipeline_mode<synchronous>, transform_indices = @transform_0, window_bounds = array<i64: 288, 25>}, {pipeline_mode = #tpu.pipeline_mode<synchronous>, transform_indices = @transform_1, window_bounds = array<i64: 25, 32>}, {pipeline_mode = #tpu.pipeline_mode<synchronous>, transform_indices = @transform_2, window_bounds = array<i64: 1, 32>}, {pipeline_mode = #tpu.pipeline_mode<synchronous>, transform_indices = @transform_3, window_bounds = array<i64: 288, 32>}]} {
    %c0 = arith.constant 0 : index
    %c0_0 = arith.constant 0 : index
    %0 = vector.load %arg1[%c0, %c0_0] : memref<288x25xf32, #tpu.memory_space<vmem>>, vector<288x25xf32>
    %c0_1 = arith.constant 0 : index
    %c0_2 = arith.constant 0 : index
    %1 = vector.load %arg2[%c0_1, %c0_2] : memref<25x32xf32, #tpu.memory_space<vmem>>, vector<25x32xf32>
    %cst = arith.constant dense<0.000000e+00> : vector<288x32xf32>
    %2 = tpu.matmul %0, %1, %cst {dimension_numbers = #tpu.dot_dimension_numbers<[1], [0], [0], [1], [0, 0, 1, 1], [], []>} : vector<288x25xf32>, vector<25x32xf32>, vector<288x32xf32> -> vector<288x32xf32>
    %c0_3 = arith.constant 0 : index
    %c0_4 = arith.constant 0 : index
    %3 = vector.load %arg3[%c0_3, %c0_4] : memref<1x32xf32, #tpu.memory_space<vmem>>, vector<1x32xf32>
    %4 = vector.broadcast %3 : vector<1x32xf32> to vector<288x32xf32>
    %5 = arith.addf %2, %4 : vector<288x32xf32>
    %c0_5 = arith.constant 0 : index
    %c0_6 = arith.constant 0 : index
    %6 = vector.load %arg4[%c0_5, %c0_6] : memref<288x32xf32, #tpu.memory_space<vmem>>, vector<288x32xf32>
    tpu.vector_store %arg4[%c0_5, %c0_6], %5 {strides = array<i32>} : memref<288x32xf32, #tpu.memory_space<vmem>>, vector<288x32xf32>,
    return
  }
  func.func @transform_0(%arg0: i32) -> (i32, i32) {
    %c0_i32 = arith.constant 0 : i32
    %c0_i32_0 = arith.constant 0 : i32
    %c0_i32_1 = arith.constant 0 : i32
    return %c0_i32, %c0_i32_0 : i32, i32
  }
  func.func @transform_1(%arg0: i32) -> (i32, i32) {
    %c0_i32 = arith.constant 0 : i32
    %c0_i32_0 = arith.constant 0 : i32
    %c0_i32_1 = arith.constant 0 : i32
    return %c0_i32, %c0_i32_0 : i32, i32
  }
  func.func @transform_2(%arg0: i32) -> (i32, i32) {
    %c0_i32 = arith.constant 0 : i32
    %c0_i32_0 = arith.constant 0 : i32
    %c0_i32_1 = arith.constant 0 : i32
    return %c0_i32, %c0_i32_0 : i32, i32
  }
  func.func @transform_3(%arg0: i32) -> (i32, i32) {
    %c0_i32 = arith.constant 0 : i32
    %c0_i32_0 = arith.constant 0 : i32
    %c0_i32_1 = arith.constant 0 : i32
    return %c0_i32, %c0_i32_0 : i32, i32
  }
}

module attributes {stable_mosaic.version = 11 : i64} {
  func.func @_linear_kernel(%arg0: i32, %arg1: memref<288x800xf32, #tpu.memory_space<vmem>>, %arg2: memref<800x32xf32, #tpu.memory_space<vmem>>, %arg3: memref<1x32xf32, #tpu.memory_space<vmem>>, %arg4: memref<288x32xf32, #tpu.memory_space<vmem>>) attributes {dimension_semantics = [#tpu.dimension_semantics<arbitrary>], iteration_bounds = array<i64: 1>, scalar_prefetch = 0 : i64, scratch_operands = 0 : i64, tpu.core_type = #tpu.core_type<tc>, window_params = [{pipeline_mode = #tpu.pipeline_mode<synchronous>, transform_indices = @transform_0, window_bounds = array<i64: 288, 800>}, {pipeline_mode = #tpu.pipeline_mode<synchronous>, transform_indices = @transform_1, window_bounds = array<i64: 800, 32>}, {pipeline_mode = #tpu.pipeline_mode<synchronous>, transform_indices = @transform_2, window_bounds = array<i64: 1, 32>}, {pipeline_mode = #tpu.pipeline_mode<synchronous>, transform_indices = @transform_3, window_bounds = array<i64: 288, 32>}]} {
    %c0 = arith.constant 0 : index
    %c0_0 = arith.constant 0 : index
    %0 = vector.load %arg1[%c0, %c0_0] : memref<288x800xf32, #tpu.memory_space<vmem>>, vector<288x800xf32>
    %c0_1 = arith.constant 0 : index
    %c0_2 = arith.constant 0 : index
    %1 = vector.load %arg2[%c0_1, %c0_2] : memref<800x32xf32, #tpu.memory_space<vmem>>, vector<800x32xf32>
    %cst = arith.constant dense<0.000000e+00> : vector<288x32xf32>
    %2 = tpu.matmul %0, %1, %cst {dimension_numbers = #tpu.dot_dimension_numbers<[1], [0], [0], [1], [0, 0, 1, 1], [], []>} : vector<288x800xf32>, vector<800x32xf32>, vector<288x32xf32> -> vector<288x32xf32>
    %c0_3 = arith.constant 0 : index
    %c0_4 = arith.constant 0 : index
    %3 = vector.load %arg3[%c0_3, %c0_4] : memref<1x32xf32, #tpu.memory_space<vmem>>, vector<1x32xf32>
    %4 = vector.broadcast %3 : vector<1x32xf32> to vector<288x32xf32>
    %5 = arith.addf %2, %4 : vector<288x32xf32>
    %c0_5 = arith.constant 0 : index
    %c0_6 = arith.constant 0 : index
    %6 = vector.load %arg4[%c0_5, %c0_6] : memref<288x32xf32, #tpu.memory_space<vmem>>, vector<288x32xf32>
    tpu.vector_store %arg4[%c0_5, %c0_6], %5 {strides = array<i32>} : memref<288x32xf32, #tpu.memory_space<vmem>>, vector<288x32xf32>,
    return
  }
  func.func @transform_0(%arg0: i32) -> (i32, i32) {
    %c0_i32 = arith.constant 0 : i32
    %c0_i32_0 = arith.constant 0 : i32
    %c0_i32_1 = arith.constant 0 : i32
    return %c0_i32, %c0_i32_0 : i32, i32
  }
  func.func @transform_1(%arg0: i32) -> (i32, i32) {
    %c0_i32 = arith.constant 0 : i32
    %c0_i32_0 = arith.constant 0 : i32
    %c0_i32_1 = arith.constant 0 : i32
    return %c0_i32, %c0_i32_0 : i32, i32
  }
  func.func @transform_2(%arg0: i32) -> (i32, i32) {
    %c0_i32 = arith.constant 0 : i32
    %c0_i32_0 = arith.constant 0 : i32
    %c0_i32_1 = arith.constant 0 : i32
    return %c0_i32, %c0_i32_0 : i32, i32
  }
  func.func @transform_3(%arg0: i32) -> (i32, i32) {
    %c0_i32 = arith.constant 0 : i32
    %c0_i32_0 = arith.constant 0 : i32
    %c0_i32_1 = arith.constant 0 : i32
    return %c0_i32, %c0_i32_0 : i32, i32
  }
}

module attributes {stable_mosaic.version = 11 : i64} {
  func.func @_feature_attn_kernel(%arg0: i32, %arg1: memref<1x24x6xf32, #tpu.memory_space<vmem>>, %arg2: memref<6x34xf32, #tpu.memory_space<vmem>>, %arg3: memref<1x34xf32, #tpu.memory_space<vmem>>, %arg4: memref<32x2xf32, #tpu.memory_space<vmem>>, %arg5: memref<1x2xf32, #tpu.memory_space<vmem>>, %arg6: memref<2x6xf32, #tpu.memory_space<vmem>>, %arg7: memref<2x2xf32, #tpu.memory_space<vmem>>, %arg8: memref<1x2xf32, #tpu.memory_space<vmem>>, %arg9: memref<1x24x2xf32, #tpu.memory_space<vmem>>) attributes {dimension_semantics = [#tpu.dimension_semantics<parallel>], iteration_bounds = array<i64: 2>, scalar_prefetch = 0 : i64, scratch_operands = 0 : i64, tpu.core_type = #tpu.core_type<tc>, window_params = [{transform_indices = @transform_0, window_bounds = array<i64: 1, 24, 6>}, {pipeline_mode = #tpu.pipeline_mode<synchronous>, transform_indices = @transform_1, window_bounds = array<i64: 6, 34>}, {pipeline_mode = #tpu.pipeline_mode<synchronous>, transform_indices = @transform_2, window_bounds = array<i64: 1, 34>}, {pipeline_mode = #tpu.pipeline_mode<synchronous>, transform_indices = @transform_3, window_bounds = array<i64: 32, 2>}, {pipeline_mode = #tpu.pipeline_mode<synchronous>, transform_indices = @transform_4, window_bounds = array<i64: 1, 2>}, {pipeline_mode = #tpu.pipeline_mode<synchronous>, transform_indices = @transform_5, window_bounds = array<i64: 2, 6>}, {pipeline_mode = #tpu.pipeline_mode<synchronous>, transform_indices = @transform_6, window_bounds = array<i64: 2, 2>}, {pipeline_mode = #tpu.pipeline_mode<synchronous>, transform_indices = @transform_7, window_bounds = array<i64: 1, 2>}, {transform_indices = @transform_8, window_bounds = array<i64: 1, 24, 2>}]} {
    %c0 = arith.constant 0 : index
    %c0_0 = arith.constant 0 : index
    %c0_1 = arith.constant 0 : index
    %0 = vector.load %arg1[%c0, %c0_0, %c0_1] : memref<1x24x6xf32, #tpu.memory_space<vmem>>, vector<1x24x6xf32>
    %1 = vector.shape_cast %0 : vector<1x24x6xf32> to vector<24x6xf32>
    %c0_2 = arith.constant 0 : index
    %c0_3 = arith.constant 0 : index
    %2 = vector.load %arg2[%c0_2, %c0_3] : memref<6x34xf32, #tpu.memory_space<vmem>>, vector<6x34xf32>
    %c0_4 = arith.constant 0 : index
    %c0_5 = arith.constant 0 : index
    %3 = vector.load %arg3[%c0_4, %c0_5] : memref<1x34xf32, #tpu.memory_space<vmem>>, vector<1x34xf32>
    %c0_6 = arith.constant 0 : index
    %c0_7 = arith.constant 0 : index
    %4 = vector.load %arg4[%c0_6, %c0_7] : memref<32x2xf32, #tpu.memory_space<vmem>>, vector<32x2xf32>
    %c0_8 = arith.constant 0 : index
    %c0_9 = arith.constant 0 : index
    %5 = vector.load %arg5[%c0_8, %c0_9] : memref<1x2xf32, #tpu.memory_space<vmem>>, vector<1x2xf32>
    %cst = arith.constant dense<0.000000e+00> : vector<24x34xf32>
    %6 = tpu.matmul %1, %2, %cst {dimension_numbers = #tpu.dot_dimension_numbers<[1], [0], [0], [1], [0, 0, 1, 1], [], []>} : vector<24x6xf32>, vector<6x34xf32>, vector<24x34xf32> -> vector<24x34xf32>
    %7 = vector.broadcast %3 : vector<1x34xf32> to vector<24x34xf32>
    %8 = arith.addf %6, %7 : vector<24x34xf32>
    %9 = vector.extract_strided_slice %8 {offsets = [0, 0], sizes = [24, 32], strides = [1, 1]} : vector<24x34xf32> to vector<24x32xf32>
    %cst_10 = arith.constant 0.000000e+00 : f32
    %10 = vector.broadcast %cst_10 : f32 to vector<24x32xf32>
    %11 = arith.maximumf %9, %10 : vector<24x32xf32>
    %12 = vector.extract_strided_slice %8 {offsets = [0, 32], sizes = [24, 2], strides = [1, 1]} : vector<24x34xf32> to vector<24x2xf32>
    %cst_11 = arith.constant dense<0.000000e+00> : vector<24x2xf32>
    %13 = tpu.matmul %11, %4, %cst_11 {dimension_numbers = #tpu.dot_dimension_numbers<[1], [0], [0], [1], [0, 0, 1, 1], [], []>} : vector<24x32xf32>, vector<32x2xf32>, vector<24x2xf32> -> vector<24x2xf32>
    %14 = vector.broadcast %5 : vector<1x2xf32> to vector<24x2xf32>
    %15 = arith.addf %13, %14 : vector<24x2xf32>
    %16 = arith.addf %15, %12 : vector<24x2xf32>
    %cst_12 = arith.constant dense<0.000000e+00> : vector<24xf32>
    %17 = vector.multi_reduction <add>, %16, %cst_12 [1] : vector<24x2xf32> to vector<24xf32>
    %18 = vector.shape_cast %17 : vector<24xf32> to vector<24x1xf32>
    %cst_13 = arith.constant 2.000000e+00 : f32
    %19 = vector.broadcast %cst_13 : f32 to vector<24x1xf32>
    %20 = arith.divf %18, %19 : vector<24x1xf32>
    %21 = vector.broadcast %20 : vector<24x1xf32> to vector<24x2xf32>
    %22 = arith.subf %16, %21 : vector<24x2xf32>
    %23 = arith.mulf %22, %22 : vector<24x2xf32>
    %cst_14 = arith.constant dense<0.000000e+00> : vector<24xf32>
    %24 = vector.multi_reduction <add>, %23, %cst_14 [1] : vector<24x2xf32> to vector<24xf32>
    %25 = vector.shape_cast %24 : vector<24xf32> to vector<24x1xf32>
    %cst_15 = arith.constant 2.000000e+00 : f32
    %26 = vector.broadcast %cst_15 : f32 to vector<24x1xf32>
    %27 = arith.divf %25, %26 : vector<24x1xf32>
    %28 = vector.broadcast %20 : vector<24x1xf32> to vector<24x2xf32>
    %29 = arith.subf %16, %28 : vector<24x2xf32>
    %cst_16 = arith.constant 9.99999974E-6 : f32
    %30 = vector.broadcast %cst_16 : f32 to vector<24x1xf32>
    %31 = arith.addf %27, %30 : vector<24x1xf32>
    %32 = math.rsqrt %31 : vector<24x1xf32>
    %33 = vector.broadcast %32 : vector<24x1xf32> to vector<24x2xf32>
    %34 = arith.mulf %29, %33 : vector<24x2xf32>
    %c0_17 = arith.constant 0 : index
    %c0_18 = arith.constant 0 : index
    %35 = vector.load %arg6[%c0_17, %c0_18] : memref<2x6xf32, #tpu.memory_space<vmem>>, vector<2x6xf32>
    %cst_19 = arith.constant dense<0.000000e+00> : vector<24x6xf32>
    %36 = tpu.matmul %34, %35, %cst_19 {dimension_numbers = #tpu.dot_dimension_numbers<[1], [0], [0], [1], [0, 0, 1, 1], [], []>} : vector<24x2xf32>, vector<2x6xf32>, vector<24x6xf32> -> vector<24x6xf32>
    %37 = vector.extract_strided_slice %36 {offsets = [0, 0], sizes = [24, 1], strides = [1, 1]} : vector<24x6xf32> to vector<24x1xf32>
    %38 = vector.extract_strided_slice %36 {offsets = [0, 2], sizes = [24, 1], strides = [1, 1]} : vector<24x6xf32> to vector<24x1xf32>
    %39 = vector.extract_strided_slice %36 {offsets = [0, 4], sizes = [24, 1], strides = [1, 1]} : vector<24x6xf32> to vector<24x1xf32>
    %cst_20 = arith.constant dense<0.000000e+00> : vector<24x24xf32>
    %40 = tpu.matmul %37, %38, %cst_20 {dimension_numbers = #tpu.dot_dimension_numbers<[1], [1], [0], [0], [0, 0, 1, 0], [], []>} : vector<24x1xf32>, vector<24x1xf32>, vector<24x24xf32> -> vector<24x24xf32>
    %cst_21 = arith.constant 1.000000e+00 : f32
    %41 = vector.broadcast %cst_21 : f32 to vector<24x24xf32>
    %42 = arith.mulf %40, %41 : vector<24x24xf32>
    %cst_22 = arith.constant dense<0xFF800000> : vector<24xf32>
    %43 = vector.multi_reduction <maximumf>, %42, %cst_22 [1] : vector<24x24xf32> to vector<24xf32>
    %44 = vector.shape_cast %43 : vector<24xf32> to vector<24x1xf32>
    %45 = vector.broadcast %44 : vector<24x1xf32> to vector<24x24xf32>
    %46 = arith.subf %42, %45 : vector<24x24xf32>
    %47 = math.exp %46 : vector<24x24xf32>
    %cst_23 = arith.constant dense<0.000000e+00> : vector<24xf32>
    %48 = vector.multi_reduction <add>, %47, %cst_23 [1] : vector<24x24xf32> to vector<24xf32>
    %49 = vector.shape_cast %48 : vector<24xf32> to vector<24x1xf32>
    %50 = tpu.reciprocal %49 {approx = true} : vector<24x1xf32> -> vector<24x1xf32>
    %51 = vector.broadcast %50 : vector<24x1xf32> to vector<24x24xf32>
    %52 = arith.mulf %47, %51 : vector<24x24xf32>
    %cst_24 = arith.constant dense<0.000000e+00> : vector<24x1xf32>
    %53 = tpu.matmul %52, %39, %cst_24 {dimension_numbers = #tpu.dot_dimension_numbers<[1], [0], [0], [1], [0, 0, 1, 1], [], []>} : vector<24x24xf32>, vector<24x1xf32>, vector<24x1xf32> -> vector<24x1xf32>
    %54 = vector.extract_strided_slice %36 {offsets = [0, 1], sizes = [24, 1], strides = [1, 1]} : vector<24x6xf32> to vector<24x1xf32>
    %55 = vector.extract_strided_slice %36 {offsets = [0, 3], sizes = [24, 1], strides = [1, 1]} : vector<24x6xf32> to vector<24x1xf32>
    %56 = vector.extract_strided_slice %36 {offsets = [0, 5], sizes = [24, 1], strides = [1, 1]} : vector<24x6xf32> to vector<24x1xf32>
    %cst_25 = arith.constant dense<0.000000e+00> : vector<24x24xf32>
    %57 = tpu.matmul %54, %55, %cst_25 {dimension_numbers = #tpu.dot_dimension_numbers<[1], [1], [0], [0], [0, 0, 1, 0], [], []>} : vector<24x1xf32>, vector<24x1xf32>, vector<24x24xf32> -> vector<24x24xf32>
    %cst_26 = arith.constant 1.000000e+00 : f32
    %58 = vector.broadcast %cst_26 : f32 to vector<24x24xf32>
    %59 = arith.mulf %57, %58 : vector<24x24xf32>
    %cst_27 = arith.constant dense<0xFF800000> : vector<24xf32>
    %60 = vector.multi_reduction <maximumf>, %59, %cst_27 [1] : vector<24x24xf32> to vector<24xf32>
    %61 = vector.shape_cast %60 : vector<24xf32> to vector<24x1xf32>
    %62 = vector.broadcast %61 : vector<24x1xf32> to vector<24x24xf32>
    %63 = arith.subf %59, %62 : vector<24x24xf32>
    %64 = math.exp %63 : vector<24x24xf32>
    %cst_28 = arith.constant dense<0.000000e+00> : vector<24xf32>
    %65 = vector.multi_reduction <add>, %64, %cst_28 [1] : vector<24x24xf32> to vector<24xf32>
    %66 = vector.shape_cast %65 : vector<24xf32> to vector<24x1xf32>
    %67 = tpu.reciprocal %66 {approx = true} : vector<24x1xf32> -> vector<24x1xf32>
    %68 = vector.broadcast %67 : vector<24x1xf32> to vector<24x24xf32>
    %69 = arith.mulf %64, %68 : vector<24x24xf32>
    %cst_29 = arith.constant dense<0.000000e+00> : vector<24x1xf32>
    %70 = tpu.matmul %69, %56, %cst_29 {dimension_numbers = #tpu.dot_dimension_numbers<[1], [0], [0], [1], [0, 0, 1, 1], [], []>} : vector<24x24xf32>, vector<24x1xf32>, vector<24x1xf32> -> vector<24x1xf32>
    %71 = tpu.concatenate %53, %70 in 1 : vector<24x1xf32>, vector<24x1xf32> -> vector<24x2xf32>
    %c0_30 = arith.constant 0 : index
    %c0_31 = arith.constant 0 : index
    %72 = vector.load %arg7[%c0_30, %c0_31] : memref<2x2xf32, #tpu.memory_space<vmem>>, vector<2x2xf32>
    %cst_32 = arith.constant dense<0.000000e+00> : vector<24x2xf32>
    %73 = tpu.matmul %71, %72, %cst_32 {dimension_numbers = #tpu.dot_dimension_numbers<[1], [0], [0], [1], [0, 0, 1, 1], [], []>} : vector<24x2xf32>, vector<2x2xf32>, vector<24x2xf32> -> vector<24x2xf32>
    %c0_33 = arith.constant 0 : index
    %c0_34 = arith.constant 0 : index
    %74 = vector.load %arg8[%c0_33, %c0_34] : memref<1x2xf32, #tpu.memory_space<vmem>>, vector<1x2xf32>
    %75 = vector.broadcast %74 : vector<1x2xf32> to vector<24x2xf32>
    %76 = arith.addf %73, %75 : vector<24x2xf32>
    %c0_35 = arith.constant 0 : index
    %c0_36 = arith.constant 0 : index
    %c0_37 = arith.constant 0 : index
    %77 = vector.load %arg9[%c0_35, %c0_36, %c0_37] : memref<1x24x2xf32, #tpu.memory_space<vmem>>, vector<1x24x2xf32>
    %78 = vector.shape_cast %77 : vector<1x24x2xf32> to vector<24x2xf32>
    %79 = vector.shape_cast %76 : vector<24x2xf32> to vector<1x24x2xf32>
    tpu.vector_store %arg9[%c0_35, %c0_36, %c0_37], %79 {strides = array<i32>} : memref<1x24x2xf32, #tpu.memory_space<vmem>>, vector<1x24x2xf32>,
    return
  }
  func.func @transform_0(%arg0: i32) -> (i32, i32, i32) {
    %c0_i32 = arith.constant 0 : i32
    %c0_i32_0 = arith.constant 0 : i32
    %c0_i32_1 = arith.constant 0 : i32
    return %arg0, %c0_i32, %c0_i32_0 : i32, i32, i32
  }
  func.func @transform_1(%arg0: i32) -> (i32, i32) {
    %c0_i32 = arith.constant 0 : i32
    %c0_i32_0 = arith.constant 0 : i32
    %c0_i32_1 = arith.constant 0 : i32
    return %c0_i32, %c0_i32_0 : i32, i32
  }
  func.func @transform_2(%arg0: i32) -> (i32, i32) {
    %c0_i32 = arith.constant 0 : i32
    %c0_i32_0 = arith.constant 0 : i32
    %c0_i32_1 = arith.constant 0 : i32
    return %c0_i32, %c0_i32_0 : i32, i32
  }
  func.func @transform_3(%arg0: i32) -> (i32, i32) {
    %c0_i32 = arith.constant 0 : i32
    %c0_i32_0 = arith.constant 0 : i32
    %c0_i32_1 = arith.constant 0 : i32
    return %c0_i32, %c0_i32_0 : i32, i32
  }
  func.func @transform_4(%arg0: i32) -> (i32, i32) {
    %c0_i32 = arith.constant 0 : i32
    %c0_i32_0 = arith.constant 0 : i32
    %c0_i32_1 = arith.constant 0 : i32
    return %c0_i32, %c0_i32_0 : i32, i32
  }
  func.func @transform_5(%arg0: i32) -> (i32, i32) {
    %c0_i32 = arith.constant 0 : i32
    %c0_i32_0 = arith.constant 0 : i32
    %c0_i32_1 = arith.constant 0 : i32
    return %c0_i32, %c0_i32_0 : i32, i32
  }
  func.func @transform_6(%arg0: i32) -> (i32, i32) {
    %c0_i32 = arith.constant 0 : i32
    %c0_i32_0 = arith.constant 0 : i32
    %c0_i32_1 = arith.constant 0 : i32
    return %c0_i32, %c0_i32_0 : i32, i32
  }
  func.func @transform_7(%arg0: i32) -> (i32, i32) {
    %c0_i32 = arith.constant 0 : i32
    %c0_i32_0 = arith.constant 0 : i32
    %c0_i32_1 = arith.constant 0 : i32
    return %c0_i32, %c0_i32_0 : i32, i32
  }
  func.func @transform_8(%arg0: i32) -> (i32, i32, i32) {
    %c0_i32 = arith.constant 0 : i32
    %c0_i32_0 = arith.constant 0 : i32
    %c0_i32_1 = arith.constant 0 : i32
    return %arg0, %c0_i32, %c0_i32_0 : i32, i32, i32
  }
}

module attributes {stable_mosaic.version = 11 : i64} {
  func.func @_trunk_kernel(%arg0: i32, %arg1: memref<6x64xf32, #tpu.memory_space<vmem>>, %arg2: memref<6x16xf32, #tpu.memory_space<vmem>>, %arg3: memref<64x64xf32, #tpu.memory_space<vmem>>, %arg4: memref<1x64xf32, #tpu.memory_space<vmem>>, %arg5: memref<32x32xf32, #tpu.memory_space<vmem>>, %arg6: memref<1x32xf32, #tpu.memory_space<vmem>>, %arg7: memref<32x64xf32, #tpu.memory_space<vmem>>, %arg8: memref<1x64xf32, #tpu.memory_space<vmem>>, %arg9: memref<32x32xf32, #tpu.memory_space<vmem>>, %arg10: memref<1x32xf32, #tpu.memory_space<vmem>>, %arg11: memref<32x64xf32, #tpu.memory_space<vmem>>, %arg12: memref<1x64xf32, #tpu.memory_space<vmem>>, %arg13: memref<32x32xf32, #tpu.memory_space<vmem>>, %arg14: memref<1x32xf32, #tpu.memory_space<vmem>>, %arg15: memref<32x40xf32, #tpu.memory_space<vmem>>, %arg16: memref<1x40xf32, #tpu.memory_space<vmem>>, %arg17: memref<32x8xf32, #tpu.memory_space<vmem>>, %arg18: memref<1x8xf32, #tpu.memory_space<vmem>>, %arg19: memref<16x8xf32, #tpu.memory_space<vmem>>, %arg20: memref<1x8xf32, #tpu.memory_space<vmem>>, %arg21: memref<6x8xf32, #tpu.memory_space<vmem>>, %arg22: memref<6x8xf32, #tpu.memory_space<vmem>>) attributes {dimension_semantics = [#tpu.dimension_semantics<arbitrary>], iteration_bounds = array<i64: 1>, scalar_prefetch = 0 : i64, scratch_operands = 0 : i64, tpu.core_type = #tpu.core_type<tc>, window_params = [{pipeline_mode = #tpu.pipeline_mode<synchronous>, transform_indices = @transform_0, window_bounds = array<i64: 6, 64>}, {pipeline_mode = #tpu.pipeline_mode<synchronous>, transform_indices = @transform_1, window_bounds = array<i64: 6, 16>}, {pipeline_mode = #tpu.pipeline_mode<synchronous>, transform_indices = @transform_2, window_bounds = array<i64: 64, 64>}, {pipeline_mode = #tpu.pipeline_mode<synchronous>, transform_indices = @transform_3, window_bounds = array<i64: 1, 64>}, {pipeline_mode = #tpu.pipeline_mode<synchronous>, transform_indices = @transform_4, window_bounds = array<i64: 32, 32>}, {pipeline_mode = #tpu.pipeline_mode<synchronous>, transform_indices = @transform_5, window_bounds = array<i64: 1, 32>}, {pipeline_mode = #tpu.pipeline_mode<synchronous>, transform_indices = @transform_6, window_bounds = array<i64: 32, 64>}, {pipeline_mode = #tpu.pipeline_mode<synchronous>, transform_indices = @transform_7, window_bounds = array<i64: 1, 64>}, {pipeline_mode = #tpu.pipeline_mode<synchronous>, transform_indices = @transform_8, window_bounds = array<i64: 32, 32>}, {pipeline_mode = #tpu.pipeline_mode<synchronous>, transform_indices = @transform_9, window_bounds = array<i64: 1, 32>}, {pipeline_mode = #tpu.pipeline_mode<synchronous>, transform_indices = @transform_10, window_bounds = array<i64: 32, 64>}, {pipeline_mode = #tpu.pipeline_mode<synchronous>, transform_indices = @transform_11, window_bounds = array<i64: 1, 64>}, {pipeline_mode = #tpu.pipeline_mode<synchronous>, transform_indices = @transform_12, window_bounds = array<i64: 32, 32>}, {pipeline_mode = #tpu.pipeline_mode<synchronous>, transform_indices = @transform_13, window_bounds = array<i64: 1, 32>}, {pipeline_mode = #tpu.pipeline_mode<synchronous>, transform_indices = @transform_14, window_bounds = array<i64: 32, 40>}, {pipeline_mode = #tpu.pipeline_mode<synchronous>, transform_indices = @transform_15, window_bounds = array<i64: 1, 40>}, {pipeline_mode = #tpu.pipeline_mode<synchronous>, transform_indices = @transform_16, window_bounds = array<i64: 32, 8>}, {pipeline_mode = #tpu.pipeline_mode<synchronous>, transform_indices = @transform_17, window_bounds = array<i64: 1, 8>}, {pipeline_mode = #tpu.pipeline_mode<synchronous>, transform_indices = @transform_18, window_bounds = array<i64: 16, 8>}, {pipeline_mode = #tpu.pipeline_mode<synchronous>, transform_indices = @transform_19, window_bounds = array<i64: 1, 8>}, {pipeline_mode = #tpu.pipeline_mode<synchronous>, transform_indices = @transform_20, window_bounds = array<i64: 6, 8>}, {pipeline_mode = #tpu.pipeline_mode<synchronous>, transform_indices = @transform_21, window_bounds = array<i64: 6, 8>}]} {
    %c0 = arith.constant 0 : index
    %c0_0 = arith.constant 0 : index
    %0 = vector.load %arg1[%c0, %c0_0] : memref<6x64xf32, #tpu.memory_space<vmem>>, vector<6x64xf32>
    %c0_1 = arith.constant 0 : index
    %c0_2 = arith.constant 0 : index
    %1 = vector.load %arg3[%c0_1, %c0_2] : memref<64x64xf32, #tpu.memory_space<vmem>>, vector<64x64xf32>
    %c0_3 = arith.constant 0 : index
    %c0_4 = arith.constant 0 : index
    %2 = vector.load %arg4[%c0_3, %c0_4] : memref<1x64xf32, #tpu.memory_space<vmem>>, vector<1x64xf32>
    %c0_5 = arith.constant 0 : index
    %c0_6 = arith.constant 0 : index
    %3 = vector.load %arg5[%c0_5, %c0_6] : memref<32x32xf32, #tpu.memory_space<vmem>>, vector<32x32xf32>
    %c0_7 = arith.constant 0 : index
    %c0_8 = arith.constant 0 : index
    %4 = vector.load %arg6[%c0_7, %c0_8] : memref<1x32xf32, #tpu.memory_space<vmem>>, vector<1x32xf32>
    %cst = arith.constant dense<0.000000e+00> : vector<6x64xf32>
    %5 = tpu.matmul %0, %1, %cst {dimension_numbers = #tpu.dot_dimension_numbers<[1], [0], [0], [1], [0, 0, 1, 1], [], []>} : vector<6x64xf32>, vector<64x64xf32>, vector<6x64xf32> -> vector<6x64xf32>
    %6 = vector.broadcast %2 : vector<1x64xf32> to vector<6x64xf32>
    %7 = arith.addf %5, %6 : vector<6x64xf32>
    %8 = vector.extract_strided_slice %7 {offsets = [0, 0], sizes = [6, 32], strides = [1, 1]} : vector<6x64xf32> to vector<6x32xf32>
    %cst_9 = arith.constant 0.000000e+00 : f32
    %9 = vector.broadcast %cst_9 : f32 to vector<6x32xf32>
    %10 = arith.maximumf %8, %9 : vector<6x32xf32>
    %11 = vector.extract_strided_slice %7 {offsets = [0, 32], sizes = [6, 32], strides = [1, 1]} : vector<6x64xf32> to vector<6x32xf32>
    %cst_10 = arith.constant dense<0.000000e+00> : vector<6x32xf32>
    %12 = tpu.matmul %10, %3, %cst_10 {dimension_numbers = #tpu.dot_dimension_numbers<[1], [0], [0], [1], [0, 0, 1, 1], [], []>} : vector<6x32xf32>, vector<32x32xf32>, vector<6x32xf32> -> vector<6x32xf32>
    %13 = vector.broadcast %4 : vector<1x32xf32> to vector<6x32xf32>
    %14 = arith.addf %12, %13 : vector<6x32xf32>
    %15 = arith.addf %14, %11 : vector<6x32xf32>
    %cst_11 = arith.constant dense<0.000000e+00> : vector<6xf32>
    %16 = vector.multi_reduction <add>, %15, %cst_11 [1] : vector<6x32xf32> to vector<6xf32>
    %17 = vector.shape_cast %16 : vector<6xf32> to vector<6x1xf32>
    %cst_12 = arith.constant 3.200000e+01 : f32
    %18 = vector.broadcast %cst_12 : f32 to vector<6x1xf32>
    %19 = arith.divf %17, %18 : vector<6x1xf32>
    %20 = vector.broadcast %19 : vector<6x1xf32> to vector<6x32xf32>
    %21 = arith.subf %15, %20 : vector<6x32xf32>
    %22 = arith.mulf %21, %21 : vector<6x32xf32>
    %cst_13 = arith.constant dense<0.000000e+00> : vector<6xf32>
    %23 = vector.multi_reduction <add>, %22, %cst_13 [1] : vector<6x32xf32> to vector<6xf32>
    %24 = vector.shape_cast %23 : vector<6xf32> to vector<6x1xf32>
    %cst_14 = arith.constant 3.200000e+01 : f32
    %25 = vector.broadcast %cst_14 : f32 to vector<6x1xf32>
    %26 = arith.divf %24, %25 : vector<6x1xf32>
    %27 = vector.broadcast %19 : vector<6x1xf32> to vector<6x32xf32>
    %28 = arith.subf %15, %27 : vector<6x32xf32>
    %cst_15 = arith.constant 9.99999974E-6 : f32
    %29 = vector.broadcast %cst_15 : f32 to vector<6x1xf32>
    %30 = arith.addf %26, %29 : vector<6x1xf32>
    %31 = math.rsqrt %30 : vector<6x1xf32>
    %32 = vector.broadcast %31 : vector<6x1xf32> to vector<6x32xf32>
    %33 = arith.mulf %28, %32 : vector<6x32xf32>
    %c0_16 = arith.constant 0 : index
    %c0_17 = arith.constant 0 : index
    %34 = vector.load %arg7[%c0_16, %c0_17] : memref<32x64xf32, #tpu.memory_space<vmem>>, vector<32x64xf32>
    %c0_18 = arith.constant 0 : index
    %c0_19 = arith.constant 0 : index
    %35 = vector.load %arg8[%c0_18, %c0_19] : memref<1x64xf32, #tpu.memory_space<vmem>>, vector<1x64xf32>
    %c0_20 = arith.constant 0 : index
    %c0_21 = arith.constant 0 : index
    %36 = vector.load %arg9[%c0_20, %c0_21] : memref<32x32xf32, #tpu.memory_space<vmem>>, vector<32x32xf32>
    %c0_22 = arith.constant 0 : index
    %c0_23 = arith.constant 0 : index
    %37 = vector.load %arg10[%c0_22, %c0_23] : memref<1x32xf32, #tpu.memory_space<vmem>>, vector<1x32xf32>
    %cst_24 = arith.constant dense<0.000000e+00> : vector<6x64xf32>
    %38 = tpu.matmul %33, %34, %cst_24 {dimension_numbers = #tpu.dot_dimension_numbers<[1], [0], [0], [1], [0, 0, 1, 1], [], []>} : vector<6x32xf32>, vector<32x64xf32>, vector<6x64xf32> -> vector<6x64xf32>
    %39 = vector.broadcast %35 : vector<1x64xf32> to vector<6x64xf32>
    %40 = arith.addf %38, %39 : vector<6x64xf32>
    %41 = vector.extract_strided_slice %40 {offsets = [0, 0], sizes = [6, 32], strides = [1, 1]} : vector<6x64xf32> to vector<6x32xf32>
    %cst_25 = arith.constant 0.000000e+00 : f32
    %42 = vector.broadcast %cst_25 : f32 to vector<6x32xf32>
    %43 = arith.maximumf %41, %42 : vector<6x32xf32>
    %44 = vector.extract_strided_slice %40 {offsets = [0, 32], sizes = [6, 32], strides = [1, 1]} : vector<6x64xf32> to vector<6x32xf32>
    %cst_26 = arith.constant dense<0.000000e+00> : vector<6x32xf32>
    %45 = tpu.matmul %43, %36, %cst_26 {dimension_numbers = #tpu.dot_dimension_numbers<[1], [0], [0], [1], [0, 0, 1, 1], [], []>} : vector<6x32xf32>, vector<32x32xf32>, vector<6x32xf32> -> vector<6x32xf32>
    %46 = vector.broadcast %37 : vector<1x32xf32> to vector<6x32xf32>
    %47 = arith.addf %45, %46 : vector<6x32xf32>
    %48 = arith.addf %47, %44 : vector<6x32xf32>
    %cst_27 = arith.constant dense<0.000000e+00> : vector<6xf32>
    %49 = vector.multi_reduction <add>, %48, %cst_27 [1] : vector<6x32xf32> to vector<6xf32>
    %50 = vector.shape_cast %49 : vector<6xf32> to vector<6x1xf32>
    %cst_28 = arith.constant 3.200000e+01 : f32
    %51 = vector.broadcast %cst_28 : f32 to vector<6x1xf32>
    %52 = arith.divf %50, %51 : vector<6x1xf32>
    %53 = vector.broadcast %52 : vector<6x1xf32> to vector<6x32xf32>
    %54 = arith.subf %48, %53 : vector<6x32xf32>
    %55 = arith.mulf %54, %54 : vector<6x32xf32>
    %cst_29 = arith.constant dense<0.000000e+00> : vector<6xf32>
    %56 = vector.multi_reduction <add>, %55, %cst_29 [1] : vector<6x32xf32> to vector<6xf32>
    %57 = vector.shape_cast %56 : vector<6xf32> to vector<6x1xf32>
    %cst_30 = arith.constant 3.200000e+01 : f32
    %58 = vector.broadcast %cst_30 : f32 to vector<6x1xf32>
    %59 = arith.divf %57, %58 : vector<6x1xf32>
    %60 = vector.broadcast %52 : vector<6x1xf32> to vector<6x32xf32>
    %61 = arith.subf %48, %60 : vector<6x32xf32>
    %cst_31 = arith.constant 9.99999974E-6 : f32
    %62 = vector.broadcast %cst_31 : f32 to vector<6x1xf32>
    %63 = arith.addf %59, %62 : vector<6x1xf32>
    %64 = math.rsqrt %63 : vector<6x1xf32>
    %65 = vector.broadcast %64 : vector<6x1xf32> to vector<6x32xf32>
    %66 = arith.mulf %61, %65 : vector<6x32xf32>
    %c0_32 = arith.constant 0 : index
    %c0_33 = arith.constant 0 : index
    %67 = vector.load %arg11[%c0_32, %c0_33] : memref<32x64xf32, #tpu.memory_space<vmem>>, vector<32x64xf32>
    %c0_34 = arith.constant 0 : index
    %c0_35 = arith.constant 0 : index
    %68 = vector.load %arg12[%c0_34, %c0_35] : memref<1x64xf32, #tpu.memory_space<vmem>>, vector<1x64xf32>
    %c0_36 = arith.constant 0 : index
    %c0_37 = arith.constant 0 : index
    %69 = vector.load %arg13[%c0_36, %c0_37] : memref<32x32xf32, #tpu.memory_space<vmem>>, vector<32x32xf32>
    %c0_38 = arith.constant 0 : index
    %c0_39 = arith.constant 0 : index
    %70 = vector.load %arg14[%c0_38, %c0_39] : memref<1x32xf32, #tpu.memory_space<vmem>>, vector<1x32xf32>
    %cst_40 = arith.constant dense<0.000000e+00> : vector<6x64xf32>
    %71 = tpu.matmul %66, %67, %cst_40 {dimension_numbers = #tpu.dot_dimension_numbers<[1], [0], [0], [1], [0, 0, 1, 1], [], []>} : vector<6x32xf32>, vector<32x64xf32>, vector<6x64xf32> -> vector<6x64xf32>
    %72 = vector.broadcast %68 : vector<1x64xf32> to vector<6x64xf32>
    %73 = arith.addf %71, %72 : vector<6x64xf32>
    %74 = vector.extract_strided_slice %73 {offsets = [0, 0], sizes = [6, 32], strides = [1, 1]} : vector<6x64xf32> to vector<6x32xf32>
    %cst_41 = arith.constant 0.000000e+00 : f32
    %75 = vector.broadcast %cst_41 : f32 to vector<6x32xf32>
    %76 = arith.maximumf %74, %75 : vector<6x32xf32>
    %77 = vector.extract_strided_slice %73 {offsets = [0, 32], sizes = [6, 32], strides = [1, 1]} : vector<6x64xf32> to vector<6x32xf32>
    %cst_42 = arith.constant dense<0.000000e+00> : vector<6x32xf32>
    %78 = tpu.matmul %76, %69, %cst_42 {dimension_numbers = #tpu.dot_dimension_numbers<[1], [0], [0], [1], [0, 0, 1, 1], [], []>} : vector<6x32xf32>, vector<32x32xf32>, vector<6x32xf32> -> vector<6x32xf32>
    %79 = vector.broadcast %70 : vector<1x32xf32> to vector<6x32xf32>
    %80 = arith.addf %78, %79 : vector<6x32xf32>
    %81 = arith.addf %80, %77 : vector<6x32xf32>
    %cst_43 = arith.constant dense<0.000000e+00> : vector<6xf32>
    %82 = vector.multi_reduction <add>, %81, %cst_43 [1] : vector<6x32xf32> to vector<6xf32>
    %83 = vector.shape_cast %82 : vector<6xf32> to vector<6x1xf32>
    %cst_44 = arith.constant 3.200000e+01 : f32
    %84 = vector.broadcast %cst_44 : f32 to vector<6x1xf32>
    %85 = arith.divf %83, %84 : vector<6x1xf32>
    %86 = vector.broadcast %85 : vector<6x1xf32> to vector<6x32xf32>
    %87 = arith.subf %81, %86 : vector<6x32xf32>
    %88 = arith.mulf %87, %87 : vector<6x32xf32>
    %cst_45 = arith.constant dense<0.000000e+00> : vector<6xf32>
    %89 = vector.multi_reduction <add>, %88, %cst_45 [1] : vector<6x32xf32> to vector<6xf32>
    %90 = vector.shape_cast %89 : vector<6xf32> to vector<6x1xf32>
    %cst_46 = arith.constant 3.200000e+01 : f32
    %91 = vector.broadcast %cst_46 : f32 to vector<6x1xf32>
    %92 = arith.divf %90, %91 : vector<6x1xf32>
    %93 = vector.broadcast %85 : vector<6x1xf32> to vector<6x32xf32>
    %94 = arith.subf %81, %93 : vector<6x32xf32>
    %cst_47 = arith.constant 9.99999974E-6 : f32
    %95 = vector.broadcast %cst_47 : f32 to vector<6x1xf32>
    %96 = arith.addf %92, %95 : vector<6x1xf32>
    %97 = math.rsqrt %96 : vector<6x1xf32>
    %98 = vector.broadcast %97 : vector<6x1xf32> to vector<6x32xf32>
    %99 = arith.mulf %94, %98 : vector<6x32xf32>
    %c0_48 = arith.constant 0 : index
    %c0_49 = arith.constant 0 : index
    %100 = vector.load %arg15[%c0_48, %c0_49] : memref<32x40xf32, #tpu.memory_space<vmem>>, vector<32x40xf32>
    %c0_50 = arith.constant 0 : index
    %c0_51 = arith.constant 0 : index
    %101 = vector.load %arg16[%c0_50, %c0_51] : memref<1x40xf32, #tpu.memory_space<vmem>>, vector<1x40xf32>
    %c0_52 = arith.constant 0 : index
    %c0_53 = arith.constant 0 : index
    %102 = vector.load %arg17[%c0_52, %c0_53] : memref<32x8xf32, #tpu.memory_space<vmem>>, vector<32x8xf32>
    %c0_54 = arith.constant 0 : index
    %c0_55 = arith.constant 0 : index
    %103 = vector.load %arg18[%c0_54, %c0_55] : memref<1x8xf32, #tpu.memory_space<vmem>>, vector<1x8xf32>
    %cst_56 = arith.constant dense<0.000000e+00> : vector<6x40xf32>
    %104 = tpu.matmul %99, %100, %cst_56 {dimension_numbers = #tpu.dot_dimension_numbers<[1], [0], [0], [1], [0, 0, 1, 1], [], []>} : vector<6x32xf32>, vector<32x40xf32>, vector<6x40xf32> -> vector<6x40xf32>
    %105 = vector.broadcast %101 : vector<1x40xf32> to vector<6x40xf32>
    %106 = arith.addf %104, %105 : vector<6x40xf32>
    %107 = vector.extract_strided_slice %106 {offsets = [0, 0], sizes = [6, 32], strides = [1, 1]} : vector<6x40xf32> to vector<6x32xf32>
    %cst_57 = arith.constant 0.000000e+00 : f32
    %108 = vector.broadcast %cst_57 : f32 to vector<6x32xf32>
    %109 = arith.maximumf %107, %108 : vector<6x32xf32>
    %110 = vector.extract_strided_slice %106 {offsets = [0, 32], sizes = [6, 8], strides = [1, 1]} : vector<6x40xf32> to vector<6x8xf32>
    %cst_58 = arith.constant dense<0.000000e+00> : vector<6x8xf32>
    %111 = tpu.matmul %109, %102, %cst_58 {dimension_numbers = #tpu.dot_dimension_numbers<[1], [0], [0], [1], [0, 0, 1, 1], [], []>} : vector<6x32xf32>, vector<32x8xf32>, vector<6x8xf32> -> vector<6x8xf32>
    %112 = vector.broadcast %103 : vector<1x8xf32> to vector<6x8xf32>
    %113 = arith.addf %111, %112 : vector<6x8xf32>
    %114 = arith.addf %113, %110 : vector<6x8xf32>
    %cst_59 = arith.constant dense<0.000000e+00> : vector<6xf32>
    %115 = vector.multi_reduction <add>, %114, %cst_59 [1] : vector<6x8xf32> to vector<6xf32>
    %116 = vector.shape_cast %115 : vector<6xf32> to vector<6x1xf32>
    %cst_60 = arith.constant 8.000000e+00 : f32
    %117 = vector.broadcast %cst_60 : f32 to vector<6x1xf32>
    %118 = arith.divf %116, %117 : vector<6x1xf32>
    %119 = vector.broadcast %118 : vector<6x1xf32> to vector<6x8xf32>
    %120 = arith.subf %114, %119 : vector<6x8xf32>
    %121 = arith.mulf %120, %120 : vector<6x8xf32>
    %cst_61 = arith.constant dense<0.000000e+00> : vector<6xf32>
    %122 = vector.multi_reduction <add>, %121, %cst_61 [1] : vector<6x8xf32> to vector<6xf32>
    %123 = vector.shape_cast %122 : vector<6xf32> to vector<6x1xf32>
    %cst_62 = arith.constant 8.000000e+00 : f32
    %124 = vector.broadcast %cst_62 : f32 to vector<6x1xf32>
    %125 = arith.divf %123, %124 : vector<6x1xf32>
    %126 = vector.broadcast %118 : vector<6x1xf32> to vector<6x8xf32>
    %127 = arith.subf %114, %126 : vector<6x8xf32>
    %cst_63 = arith.constant 9.99999974E-6 : f32
    %128 = vector.broadcast %cst_63 : f32 to vector<6x1xf32>
    %129 = arith.addf %125, %128 : vector<6x1xf32>
    %130 = math.rsqrt %129 : vector<6x1xf32>
    %131 = vector.broadcast %130 : vector<6x1xf32> to vector<6x8xf32>
    %132 = arith.mulf %127, %131 : vector<6x8xf32>
    %c0_64 = arith.constant 0 : index
    %c0_65 = arith.constant 0 : index
    %133 = vector.load %arg21[%c0_64, %c0_65] : memref<6x8xf32, #tpu.memory_space<vmem>>, vector<6x8xf32>
    tpu.vector_store %arg21[%c0_64, %c0_65], %132 {strides = array<i32>} : memref<6x8xf32, #tpu.memory_space<vmem>>, vector<6x8xf32>,
    %c0_66 = arith.constant 0 : index
    %c0_67 = arith.constant 0 : index
    %134 = vector.load %arg2[%c0_66, %c0_67] : memref<6x16xf32, #tpu.memory_space<vmem>>, vector<6x16xf32>
    %c0_68 = arith.constant 0 : index
    %c0_69 = arith.constant 0 : index
    %135 = vector.load %arg19[%c0_68, %c0_69] : memref<16x8xf32, #tpu.memory_space<vmem>>, vector<16x8xf32>
    %cst_70 = arith.constant dense<0.000000e+00> : vector<6x8xf32>
    %136 = tpu.matmul %134, %135, %cst_70 {dimension_numbers = #tpu.dot_dimension_numbers<[1], [0], [0], [1], [0, 0, 1, 1], [], []>} : vector<6x16xf32>, vector<16x8xf32>, vector<6x8xf32> -> vector<6x8xf32>
    %c0_71 = arith.constant 0 : index
    %c0_72 = arith.constant 0 : index
    %137 = vector.load %arg20[%c0_71, %c0_72] : memref<1x8xf32, #tpu.memory_space<vmem>>, vector<1x8xf32>
    %138 = vector.broadcast %137 : vector<1x8xf32> to vector<6x8xf32>
    %139 = arith.addf %136, %138 : vector<6x8xf32>
    %c0_73 = arith.constant 0 : index
    %c0_74 = arith.constant 0 : index
    %140 = vector.load %arg22[%c0_73, %c0_74] : memref<6x8xf32, #tpu.memory_space<vmem>>, vector<6x8xf32>
    tpu.vector_store %arg22[%c0_73, %c0_74], %139 {strides = array<i32>} : memref<6x8xf32, #tpu.memory_space<vmem>>, vector<6x8xf32>,
    return
  }
  func.func @transform_0(%arg0: i32) -> (i32, i32) {
    %c0_i32 = arith.constant 0 : i32
    %c0_i32_0 = arith.constant 0 : i32
    %c0_i32_1 = arith.constant 0 : i32
    return %c0_i32, %c0_i32_0 : i32, i32
  }
  func.func @transform_1(%arg0: i32) -> (i32, i32) {
    %c0_i32 = arith.constant 0 : i32
    %c0_i32_0 = arith.constant 0 : i32
    %c0_i32_1 = arith.constant 0 : i32
    return %c0_i32, %c0_i32_0 : i32, i32
  }
  func.func @transform_2(%arg0: i32) -> (i32, i32) {
    %c0_i32 = arith.constant 0 : i32
    %c0_i32_0 = arith.constant 0 : i32
    %c0_i32_1 = arith.constant 0 : i32
    return %c0_i32, %c0_i32_0 : i32, i32
  }
  func.func @transform_3(%arg0: i32) -> (i32, i32) {
    %c0_i32 = arith.constant 0 : i32
    %c0_i32_0 = arith.constant 0 : i32
    %c0_i32_1 = arith.constant 0 : i32
    return %c0_i32, %c0_i32_0 : i32, i32
  }
  func.func @transform_4(%arg0: i32) -> (i32, i32) {
    %c0_i32 = arith.constant 0 : i32
    %c0_i32_0 = arith.constant 0 : i32
    %c0_i32_1 = arith.constant 0 : i32
    return %c0_i32, %c0_i32_0 : i32, i32
  }
  func.func @transform_5(%arg0: i32) -> (i32, i32) {
    %c0_i32 = arith.constant 0 : i32
    %c0_i32_0 = arith.constant 0 : i32
    %c0_i32_1 = arith.constant 0 : i32
    return %c0_i32, %c0_i32_0 : i32, i32
  }
  func.func @transform_6(%arg0: i32) -> (i32, i32) {
    %c0_i32 = arith.constant 0 : i32
    %c0_i32_0 = arith.constant 0 : i32
    %c0_i32_1 = arith.constant 0 : i32
    return %c0_i32, %c0_i32_0 : i32, i32
  }
  func.func @transform_7(%arg0: i32) -> (i32, i32) {
    %c0_i32 = arith.constant 0 : i32
    %c0_i32_0 = arith.constant 0 : i32
    %c0_i32_1 = arith.constant 0 : i32
    return %c0_i32, %c0_i32_0 : i32, i32
  }
  func.func @transform_8(%arg0: i32) -> (i32, i32) {
    %c0_i32 = arith.constant 0 : i32
    %c0_i32_0 = arith.constant 0 : i32
    %c0_i32_1 = arith.constant 0 : i32
    return %c0_i32, %c0_i32_0 : i32, i32
  }
  func.func @transform_9(%arg0: i32) -> (i32, i32) {
    %c0_i32 = arith.constant 0 : i32
    %c0_i32_0 = arith.constant 0 : i32
    %c0_i32_1 = arith.constant 0 : i32
    return %c0_i32, %c0_i32_0 : i32, i32
  }
  func.func @transform_10(%arg0: i32) -> (i32, i32) {
    %c0_i32 = arith.constant 0 : i32
    %c0_i32_0 = arith.constant 0 : i32
    %c0_i32_1 = arith.constant 0 : i32
    return %c0_i32, %c0_i32_0 : i32, i32
  }
  func.func @transform_11(%arg0: i32) -> (i32, i32) {
    %c0_i32 = arith.constant 0 : i32
    %c0_i32_0 = arith.constant 0 : i32
    %c0_i32_1 = arith.constant 0 : i32
    return %c0_i32, %c0_i32_0 : i32, i32
  }
  func.func @transform_12(%arg0: i32) -> (i32, i32) {
    %c0_i32 = arith.constant 0 : i32
    %c0_i32_0 = arith.constant 0 : i32
    %c0_i32_1 = arith.constant 0 : i32
    return %c0_i32, %c0_i32_0 : i32, i32
  }
  func.func @transform_13(%arg0: i32) -> (i32, i32) {
    %c0_i32 = arith.constant 0 : i32
    %c0_i32_0 = arith.constant 0 : i32
    %c0_i32_1 = arith.constant 0 : i32
    return %c0_i32, %c0_i32_0 : i32, i32
  }
  func.func @transform_14(%arg0: i32) -> (i32, i32) {
    %c0_i32 = arith.constant 0 : i32
    %c0_i32_0 = arith.constant 0 : i32
    %c0_i32_1 = arith.constant 0 : i32
    return %c0_i32, %c0_i32_0 : i32, i32
  }
  func.func @transform_15(%arg0: i32) -> (i32, i32) {
    %c0_i32 = arith.constant 0 : i32
    %c0_i32_0 = arith.constant 0 : i32
    %c0_i32_1 = arith.constant 0 : i32
    return %c0_i32, %c0_i32_0 : i32, i32
  }
  func.func @transform_16(%arg0: i32) -> (i32, i32) {
    %c0_i32 = arith.constant 0 : i32
    %c0_i32_0 = arith.constant 0 : i32
    %c0_i32_1 = arith.constant 0 : i32
    return %c0_i32, %c0_i32_0 : i32, i32
  }
  func.func @transform_17(%arg0: i32) -> (i32, i32) {
    %c0_i32 = arith.constant 0 : i32
    %c0_i32_0 = arith.constant 0 : i32
    %c0_i32_1 = arith.constant 0 : i32
    return %c0_i32, %c0_i32_0 : i32, i32
  }
  func.func @transform_18(%arg0: i32) -> (i32, i32) {
    %c0_i32 = arith.constant 0 : i32
    %c0_i32_0 = arith.constant 0 : i32
    %c0_i32_1 = arith.constant 0 : i32
    return %c0_i32, %c0_i32_0 : i32, i32
  }
  func.func @transform_19(%arg0: i32) -> (i32, i32) {
    %c0_i32 = arith.constant 0 : i32
    %c0_i32_0 = arith.constant 0 : i32
    %c0_i32_1 = arith.constant 0 : i32
    return %c0_i32, %c0_i32_0 : i32, i32
  }
  func.func @transform_20(%arg0: i32) -> (i32, i32) {
    %c0_i32 = arith.constant 0 : i32
    %c0_i32_0 = arith.constant 0 : i32
    %c0_i32_1 = arith.constant 0 : i32
    return %c0_i32, %c0_i32_0 : i32, i32
  }
  func.func @transform_21(%arg0: i32) -> (i32, i32) {
    %c0_i32 = arith.constant 0 : i32
    %c0_i32_0 = arith.constant 0 : i32
    %c0_i32_1 = arith.constant 0 : i32
    return %c0_i32, %c0_i32_0 : i32, i32
  }
}

module attributes {stable_mosaic.version = 11 : i64} {
  func.func @_resblock_chain_kernel(%arg0: i32, %arg1: memref<48x3xf32, #tpu.memory_space<vmem>>, %arg2: memref<3x33xf32, #tpu.memory_space<vmem>>, %arg3: memref<1x33xf32, #tpu.memory_space<vmem>>, %arg4: memref<32x1xf32, #tpu.memory_space<vmem>>, %arg5: memref<1x1xf32, #tpu.memory_space<vmem>>, %arg6: memref<48x1xf32, #tpu.memory_space<vmem>>) attributes {dimension_semantics = [#tpu.dimension_semantics<arbitrary>], iteration_bounds = array<i64: 1>, scalar_prefetch = 0 : i64, scratch_operands = 0 : i64, tpu.core_type = #tpu.core_type<tc>, window_params = [{pipeline_mode = #tpu.pipeline_mode<synchronous>, transform_indices = @transform_0, window_bounds = array<i64: 48, 3>}, {pipeline_mode = #tpu.pipeline_mode<synchronous>, transform_indices = @transform_1, window_bounds = array<i64: 3, 33>}, {pipeline_mode = #tpu.pipeline_mode<synchronous>, transform_indices = @transform_2, window_bounds = array<i64: 1, 33>}, {pipeline_mode = #tpu.pipeline_mode<synchronous>, transform_indices = @transform_3, window_bounds = array<i64: 32, 1>}, {pipeline_mode = #tpu.pipeline_mode<synchronous>, transform_indices = @transform_4, window_bounds = array<i64: 1, 1>}, {pipeline_mode = #tpu.pipeline_mode<synchronous>, transform_indices = @transform_5, window_bounds = array<i64: 48, 1>}]} {
    %c0 = arith.constant 0 : index
    %c0_0 = arith.constant 0 : index
    %0 = vector.load %arg1[%c0, %c0_0] : memref<48x3xf32, #tpu.memory_space<vmem>>, vector<48x3xf32>
    %c0_1 = arith.constant 0 : index
    %c0_2 = arith.constant 0 : index
    %1 = vector.load %arg2[%c0_1, %c0_2] : memref<3x33xf32, #tpu.memory_space<vmem>>, vector<3x33xf32>
    %c0_3 = arith.constant 0 : index
    %c0_4 = arith.constant 0 : index
    %2 = vector.load %arg3[%c0_3, %c0_4] : memref<1x33xf32, #tpu.memory_space<vmem>>, vector<1x33xf32>
    %c0_5 = arith.constant 0 : index
    %c0_6 = arith.constant 0 : index
    %3 = vector.load %arg4[%c0_5, %c0_6] : memref<32x1xf32, #tpu.memory_space<vmem>>, vector<32x1xf32>
    %c0_7 = arith.constant 0 : index
    %c0_8 = arith.constant 0 : index
    %4 = vector.load %arg5[%c0_7, %c0_8] : memref<1x1xf32, #tpu.memory_space<vmem>>, vector<1x1xf32>
    %cst = arith.constant dense<0.000000e+00> : vector<48x33xf32>
    %5 = tpu.matmul %0, %1, %cst {dimension_numbers = #tpu.dot_dimension_numbers<[1], [0], [0], [1], [0, 0, 1, 1], [], []>} : vector<48x3xf32>, vector<3x33xf32>, vector<48x33xf32> -> vector<48x33xf32>
    %6 = vector.broadcast %2 : vector<1x33xf32> to vector<48x33xf32>
    %7 = arith.addf %5, %6 : vector<48x33xf32>
    %8 = vector.extract_strided_slice %7 {offsets = [0, 0], sizes = [48, 32], strides = [1, 1]} : vector<48x33xf32> to vector<48x32xf32>
    %cst_9 = arith.constant 0.000000e+00 : f32
    %9 = vector.broadcast %cst_9 : f32 to vector<48x32xf32>
    %10 = arith.maximumf %8, %9 : vector<48x32xf32>
    %11 = vector.extract_strided_slice %7 {offsets = [0, 32], sizes = [48, 1], strides = [1, 1]} : vector<48x33xf32> to vector<48x1xf32>
    %cst_10 = arith.constant dense<0.000000e+00> : vector<48x1xf32>
    %12 = tpu.matmul %10, %3, %cst_10 {dimension_numbers = #tpu.dot_dimension_numbers<[1], [0], [0], [1], [0, 0, 1, 1], [], []>} : vector<48x32xf32>, vector<32x1xf32>, vector<48x1xf32> -> vector<48x1xf32>
    %13 = vector.broadcast %4 : vector<1x1xf32> to vector<48x1xf32>
    %14 = arith.addf %12, %13 : vector<48x1xf32>
    %15 = arith.addf %14, %11 : vector<48x1xf32>
    %cst_11 = arith.constant dense<0.000000e+00> : vector<48xf32>
    %16 = vector.multi_reduction <add>, %15, %cst_11 [1] : vector<48x1xf32> to vector<48xf32>
    %17 = vector.shape_cast %16 : vector<48xf32> to vector<48x1xf32>
    %cst_12 = arith.constant 1.000000e+00 : f32
    %18 = vector.broadcast %cst_12 : f32 to vector<48x1xf32>
    %19 = arith.divf %17, %18 : vector<48x1xf32>
    %20 = arith.subf %15, %19 : vector<48x1xf32>
    %21 = arith.mulf %20, %20 : vector<48x1xf32>
    %cst_13 = arith.constant dense<0.000000e+00> : vector<48xf32>
    %22 = vector.multi_reduction <add>, %21, %cst_13 [1] : vector<48x1xf32> to vector<48xf32>
    %23 = vector.shape_cast %22 : vector<48xf32> to vector<48x1xf32>
    %cst_14 = arith.constant 1.000000e+00 : f32
    %24 = vector.broadcast %cst_14 : f32 to vector<48x1xf32>
    %25 = arith.divf %23, %24 : vector<48x1xf32>
    %26 = arith.subf %15, %19 : vector<48x1xf32>
    %cst_15 = arith.constant 9.99999974E-6 : f32
    %27 = vector.broadcast %cst_15 : f32 to vector<48x1xf32>
    %28 = arith.addf %25, %27 : vector<48x1xf32>
    %29 = math.rsqrt %28 : vector<48x1xf32>
    %30 = arith.mulf %26, %29 : vector<48x1xf32>
    %c0_16 = arith.constant 0 : index
    %c0_17 = arith.constant 0 : index
    %31 = vector.load %arg6[%c0_16, %c0_17] : memref<48x1xf32, #tpu.memory_space<vmem>>, vector<48x1xf32>
    tpu.vector_store %arg6[%c0_16, %c0_17], %30 {strides = array<i32>} : memref<48x1xf32, #tpu.memory_space<vmem>>, vector<48x1xf32>,
    return
  }
  func.func @transform_0(%arg0: i32) -> (i32, i32) {
    %c0_i32 = arith.constant 0 : i32
    %c0_i32_0 = arith.constant 0 : i32
    %c0_i32_1 = arith.constant 0 : i32
    return %c0_i32, %c0_i32_0 : i32, i32
  }
  func.func @transform_1(%arg0: i32) -> (i32, i32) {
    %c0_i32 = arith.constant 0 : i32
    %c0_i32_0 = arith.constant 0 : i32
    %c0_i32_1 = arith.constant 0 : i32
    return %c0_i32, %c0_i32_0 : i32, i32
  }
  func.func @transform_2(%arg0: i32) -> (i32, i32) {
    %c0_i32 = arith.constant 0 : i32
    %c0_i32_0 = arith.constant 0 : i32
    %c0_i32_1 = arith.constant 0 : i32
    return %c0_i32, %c0_i32_0 : i32, i32
  }
  func.func @transform_3(%arg0: i32) -> (i32, i32) {
    %c0_i32 = arith.constant 0 : i32
    %c0_i32_0 = arith.constant 0 : i32
    %c0_i32_1 = arith.constant 0 : i32
    return %c0_i32, %c0_i32_0 : i32, i32
  }
  func.func @transform_4(%arg0: i32) -> (i32, i32) {
    %c0_i32 = arith.constant 0 : i32
    %c0_i32_0 = arith.constant 0 : i32
    %c0_i32_1 = arith.constant 0 : i32
    return %c0_i32, %c0_i32_0 : i32, i32
  }
  func.func @transform_5(%arg0: i32) -> (i32, i32) {
    %c0_i32 = arith.constant 0 : i32
    %c0_i32_0 = arith.constant 0 : i32
    %c0_i32_1 = arith.constant 0 : i32
    return %c0_i32, %c0_i32_0 : i32, i32
  }
}

</mosaic_0001>

<bundles_post_ra>
// kernel: squeeze.14
= control target key start
LH: loop header
LB: loop body
LE: loop exit
PB: predicated region body
PF: predicated region fallthrough
CT: control target
= control target key end

     0   :  { %s67_s8 = smov 119   ;;  %vm8_vm0 = vcmask 23552   ;;  %s68_s11 = smov 122   ;;  %s118_s0 = inlined_call_operand.vmem [shape: f32[1,2,24], index: 0, kind: input, shape index: {}]   ;;  %s119_s1 = inlined_call_operand.vmem [shape: f32[2,8,3], index: 1, kind: output, shape index: {}]  }
   0x1   :  { %v5_v0 = vld [vmem:[%s118_s0] sm:$0x3]  ;;  %s66_s0 = smov 125   ;;  %s69_s12 = smov 116  }
   0x2   :  { %6 = vst [vmem:[#allocation0] sm:$0x3] %v5_v0  ;;  %s70_s13 = smov 113   ;;  %s71_s14 = smov 110  }
   0x3   :  { %s72_s15 = smov 107  }
   0x9   :  { %v10_v1 = vld [vmem:[#allocation0] sm:$0x3]  }
   0xa   :  { %v22_v2 = vld [vmem:[#allocation0] sm:$0x3]   ;;  %11 = vrot.lane.b32.xlu0 %v10_v1, %s66_s0 }
   0xb   :  { %23 = vrot.lane.b32.xlu1 %v22_v2, %s67_s8  ;;  %v16_v3 = vld [vmem:[#allocation0] sm:$0x3]  }
   0xc   :  { %v28_v4 = vld [vmem:[#allocation0] sm:$0x3]  }
   0xd   :  { %v7_v5 = vld [vmem:[#allocation0] sm:$0x3]  }
   0xe   :  { %9 = vst.msk [vmem:[%s119_s1] ss:$8 sm:$0x3] %vm8_vm0, %v7_v5   ;;  %17 = vrot.lane.b32.xlu0 %v16_v3, %s68_s11  ;;  %v34_v6 = vld [vmem:[#allocation0] sm:$0x3]  }
   0xf   :  { %29 = vrot.lane.b32.xlu1 %v28_v4, %s69_s12  ;;  %v40_v7 = vld [vmem:[#allocation0] sm:$0x3]  }
  0x10   :  { %v46_v8 = vld [vmem:[#allocation0] sm:$0x3]  }
  0x12   :  { %35 = vrot.lane.b32.xlu0 %v34_v6, %s70_s13 }
  0x13   :  { %41 = vrot.lane.b32.xlu1 %v40_v7, %s71_s14 }
  0x16   :  { %47 = vrot.lane.b32.xlu0 %v46_v8, %s72_s15 }
  0x7c   :  { %v12_v9 = vpop.permute.xlu0 %11  }
  0x7d   :  { %v24_v10 = vpop.permute.xlu1 %23   ;;  %52 = vst.msk [vmem:[%s119_s1 + $0x1] ss:$8 sm:$0x3] %vm8_vm0, %v12_v9  }
  0x7e   :  { %54 = vst.msk [vmem:[%s119_s1 + $0x3] ss:$8 sm:$0x3] %vm8_vm0, %v24_v10  }
  0x80   :  { %v18_v11 = vpop.permute.xlu0 %17  }
  0x81   :  { %v30_v12 = vpop.permute.xlu1 %29   ;;  %53 = vst.msk [vmem:[%s119_s1 + $0x2] ss:$8 sm:$0x3] %vm8_vm0, %v18_v11  }
  0x82   :  { %55 = vst.msk [vmem:[%s119_s1 + $0x4] ss:$8 sm:$0x3] %vm8_vm0, %v30_v12  }
  0x84   :  { %v36_v13 = vpop.permute.xlu0 %35  }
  0x85   :  { %v42_v14 = vpop.permute.xlu1 %41   ;;  %56 = vst.msk [vmem:[%s119_s1 + $0x5] ss:$8 sm:$0x3] %vm8_vm0, %v36_v13  }
  0x86   :  { %57 = vst.msk [vmem:[%s119_s1 + $0x6] ss:$8 sm:$0x3] %vm8_vm0, %v42_v14  }
  0x88   :  { %v48_v15 = vpop.permute.xlu0 %47  }
  0x89   :  { %58 = vst.msk [vmem:[%s119_s1 + $0x7] ss:$8 sm:$0x3] %vm8_vm0, %v48_v15  }

// kernel: squeeze.13
= control target key start
LH: loop header
LB: loop body
LE: loop exit
PB: predicated region body
PF: predicated region fallthrough
CT: control target
= control target key end

     0   :  { %s47_s8 = smov 110   ;;  %vm8_vm0 = vcmask 48128   ;;  %s48_s9 = smov 116   ;;  %s68_s0 = inlined_call_operand.vmem [shape: f32[1,2,24], index: 0, kind: input, shape index: {}]   ;;  %s69_s1 = inlined_call_operand.vmem [shape: f32[2,4,6], index: 1, kind: output, shape index: {}]  }
   0x1   :  { %v5_v0 = vld [vmem:[%s68_s0] sm:$0x3]  ;;  %s46_s0 = smov 122  }
   0x2   :  { %6 = vst [vmem:[#allocation1] sm:$0x3] %v5_v0 }
   0x9   :  { %v10_v1 = vld [vmem:[#allocation1] sm:$0x3]  }
   0xa   :  { %v22_v2 = vld [vmem:[#allocation1] sm:$0x3]   ;;  %11 = vrot.lane.b32.xlu0 %v10_v1, %s46_s0 }
   0xb   :  { %23 = vrot.lane.b32.xlu1 %v22_v2, %s47_s8  ;;  %v7_v3 = vld [vmem:[#allocation1] sm:$0x3]  }
   0xc   :  { %v16_v4 = vld [vmem:[#allocation1] sm:$0x3]   ;;  %9 = vst.msk [vmem:[#allocation0] ss:$8 sm:$0x3] %vm8_vm0, %v7_v3  }
   0xe   :  { %17 = vrot.lane.b32.xlu0 %v16_v4, %s48_s9 }
  0x7c   :  { %v12_v5 = vpop.permute.xlu0 %11  }
  0x7d   :  { %v24_v6 = vpop.permute.xlu1 %23   ;;  %15 = vst.msk [vmem:[#allocation0 + $0x1] ss:$8 sm:$0x3] %vm8_vm0, %v12_v5  }
  0x7e   :  { %27 = vst.msk [vmem:[#allocation0 + $0x3] ss:$8 sm:$0x3] %vm8_vm0, %v24_v6  }
  0x80   :  { %v18_v7 = vpop.permute.xlu0 %17  }
  0x81   :  { %21 = vst.msk [vmem:[#allocation0 + $0x2] ss:$8 sm:$0x3] %vm8_vm0, %v18_v7  }
  0x88   :  { %v32_v8 = vld [vmem:[#allocation0] sm:$0xf]  ;;  %v37_v9 = vld [vmem:[#allocation0 + $0x8] sm:$0xf] }
  0x89   :  { %35 = vst [vmem:[%s69_s1] sm:$0xf] %v32_v8  ;;  %42 = vst [vmem:[%s69_s1 + $0x4] sm:$0xf] %v37_v9 }

// kernel: squeeze.12
= control target key start
LH: loop header
LB: loop body
LE: loop exit
PB: predicated region body
PF: predicated region fallthrough
CT: control target
= control target key end

     0   :  { %s99_s8 = smov 122   ;;  %vm8_vm0 = vcmask 15360   ;;  %s100_s11 = smov 124   ;;  %s170_s0 = inlined_call_operand.vmem [shape: f32[1,2,24], index: 0, kind: input, shape index: {}]   ;;  %s171_s1 = inlined_call_operand.vmem [shape: f32[2,12,2], index: 1, kind: output, shape index: {}]  }
   0x1   :  { %v5_v0 = vld [vmem:[%s170_s0] sm:$0x3]  ;;  %s98_s0 = smov 126   ;;  %s101_s12 = smov 120  }
   0x2   :  { %6 = vst [vmem:[#allocation0] sm:$0x3] %v5_v0  ;;  %s102_s13 = smov 118   ;;  %s103_s14 = smov 116  }
   0x3   :  { %s104_s15 = smov 114   ;;  %s105_s16 = smov 112  }
   0x4   :  { %s106_s17 = smov 110   ;;  %s107_s18 = smov 108  }
   0x5   :  { %s108_s19 = smov 106  }
   0x9   :  { %v10_v1 = vld [vmem:[#allocation0] sm:$0x3]  }
   0xa   :  { %v22_v2 = vld [vmem:[#allocation0] sm:$0x3]   ;;  %11 = vrot.lane.b32.xlu0 %v10_v1, %s98_s0 }
   0xb   :  { %23 = vrot.lane.b32.xlu1 %v22_v2, %s99_s8  ;;  %v16_v3 = vld [vmem:[#allocation0] sm:$0x3]  }
   0xc   :  { %v28_v4 = vld [vmem:[#allocation0] sm:$0x3]  }
   0xd   :  { %v7_v5 = vld [vmem:[#allocation0] sm:$0x3]  }
   0xe   :  { %9 = vst.msk [vmem:[%s171_s1] ss:$16 sm:$0x3] %vm8_vm0, %v7_v5   ;;  %17 = vrot.lane.b32.xlu0 %v16_v3, %s100_s11  ;;  %v34_v6 = vld [vmem:[#allocation0] sm:$0x3]  }
   0xf   :  { %29 = vrot.lane.b32.xlu1 %v28_v4, %s101_s12  ;;  %v40_v7 = vld [vmem:[#allocation0] sm:$0x3]  }
  0x10   :  { %v46_v8 = vld [vmem:[#allocation0] sm:$0x3]  }
  0x11   :  { %v52_v9 = vld [vmem:[#allocation0] sm:$0x3]  }
  0x12   :  { %35 = vrot.lane.b32.xlu0 %v34_v6, %s102_s13  ;;  %v58_v10 = vld [vmem:[#allocation0] sm:$0x3]  }
  0x13   :  { %41 = vrot.lane.b32.xlu1 %v40_v7, %s103_s14  ;;  %v64_v11 = vld [vmem:[#allocation0] sm:$0x3]  }
  0x14   :  { %v70_v12 = vld [vmem:[#allocation0] sm:$0x3]  }
  0x16   :  { %47 = vrot.lane.b32.xlu0 %v46_v8, %s104_s15 }
  0x17   :  { %53 = vrot.lane.b32.xlu1 %v52_v9, %s105_s16 }
  0x1a   :  { %59 = vrot.lane.b32.xlu0 %v58_v10, %s106_s17 }
  0x1b   :  { %65 = vrot.lane.b32.xlu1 %v64_v11, %s107_s18 }
  0x1e   :  { %71 = vrot.lane.b32.xlu0 %v70_v12, %s108_s19 }
  0x7c   :  { %v12_v13 = vpop.permute.xlu0 %11  }
  0x7d   :  { %v24_v14 = vpop.permute.xlu1 %23   ;;  %76 = vst.msk [vmem:[%s171_s1 + $0x1] ss:$16 sm:$0x3] %vm8_vm0, %v12_v13  }
  0x7e   :  { %78 = vst.msk [vmem:[%s171_s1 + $0x3] ss:$16 sm:$0x3] %vm8_vm0, %v24_v14  }
  0x80   :  { %v18_v15 = vpop.permute.xlu0 %17  }
  0x81   :  { %v30_v16 = vpop.permute.xlu1 %29   ;;  %77 = vst.msk [vmem:[%s171_s1 + $0x2] ss:$16 sm:$0x3] %vm8_vm0, %v18_v15  }
  0x82   :  { %79 = vst.msk [vmem:[%s171_s1 + $0x4] ss:$16 sm:$0x3] %vm8_vm0, %v30_v16  }
  0x84   :  { %v36_v17 = vpop.permute.xlu0 %35  }
  0x85   :  { %v42_v18 = vpop.permute.xlu1 %41   ;;  %80 = vst.msk [vmem:[%s171_s1 + $0x5] ss:$16 sm:$0x3] %vm8_vm0, %v36_v17  }
  0x86   :  { %81 = vst.msk [vmem:[%s171_s1 + $0x6] ss:$16 sm:$0x3] %vm8_vm0, %v42_v18  }
  0x88   :  { %v48_v19 = vpop.permute.xlu0 %47  }
  0x89   :  { %v54_v20 = vpop.permute.xlu1 %53   ;;  %82 = vst.msk [vmem:[%s171_s1 + $0x7] ss:$16 sm:$0x3] %vm8_vm0, %v48_v19  }
  0x8a   :  { %83 = vst.msk [vmem:[%s171_s1 + $0x8] ss:$16 sm:$0x3] %vm8_vm0, %v54_v20  }
  0x8c   :  { %v60_v21 = vpop.permute.xlu0 %59  }
  0x8d   :  { %v66_v22 = vpop.permute.xlu1 %65   ;;  %84 = vst.msk [vmem:[%s171_s1 + $0x9] ss:$16 sm:$0x3] %vm8_vm0, %v60_v21  }
  0x8e   :  { %85 = vst.msk [vmem:[%s171_s1 + $0xa] ss:$16 sm:$0x3] %vm8_vm0, %v66_v22  }
  0x90   :  { %v72_v23 = vpop.permute.xlu0 %71  }
  0x91   :  { %86 = vst.msk [vmem:[%s171_s1 + $0xb] ss:$16 sm:$0x3] %vm8_vm0, %v72_v23  }

// kernel: squeeze.10
= control target key start
LH: loop header
LB: loop body
LE: loop exit
PB: predicated region body
PF: predicated region fallthrough
CT: control target
= control target key end

     0   :  { %s67_s8 = smov 119   ;;  %vm8_vm0 = vcmask 23552   ;;  %s68_s11 = smov 122   ;;  %s118_s0 = inlined_call_operand.vmem [shape: f32[2,24], index: 0, kind: input, shape index: {}]   ;;  %s119_s1 = inlined_call_operand.vmem [shape: f32[2,8,3], index: 1, kind: output, shape index: {}]  }
   0x1   :  { %v5_v0 = vld [vmem:[%s118_s0] sm:$0x3]  ;;  %s66_s0 = smov 125   ;;  %s69_s12 = smov 116  }
   0x2   :  { %6 = vst [vmem:[#allocation0] sm:$0x3] %v5_v0  ;;  %s70_s13 = smov 113   ;;  %s71_s14 = smov 110  }
   0x3   :  { %s72_s15 = smov 107  }
   0x9   :  { %v10_v1 = vld [vmem:[#allocation0] sm:$0x3]  }
   0xa   :  { %v22_v2 = vld [vmem:[#allocation0] sm:$0x3]   ;;  %11 = vrot.lane.b32.xlu0 %v10_v1, %s66_s0 }
   0xb   :  { %23 = vrot.lane.b32.xlu1 %v22_v2, %s67_s8  ;;  %v16_v3 = vld [vmem:[#allocation0] sm:$0x3]  }
   0xc   :  { %v28_v4 = vld [vmem:[#allocation0] sm:$0x3]  }
   0xd   :  { %v7_v5 = vld [vmem:[#allocation0] sm:$0x3]  }
   0xe   :  { %9 = vst.msk [vmem:[%s119_s1] ss:$8 sm:$0x3] %vm8_vm0, %v7_v5   ;;  %17 = vrot.lane.b32.xlu0 %v16_v3, %s68_s11  ;;  %v34_v6 = vld [vmem:[#allocation0] sm:$0x3]  }
   0xf   :  { %29 = vrot.lane.b32.xlu1 %v28_v4, %s69_s12  ;;  %v40_v7 = vld [vmem:[#allocation0] sm:$0x3]  }
  0x10   :  { %v46_v8 = vld [vmem:[#allocation0] sm:$0x3]  }
  0x12   :  { %35 = vrot.lane.b32.xlu0 %v34_v6, %s70_s13 }
  0x13   :  { %41 = vrot.lane.b32.xlu1 %v40_v7, %s71_s14 }
  0x16   :  { %47 = vrot.lane.b32.xlu0 %v46_v8, %s72_s15 }
  0x7c   :  { %v12_v9 = vpop.permute.xlu0 %11  }
  0x7d   :  { %v24_v10 = vpop.permute.xlu1 %23   ;;  %52 = vst.msk [vmem:[%s119_s1 + $0x1] ss:$8 sm:$0x3] %vm8_vm0, %v12_v9  }
  0x7e   :  { %54 = vst.msk [vmem:[%s119_s1 + $0x3] ss:$8 sm:$0x3] %vm8_vm0, %v24_v10  }
  0x80   :  { %v18_v11 = vpop.permute.xlu0 %17  }
  0x81   :  { %v30_v12 = vpop.permute.xlu1 %29   ;;  %53 = vst.msk [vmem:[%s119_s1 + $0x2] ss:$8 sm:$0x3] %vm8_vm0, %v18_v11  }
  0x82   :  { %55 = vst.msk [vmem:[%s119_s1 + $0x4] ss:$8 sm:$0x3] %vm8_vm0, %v30_v12  }
  0x84   :  { %v36_v13 = vpop.permute.xlu0 %35  }
  0x85   :  { %v42_v14 = vpop.permute.xlu1 %41   ;;  %56 = vst.msk [vmem:[%s119_s1 + $0x5] ss:$8 sm:$0x3] %vm8_vm0, %v36_v13  }
  0x86   :  { %57 = vst.msk [vmem:[%s119_s1 + $0x6] ss:$8 sm:$0x3] %vm8_vm0, %v42_v14  }
  0x88   :  { %v48_v15 = vpop.permute.xlu0 %47  }
  0x89   :  { %58 = vst.msk [vmem:[%s119_s1 + $0x7] ss:$8 sm:$0x3] %vm8_vm0, %v48_v15  }

// kernel: squeeze.9
= control target key start
LH: loop header
LB: loop body
LE: loop exit
PB: predicated region body
PF: predicated region fallthrough
CT: control target
= control target key end

     0   :  { %s51_s8 = smov 116   ;;  %vm8_vm0 = vcmask 31744   ;;  %s52_s11 = smov 120   ;;  %s92_s0 = inlined_call_operand.vmem [shape: f32[2,24], index: 0, kind: input, shape index: {}]   ;;  %s93_s1 = inlined_call_operand.vmem [shape: f32[2,6,4], index: 1, kind: output, shape index: {}]  }
   0x1   :  { %v5_v0 = vld [vmem:[%s92_s0] sm:$0x3]  ;;  %s50_s0 = smov 124   ;;  %s53_s12 = smov 112  }
   0x2   :  { %6 = vst [vmem:[#allocation0] sm:$0x3] %v5_v0  ;;  %s54_s13 = smov 108  }
   0x9   :  { %v10_v1 = vld [vmem:[#allocation0] sm:$0x3]  }
   0xa   :  { %v22_v2 = vld [vmem:[#allocation0] sm:$0x3]   ;;  %11 = vrot.lane.b32.xlu0 %v10_v1, %s50_s0 }
   0xb   :  { %23 = vrot.lane.b32.xlu1 %v22_v2, %s51_s8  ;;  %v7_v3 = vld [vmem:[#allocation0] sm:$0x3]  }
   0xc   :  { %v16_v4 = vld [vmem:[#allocation0] sm:$0x3]   ;;  %9 = vst.msk [vmem:[%s93_s1] ss:$8 sm:$0x3] %vm8_vm0, %v7_v3  }
   0xd   :  { %v28_v5 = vld [vmem:[#allocation0] sm:$0x3]  }
   0xe   :  { %17 = vrot.lane.b32.xlu0 %v16_v4, %s52_s11  ;;  %v34_v6 = vld [vmem:[#allocation0] sm:$0x3]  }
   0xf   :  { %29 = vrot.lane.b32.xlu1 %v28_v5, %s53_s12 }
  0x12   :  { %35 = vrot.lane.b32.xlu0 %v34_v6, %s54_s13 }
  0x7c   :  { %v12_v7 = vpop.permute.xlu0 %11  }
  0x7d   :  { %v24_v8 = vpop.permute.xlu1 %23   ;;  %40 = vst.msk [vmem:[%s93_s1 + $0x1] ss:$8 sm:$0x3] %vm8_vm0, %v12_v7  }
  0x7e   :  { %42 = vst.msk [vmem:[%s93_s1 + $0x3] ss:$8 sm:$0x3] %vm8_vm0, %v24_v8  }
  0x80   :  { %v18_v9 = vpop.permute.xlu0 %17  }
  0x81   :  { %v30_v10 = vpop.permute.xlu1 %29   ;;  %41 = vst.msk [vmem:[%s93_s1 + $0x2] ss:$8 sm:$0x3] %vm8_vm0, %v18_v9  }
  0x82   :  { %43 = vst.msk [vmem:[%s93_s1 + $0x4] ss:$8 sm:$0x3] %vm8_vm0, %v30_v10  }
  0x84   :  { %v36_v11 = vpop.permute.xlu0 %35  }
  0x85   :  { %44 = vst.msk [vmem:[%s93_s1 + $0x5] ss:$8 sm:$0x3] %vm8_vm0, %v36_v11  }

// kernel: _lambda_.6
= control target key start
LH: loop header
LB: loop body
LE: loop exit
PB: predicated region body
PF: predicated region fallthrough
CT: control target
= control target key end

     0   :  { %vm170_vm0 = vcmask 1040384   ;;  %vm61_vm1 = vcmask 203776   ;;  %vm419_vm2 = vcmask 261120   ;;  %s969_s1 = inlined_call_operand.vmem [shape: f32[25,32], index: 1, kind: input, shape index: {}]   ;;  %s970_s0 = inlined_call_operand.vmem [shape: f32[288,25], index: 0, kind: input, shape index: {}]   ;;  %s971_s2 = inlined_call_operand.vmem [shape: f32[1,32], index: 2, kind: input, shape index: {}]   ;;  %s972_s3 = inlined_call_operand.vmem [shape: f32[288,32], index: 3, kind: output, shape index: {}]  }
   0x1   :  { %v53_v0 = vld [vmem:[%s969_s1 + $0x18] sm:$0x1]  ;;  %v52_v1 = vld [vmem:[%s969_s1 + $0x10] sm:$0xff]  ;;  %v51_v2 = vld [vmem:[%s969_s1 + $0x8] sm:$0xff] }
   0x2   :  { %538 = vmatprep.subr.msk.mxu0 %vm170_vm0, %v53_v0  ;;  %600 = vmatprep.subr.msk.mxu1 %vm170_vm0, %v53_v0  ;;  %v50_v3 = vld [vmem:[%s969_s1] sm:$0xff]  ;;  %v32_v5 = vld [vmem:[%s970_s0 + $0x90] sm:$0xff]  ;;  %v15_v6 = vld [vmem:[%s970_s0 + $0x8] sm:$0xff] }
   0x3   :  { %539 = vmatpush3.msk.msra.mxu0 %vm170_vm0, %v53_v0  ;;  %604 = vmatpush3.msk.msra.mxu1 %vm170_vm0, %v53_v0  ;;  %v14_v4 = vld [vmem:[%s970_s0] sm:$0xff]  ;;  %v33_v7 = vld [vmem:[%s970_s0 + $0x98] sm:$0xff]  ;;  %v16_v8 = vld [vmem:[%s970_s0 + $0x10] sm:$0xff] }
   0x4   :  { %540 = vmatprep.subr.mxu0 %v52_v1  ;;  %601 = vmatprep.subr.mxu1 %v52_v1  ;;  %v34_v9 = vld [vmem:[%s970_s0 + $0xa0] sm:$0xff]  ;;  %v17_v10 = vld [vmem:[%s970_s0 + $0x18] sm:$0xff]  ;;  %v35_v11 = vld [vmem:[%s970_s0 + $0xa8] sm:$0xff] }
   0x5   :  { %541 = vmatpush3.msra.mxu0 %v52_v1  ;;  %605 = vmatpush3.msra.mxu1 %v52_v1  ;;  %v18_v12 = vld [vmem:[%s970_s0 + $0x20] sm:$0xff]  ;;  %v36_v13 = vld [vmem:[%s970_s0 + $0xb0] sm:$0xff]  ;;  %v19_v14 = vld [vmem:[%s970_s0 + $0x28] sm:$0xff] }
   0x6   :  { %542 = vmatprep.subr.mxu0 %v51_v2  ;;  %602 = vmatprep.subr.mxu1 %v51_v2  ;;  %v37_v15 = vld [vmem:[%s970_s0 + $0xb8] sm:$0xff]  ;;  %v20_v16 = vld [vmem:[%s970_s0 + $0x30] sm:$0xff]  ;;  %v38_v17 = vld [vmem:[%s970_s0 + $0xc0] sm:$0xff] }
   0x7   :  { %543 = vmatpush3.msra.mxu0 %v51_v2  ;;  %606 = vmatpush3.msra.mxu1 %v51_v2  ;;  %v21_v18 = vld [vmem:[%s970_s0 + $0x38] sm:$0xff]  ;;  %v39_v19 = vld [vmem:[%s970_s0 + $0xc8] sm:$0xff]  ;;  %v22_v20 = vld [vmem:[%s970_s0 + $0x40] sm:$0xff] }
   0x8   :  { %544 = vmatprep.subr.mxu0 %v50_v3  ;;  %603 = vmatprep.subr.mxu1 %v50_v3  ;;  %v40_v21 = vld [vmem:[%s970_s0 + $0xd0] sm:$0xff]  ;;  %v23_v22 = vld [vmem:[%s970_s0 + $0x48] sm:$0xff]  ;;  %v41_v23 = vld [vmem:[%s970_s0 + $0xd8] sm:$0xff] }
   0x9   :  { %545 = vmatpush3.msra.mxu0 %v50_v3  ;;  %607 = vmatpush3.msra.mxu1 %v50_v3  ;;  %v24_v24 = vld [vmem:[%s970_s0 + $0x50] sm:$0xff]  ;;  %v42_v25 = vld [vmem:[%s970_s0 + $0xe0] sm:$0xff]  ;;  %v25_v26 = vld [vmem:[%s970_s0 + $0x58] sm:$0xff] }
   0xa   :  { %546 = vmatprep.mubr.msk.f32.mxu0 %vm61_vm1, %v14_v4  ;;  %573 = vmatprep.mubr.msk.f32.mxu1 %vm61_vm1, %v32_v5  ;;  %v43_v27 = vld [vmem:[%s970_s0 + $0xe8] sm:$0xff]  ;;  %v26_v28 = vld [vmem:[%s970_s0 + $0x60] sm:$0xff]  ;;  %v44_v29 = vld [vmem:[%s970_s0 + $0xf0] sm:$0xff] }
   0xb   :  { %547 = vmatmul.mubr.msk.f32.vlgmr.msra.gmra.mxu0 %vm61_vm1, %v15_v6  ;;  %574 = vmatmul.mubr.msk.f32.vlgmr.msra.gmra.mxu1 %vm61_vm1, %v33_v7  ;;  %v27_v30 = vld [vmem:[%s970_s0 + $0x68] sm:$0xff]  ;;  %v45_v31 = vld [vmem:[%s970_s0 + $0xf8] sm:$0xff]  ;;  %v28_v32 = vld [vmem:[%s970_s0 + $0x70] sm:$0xff] }
   0xc   :  { %549 = vmatprep.mubr.msk.f32.mxu0 %vm61_vm1, %v16_v8  ;;  %576 = vmatprep.mubr.msk.f32.mxu1 %vm61_vm1, %v34_v9  ;;  %v46_v33 = vld [vmem:[%s970_s0 + $0x100] sm:$0xff]  ;;  %v29_v34 = vld [vmem:[%s970_s0 + $0x78] sm:$0xff]  ;;  %v47_v35 = vld [vmem:[%s970_s0 + $0x108] sm:$0xff] }
   0xd   :  { %v30_v36 = vld [vmem:[%s970_s0 + $0x80] sm:$0xff]  ;;  %v48_v37 = vld [vmem:[%s970_s0 + $0x110] sm:$0xff]  ;;  %v31_v38 = vld [vmem:[%s970_s0 + $0x88] sm:$0xff] }
   0xe   :  { %v49_v39 = vld [vmem:[%s970_s0 + $0x118] sm:$0xff]  ;;  %v787_v40 = vld [vmem:[%s971_s2] ss:$0 sm:$0xff] }
   0xf   :  { %550 = vmatmul.mubr.msk.f32.gmra.mxu0 %vm61_vm1, %v17_v10  ;;  %577 = vmatmul.mubr.msk.f32.gmra.mxu1 %vm61_vm1, %v35_v11 }
  0x10   :  { %552 = vmatprep.mubr.msk.f32.mxu0 %vm61_vm1, %v18_v12  ;;  %579 = vmatprep.mubr.msk.f32.mxu1 %vm61_vm1, %v36_v13 }
  0x13   :  { %553 = vmatmul.mubr.msk.f32.gmra.mxu0 %vm61_vm1, %v19_v14  ;;  %580 = vmatmul.mubr.msk.f32.gmra.mxu1 %vm61_vm1, %v37_v15 }
  0x14   :  { %555 = vmatprep.mubr.msk.f32.mxu0 %vm61_vm1, %v20_v16  ;;  %582 = vmatprep.mubr.msk.f32.mxu1 %vm61_vm1, %v38_v17 }
  0x17   :  { %556 = vmatmul.mubr.msk.f32.gmra.mxu0 %vm61_vm1, %v21_v18  ;;  %583 = vmatmul.mubr.msk.f32.gmra.mxu1 %vm61_vm1, %v39_v19 }
  0x18   :  { %558 = vmatprep.mubr.msk.f32.mxu0 %vm61_vm1, %v22_v20  ;;  %585 = vmatprep.mubr.msk.f32.mxu1 %vm61_vm1, %v40_v21 }
  0x1b   :  { %559 = vmatmul.mubr.msk.f32.gmra.mxu0 %vm61_vm1, %v23_v22  ;;  %586 = vmatmul.mubr.msk.f32.gmra.mxu1 %vm61_vm1, %v41_v23 }
  0x1c   :  { %561 = vmatprep.mubr.msk.f32.mxu0 %vm61_vm1, %v24_v24  ;;  %588 = vmatprep.mubr.msk.f32.mxu1 %vm61_vm1, %v42_v25 }
  0x1f   :  { %562 = vmatmul.mubr.msk.f32.gmra.mxu0 %vm61_vm1, %v25_v26  ;;  %589 = vmatmul.mubr.msk.f32.gmra.mxu1 %vm61_vm1, %v43_v27 }
  0x20   :  { %564 = vmatprep.mubr.msk.f32.mxu0 %vm61_vm1, %v26_v28  ;;  %591 = vmatprep.mubr.msk.f32.mxu1 %vm61_vm1, %v44_v29 }
  0x23   :  { %565 = vmatmul.mubr.msk.f32.gmra.mxu0 %vm61_vm1, %v27_v30  ;;  %592 = vmatmul.mubr.msk.f32.gmra.mxu1 %vm61_vm1, %v45_v31 }
  0x24   :  { %567 = vmatprep.mubr.msk.f32.mxu0 %vm61_vm1, %v28_v32  ;;  %594 = vmatprep.mubr.msk.f32.mxu1 %vm61_vm1, %v46_v33 }
  0x27   :  { %568 = vmatmul.mubr.msk.f32.gmra.mxu0 %vm61_vm1, %v29_v34  ;;  %595 = vmatmul.mubr.msk.f32.gmra.mxu1 %vm61_vm1, %v47_v35 }
  0x28   :  { %570 = vmatprep.mubr.msk.f32.mxu0 %vm61_vm1, %v30_v36  ;;  %597 = vmatprep.mubr.msk.f32.mxu1 %vm61_vm1, %v48_v37 }
  0x2b   :  { %571 = vmatmul.mubr.msk.f32.gmra.mxu0 %vm61_vm1, %v31_v38  ;;  %598 = vmatmul.mubr.msk.f32.gmra.mxu1 %vm61_vm1, %v49_v39 }
  0xcb   :  { %v548_v41 = vpop.f32.mrf.mxu0  ;;  %v575_v42 = vpop.f32.mrf.mxu1 }
  0xcc   :  { %v246_v43 = vadd.f32 %v548_v41, %v787_v40  ;;  %v336_v44 = vadd.f32 %v575_v42, %v787_v40 }
  0xcd   :  { %v240_v45 = vpop.f32.mrf.mxu0  ;;  %v330_v46 = vpop.f32.mrf.mxu1 }
  0xce   :  { %421 = vst.msk [vmem:[%s972_s3 + $0x8] sm:$0xff] %vm419_vm2, %v246_v43  ;;  %439 = vst.msk [vmem:[%s972_s3 + $0x98] sm:$0xff] %vm419_vm2, %v336_v44  ;;  %v241_v47 = vadd.f32 %v787_v40, %v240_v45  ;;  %v331_v48 = vadd.f32 %v787_v40, %v330_v46 }
  0xcf   :  { %v551_v49 = vpop.f32.mrf.mxu0  ;;  %v578_v50 = vpop.f32.mrf.mxu1 }
  0xd0   :  { %420 = vst.msk [vmem:[%s972_s3] sm:$0xff] %vm419_vm2, %v241_v47  ;;  %438 = vst.msk [vmem:[%s972_s3 + $0x90] sm:$0xff] %vm419_vm2, %v331_v48  ;;  %v256_v51 = vadd.f32 %v551_v49, %v787_v40  ;;  %v346_v52 = vadd.f32 %v578_v50, %v787_v40 }
  0xd1   :  { %v250_v53 = vpop.f32.mrf.mxu0  ;;  %v340_v54 = vpop.f32.mrf.mxu1 }
  0xd2   :  { %423 = vst.msk [vmem:[%s972_s3 + $0x18] sm:$0xff] %vm419_vm2, %v256_v51  ;;  %441 = vst.msk [vmem:[%s972_s3 + $0xa8] sm:$0xff] %vm419_vm2, %v346_v52  ;;  %v251_v55 = vadd.f32 %v787_v40, %v250_v53  ;;  %v341_v56 = vadd.f32 %v787_v40, %v340_v54 }
  0xd3   :  { %v554_v57 = vpop.f32.mrf.mxu0  ;;  %v581_v58 = vpop.f32.mrf.mxu1 }
  0xd4   :  { %422 = vst.msk [vmem:[%s972_s3 + $0x10] sm:$0xff] %vm419_vm2, %v251_v55  ;;  %440 = vst.msk [vmem:[%s972_s3 + $0xa0] sm:$0xff] %vm419_vm2, %v341_v56  ;;  %v266_v59 = vadd.f32 %v554_v57, %v787_v40  ;;  %v356_v60 = vadd.f32 %v581_v58, %v787_v40 }
  0xd5   :  { %v260_v61 = vpop.f32.mrf.mxu0  ;;  %v350_v62 = vpop.f32.mrf.mxu1 }
  0xd6   :  { %425 = vst.msk [vmem:[%s972_s3 + $0x28] sm:$0xff] %vm419_vm2, %v266_v59  ;;  %443 = vst.msk [vmem:[%s972_s3 + $0xb8] sm:$0xff] %vm419_vm2, %v356_v60  ;;  %v261_v63 = vadd.f32 %v787_v40, %v260_v61  ;;  %v351_v0 = vadd.f32 %v787_v40, %v350_v62 }
  0xd7   :  { %v557_v1 = vpop.f32.mrf.mxu0  ;;  %v584_v2 = vpop.f32.mrf.mxu1 }
  0xd8   :  { %424 = vst.msk [vmem:[%s972_s3 + $0x20] sm:$0xff] %vm419_vm2, %v261_v63  ;;  %442 = vst.msk [vmem:[%s972_s3 + $0xb0] sm:$0xff] %vm419_vm2, %v351_v0  ;;  %v276_v3 = vadd.f32 %v557_v1, %v787_v40  ;;  %v366_v4 = vadd.f32 %v584_v2, %v787_v40 }
  0xd9   :  { %v270_v5 = vpop.f32.mrf.mxu0  ;;  %v360_v6 = vpop.f32.mrf.mxu1 }
  0xda   :  { %427 = vst.msk [vmem:[%s972_s3 + $0x38] sm:$0xff] %vm419_vm2, %v276_v3  ;;  %445 = vst.msk [vmem:[%s972_s3 + $0xc8] sm:$0xff] %vm419_vm2, %v366_v4  ;;  %v271_v7 = vadd.f32 %v787_v40, %v270_v5  ;;  %v361_v8 = vadd.f32 %v787_v40, %v360_v6 }
  0xdb   :  { %v560_v9 = vpop.f32.mrf.mxu0  ;;  %v587_v10 = vpop.f32.mrf.mxu1 }
  0xdc   :  { %426 = vst.msk [vmem:[%s972_s3 + $0x30] sm:$0xff] %vm419_vm2, %v271_v7  ;;  %444 = vst.msk [vmem:[%s972_s3 + $0xc0] sm:$0xff] %vm419_vm2, %v361_v8  ;;  %v286_v11 = vadd.f32 %v560_v9, %v787_v40  ;;  %v376_v12 = vadd.f32 %v587_v10, %v787_v40 }
  0xdd   :  { %v280_v13 = vpop.f32.mrf.mxu0  ;;  %v370_v14 = vpop.f32.mrf.mxu1 }
  0xde   :  { %429 = vst.msk [vmem:[%s972_s3 + $0x48] sm:$0xff] %vm419_vm2, %v286_v11  ;;  %447 = vst.msk [vmem:[%s972_s3 + $0xd8] sm:$0xff] %vm419_vm2, %v376_v12  ;;  %v281_v15 = vadd.f32 %v787_v40, %v280_v13  ;;  %v371_v16 = vadd.f32 %v787_v40, %v370_v14 }
  0xdf   :  { %v563_v17 = vpop.f32.mrf.mxu0  ;;  %v590_v18 = vpop.f32.mrf.mxu1 }
  0xe0   :  { %428 = vst.msk [vmem:[%s972_s3 + $0x40] sm:$0xff] %vm419_vm2, %v281_v15  ;;  %446 = vst.msk [vmem:[%s972_s3 + $0xd0] sm:$0xff] %vm419_vm2, %v371_v16  ;;  %v296_v19 = vadd.f32 %v563_v17, %v787_v40  ;;  %v386_v20 = vadd.f32 %v590_v18, %v787_v40 }
  0xe1   :  { %v290_v21 = vpop.f32.mrf.mxu0  ;;  %v380_v22 = vpop.f32.mrf.mxu1 }
  0xe2   :  { %431 = vst.msk [vmem:[%s972_s3 + $0x58] sm:$0xff] %vm419_vm2, %v296_v19  ;;  %449 = vst.msk [vmem:[%s972_s3 + $0xe8] sm:$0xff] %vm419_vm2, %v386_v20  ;;  %v291_v23 = vadd.f32 %v787_v40, %v290_v21  ;;  %v381_v24 = vadd.f32 %v787_v40, %v380_v22 }
  0xe3   :  { %v566_v25 = vpop.f32.mrf.mxu0  ;;  %v593_v26 = vpop.f32.mrf.mxu1 }
  0xe4   :  { %430 = vst.msk [vmem:[%s972_s3 + $0x50] sm:$0xff] %vm419_vm2, %v291_v23  ;;  %448 = vst.msk [vmem:[%s972_s3 + $0xe0] sm:$0xff] %vm419_vm2, %v381_v24  ;;  %v306_v27 = vadd.f32 %v566_v25, %v787_v40  ;;  %v396_v28 = vadd.f32 %v593_v26, %v787_v40 }
  0xe5   :  { %v300_v29 = vpop.f32.mrf.mxu0  ;;  %v390_v30 = vpop.f32.mrf.mxu1 }
  0xe6   :  { %433 = vst.msk [vmem:[%s972_s3 + $0x68] sm:$0xff] %vm419_vm2, %v306_v27  ;;  %451 = vst.msk [vmem:[%s972_s3 + $0xf8] sm:$0xff] %vm419_vm2, %v396_v28  ;;  %v301_v31 = vadd.f32 %v787_v40, %v300_v29  ;;  %v391_v32 = vadd.f32 %v787_v40, %v390_v30 }
  0xe7   :  { %v569_v33 = vpop.f32.mrf.mxu0  ;;  %v596_v34 = vpop.f32.mrf.mxu1 }
  0xe8   :  { %432 = vst.msk [vmem:[%s972_s3 + $0x60] sm:$0xff] %vm419_vm2, %v301_v31  ;;  %450 = vst.msk [vmem:[%s972_s3 + $0xf0] sm:$0xff] %vm419_vm2, %v391_v32  ;;  %v316_v35 = vadd.f32 %v569_v33, %v787_v40  ;;  %v406_v36 = vadd.f32 %v596_v34, %v787_v40 }
  0xe9   :  { %v310_v37 = vpop.f32.mrf.mxu0  ;;  %v400_v38 = vpop.f32.mrf.mxu1 }
  0xea   :  { %435 = vst.msk [vmem:[%s972_s3 + $0x78] sm:$0xff] %vm419_vm2, %v316_v35  ;;  %453 = vst.msk [vmem:[%s972_s3 + $0x108] sm:$0xff] %vm419_vm2, %v406_v36  ;;  %v311_v39 = vadd.f32 %v787_v40, %v310_v37  ;;  %v401_v41 = vadd.f32 %v787_v40, %v400_v38 }
  0xeb   :  { %v572_v42 = vpop.f32.mrf.mxu0  ;;  %v599_v43 = vpop.f32.mrf.mxu1 }
  0xec   :  { %434 = vst.msk [vmem:[%s972_s3 + $0x70] sm:$0xff] %vm419_vm2, %v311_v39  ;;  %452 = vst.msk [vmem:[%s972_s3 + $0x100] sm:$0xff] %vm419_vm2, %v401_v41  ;;  %v326_v44 = vadd.f32 %v572_v42, %v787_v40  ;;  %v416_v45 = vadd.f32 %v599_v43, %v787_v40 }
  0xed   :  { %v320_v46 = vpop.f32.mrf.mxu0  ;;  %v410_v47 = vpop.f32.mrf.mxu1 }
  0xee   :  { %437 = vst.msk [vmem:[%s972_s3 + $0x88] sm:$0xff] %vm419_vm2, %v326_v44  ;;  %455 = vst.msk [vmem:[%s972_s3 + $0x118] sm:$0xff] %vm419_vm2, %v416_v45  ;;  %v321_v48 = vadd.f32 %v787_v40, %v320_v46  ;;  %v411_v49 = vadd.f32 %v787_v40, %v410_v47 }
  0xf0   :  { %436 = vst.msk [vmem:[%s972_s3 + $0x80] sm:$0xff] %vm419_vm2, %v321_v48  ;;  %454 = vst.msk [vmem:[%s972_s3 + $0x110] sm:$0xff] %vm419_vm2, %v411_v49 }

// kernel: _lambda_.7
= control target key start
LH: loop header
LB: loop body
LE: loop exit
PB: predicated region body
PF: predicated region fallthrough
CT: control target
= control target key end

     0   :  { %v1706_v0 = vmov 0.0   ;;  %vm373_vm0 = vcmask 261120   ;;  %s3240_s1 = inlined_call_operand.vmem [shape: f32[800,32], index: 1, kind: input, shape index: {}]   ;;  %s3241_s0 = inlined_call_operand.vmem [shape: f32[288,800], index: 0, kind: input, shape index: {}]   ;;  %s3242_s2 = inlined_call_operand.vmem [shape: f32[1,32], index: 2, kind: input, shape index: {}]   ;;  %s3243_s3 = inlined_call_operand.vmem [shape: f32[288,32], index: 3, kind: output, shape index: {}]  }
   0x1   :  { %482 = vmatprep.subr.mxu0 %v1706_v0  ;;  %727 = vmatprep.subr.mxu1 %v1706_v0  ;;  %v281_v1 = vld [vmem:[%s3240_s1 + $0x78] sm:$0xff]  ;;  %v280_v3 = vld [vmem:[%s3240_s1 + $0x70] sm:$0xff]  ;;  %v279_v5 = vld [vmem:[%s3240_s1 + $0x68] sm:$0xff] }
   0x2   :  { %v313_v2 = vld [vmem:[%s3240_s1 + $0x178] sm:$0xff]  ;;  %483 = vmatpush1.msra.mxu0 %v281_v1  ;;  %v312_v4 = vld [vmem:[%s3240_s1 + $0x170] sm:$0xff]  ;;  %v311_v6 = vld [vmem:[%s3240_s1 + $0x168] sm:$0xff] }
   0x3   :  { %728 = vmatpush1.msra.mxu1 %v313_v2  ;;  %484 = vmatprep.subr.mxu0 %v1706_v0  ;;  %v278_v7 = vld [vmem:[%s3240_s1 + $0x60] sm:$0xff]  ;;  %v277_v9 = vld [vmem:[%s3240_s1 + $0x58] sm:$0xff]  ;;  %v276_v11 = vld [vmem:[%s3240_s1 + $0x50] sm:$0xff] }
   0x4   :  { %729 = vmatprep.subr.mxu1 %v1706_v0  ;;  %485 = vmatpush1.msra.mxu0 %v280_v3  ;;  %v310_v8 = vld [vmem:[%s3240_s1 + $0x160] sm:$0xff]  ;;  %v309_v10 = vld [vmem:[%s3240_s1 + $0x158] sm:$0xff]  ;;  %v308_v12 = vld [vmem:[%s3240_s1 + $0x150] sm:$0xff] }
   0x5   :  { %730 = vmatpush1.msra.mxu1 %v312_v4  ;;  %486 = vmatprep.subr.mxu0 %v1706_v0  ;;  %v275_v13 = vld [vmem:[%s3240_s1 + $0x48] sm:$0xff]  ;;  %v274_v15 = vld [vmem:[%s3240_s1 + $0x40] sm:$0xff]  ;;  %v273_v17 = vld [vmem:[%s3240_s1 + $0x38] sm:$0xff] }
   0x6   :  { %731 = vmatprep.subr.mxu1 %v1706_v0  ;;  %487 = vmatpush1.msra.mxu0 %v279_v5  ;;  %v307_v14 = vld [vmem:[%s3240_s1 + $0x148] sm:$0xff]  ;;  %v306_v16 = vld [vmem:[%s3240_s1 + $0x140] sm:$0xff]  ;;  %v305_v18 = vld [vmem:[%s3240_s1 + $0x138] sm:$0xff] }
   0x7   :  { %732 = vmatpush1.msra.mxu1 %v311_v6  ;;  %488 = vmatprep.subr.mxu0 %v1706_v0  ;;  %v272_v19 = vld [vmem:[%s3240_s1 + $0x30] sm:$0xff]  ;;  %v271_v21 = vld [vmem:[%s3240_s1 + $0x28] sm:$0xff]  ;;  %v270_v23 = vld [vmem:[%s3240_s1 + $0x20] sm:$0xff] }
   0x8   :  { %733 = vmatprep.subr.mxu1 %v1706_v0  ;;  %489 = vmatpush1.msra.mxu0 %v278_v7  ;;  %v304_v20 = vld [vmem:[%s3240_s1 + $0x130] sm:$0xff]  ;;  %v303_v22 = vld [vmem:[%s3240_s1 + $0x128] sm:$0xff]  ;;  %v302_v24 = vld [vmem:[%s3240_s1 + $0x120] sm:$0xff] }
   0x9   :  { %734 = vmatpush1.msra.mxu1 %v310_v8  ;;  %490 = vmatprep.subr.mxu0 %v1706_v0  ;;  %v269_v25 = vld [vmem:[%s3240_s1 + $0x18] sm:$0xff]  ;;  %v268_v27 = vld [vmem:[%s3240_s1 + $0x10] sm:$0xff]  ;;  %v267_v29 = vld [vmem:[%s3240_s1 + $0x8] sm:$0xff] }
   0xa   :  { %735 = vmatprep.subr.mxu1 %v1706_v0  ;;  %491 = vmatpush1.msra.mxu0 %v277_v9  ;;  %v301_v26 = vld [vmem:[%s3240_s1 + $0x118] sm:$0xff]  ;;  %v300_v28 = vld [vmem:[%s3240_s1 + $0x110] sm:$0xff]  ;;  %v299_v30 = vld [vmem:[%s3240_s1 + $0x108] sm:$0xff] }
   0xb   :  { %736 = vmatpush1.msra.mxu1 %v309_v10  ;;  %492 = vmatprep.subr.mxu0 %v1706_v0  ;;  %v266_v31 = vld [vmem:[%s3240_s1] sm:$0xff]  ;;  %v297_v33 = vld [vmem:[%s3240_s1 + $0xf8] sm:$0xff]  ;;  %v296_v35 = vld [vmem:[%s3240_s1 + $0xf0] sm:$0xff] }
   0xc   :  { %737 = vmatprep.subr.mxu1 %v1706_v0  ;;  %493 = vmatpush1.msra.mxu0 %v276_v11  ;;  %v298_v32 = vld [vmem:[%s3240_s1 + $0x100] sm:$0xff]  ;;  %v329_v34 = vld [vmem:[%s3240_s1 + $0x1f8] sm:$0xff]  ;;  %v328_v36 = vld [vmem:[%s3240_s1 + $0x1f0] sm:$0xff] }
   0xd   :  { %738 = vmatpush1.msra.mxu1 %v308_v12  ;;  %494 = vmatprep.subr.mxu0 %v1706_v0  ;;  %v295_v37 = vld [vmem:[%s3240_s1 + $0xe8] sm:$0xff]  ;;  %v294_v39 = vld [vmem:[%s3240_s1 + $0xe0] sm:$0xff]  ;;  %v293_v41 = vld [vmem:[%s3240_s1 + $0xd8] sm:$0xff] }
   0xe   :  { %739 = vmatprep.subr.mxu1 %v1706_v0  ;;  %495 = vmatpush1.msra.mxu0 %v275_v13  ;;  %v327_v38 = vld [vmem:[%s3240_s1 + $0x1e8] sm:$0xff]  ;;  %v326_v40 = vld [vmem:[%s3240_s1 + $0x1e0] sm:$0xff]  ;;  %v325_v42 = vld [vmem:[%s3240_s1 + $0x1d8] sm:$0xff] }
   0xf   :  { %740 = vmatpush1.msra.mxu1 %v307_v14  ;;  %496 = vmatprep.subr.mxu0 %v1706_v0  ;;  %v292_v43 = vld [vmem:[%s3240_s1 + $0xd0] sm:$0xff]  ;;  %v291_v45 = vld [vmem:[%s3240_s1 + $0xc8] sm:$0xff]  ;;  %v290_v47 = vld [vmem:[%s3240_s1 + $0xc0] sm:$0xff] }
  0x10   :  { %741 = vmatprep.subr.mxu1 %v1706_v0  ;;  %497 = vmatpush1.msra.mxu0 %v274_v15  ;;  %v324_v44 = vld [vmem:[%s3240_s1 + $0x1d0] sm:$0xff]  ;;  %v323_v46 = vld [vmem:[%s3240_s1 + $0x1c8] sm:$0xff]  ;;  %v322_v48 = vld [vmem:[%s3240_s1 + $0x1c0] sm:$0xff] }
  0x11   :  { %742 = vmatpush1.msra.mxu1 %v306_v16  ;;  %498 = vmatprep.subr.mxu0 %v1706_v0  ;;  %v289_v49 = vld [vmem:[%s3240_s1 + $0xb8] sm:$0xff]  ;;  %v288_v51 = vld [vmem:[%s3240_s1 + $0xb0] sm:$0xff]  ;;  %v287_v53 = vld [vmem:[%s3240_s1 + $0xa8] sm:$0xff] }
  0x12   :  { %743 = vmatprep.subr.mxu1 %v1706_v0  ;;  %499 = vmatpush1.msra.mxu0 %v273_v17  ;;  %v321_v50 = vld [vmem:[%s3240_s1 + $0x1b8] sm:$0xff]  ;;  %v320_v52 = vld [vmem:[%s3240_s1 + $0x1b0] sm:$0xff]  ;;  %v319_v54 = vld [vmem:[%s3240_s1 + $0x1a8] sm:$0xff] }
  0x13   :  { %744 = vmatpush1.msra.mxu1 %v305_v18  ;;  %500 = vmatprep.subr.mxu0 %v1706_v0  ;;  %v286_v55 = vld [vmem:[%s3240_s1 + $0xa0] sm:$0xff]  ;;  %v285_v57 = vld [vmem:[%s3240_s1 + $0x98] sm:$0xff]  ;;  %v284_v59 = vld [vmem:[%s3240_s1 + $0x90] sm:$0xff] }
  0x14   :  { %745 = vmatprep.subr.mxu1 %v1706_v0  ;;  %501 = vmatpush1.msra.mxu0 %v272_v19  ;;  %v318_v56 = vld [vmem:[%s3240_s1 + $0x1a0] sm:$0xff]  ;;  %v317_v58 = vld [vmem:[%s3240_s1 + $0x198] sm:$0xff]  ;;  %v316_v60 = vld [vmem:[%s3240_s1 + $0x190] sm:$0xff] }
  0x15   :  { %746 = vmatpush1.msra.mxu1 %v304_v20  ;;  %502 = vmatprep.subr.mxu0 %v1706_v0  ;;  %v283_v61 = vld [vmem:[%s3240_s1 + $0x88] sm:$0xff]  ;;  %v282_v63 = vld [vmem:[%s3240_s1 + $0x80] sm:$0xff]  ;;  %v17_v3 = vld [vmem:[%s3241_s0 + $0x18] sm:$0xff] }
  0x16   :  { %747 = vmatprep.subr.mxu1 %v1706_v0  ;;  %503 = vmatpush1.msra.mxu0 %v271_v21  ;;  %v315_v62 = vld [vmem:[%s3240_s1 + $0x188] sm:$0xff]  ;;  %v314_v2 = vld [vmem:[%s3240_s1 + $0x180] sm:$0xff]  ;;  %v16_v5 = vld [vmem:[%s3241_s0 + $0x10] sm:$0xff] }
  0x17   :  { %748 = vmatpush1.msra.mxu1 %v303_v22  ;;  %504 = vmatprep.subr.mxu0 %v1706_v0  ;;  %v15_v1 = vld [vmem:[%s3241_s0 + $0x8] sm:$0xff]  ;;  %v14_v4 = vld [vmem:[%s3241_s0] sm:$0xff]  ;;  %v345_v6 = vld [vmem:[%s3240_s1 + $0x278] sm:$0xff] }
  0x18   :  { %749 = vmatprep.subr.mxu1 %v1706_v0  ;;  %505 = vmatpush1.msra.mxu0 %v270_v23  ;;  %v22_v7 = vld [vmem:[%s3241_s0 + $0x40] sm:$0xff]  ;;  %v24_v8 = vld [vmem:[%s3241_s0 + $0x50] sm:$0xff]  ;;  %v21_v9 = vld [vmem:[%s3241_s0 + $0x38] sm:$0xff] }
  0x19   :  { %750 = vmatpush1.msra.mxu1 %v302_v24  ;;  %506 = vmatprep.subr.mxu0 %v1706_v0  ;;  %v23_v10 = vld [vmem:[%s3241_s0 + $0x48] sm:$0xff]  ;;  %v344_v11 = vld [vmem:[%s3240_s1 + $0x270] sm:$0xff]  ;;  %v29_v12 = vld [vmem:[%s3241_s0 + $0x78] sm:$0xff] }
  0x1a   :  { %751 = vmatprep.subr.mxu1 %v1706_v0  ;;  %507 = vmatpush1.msra.mxu0 %v269_v25  ;;  %v31_v13 = vld [vmem:[%s3241_s0 + $0x88] sm:$0xff]  ;;  %v28_v14 = vld [vmem:[%s3241_s0 + $0x70] sm:$0xff]  ;;  %v30_v15 = vld [vmem:[%s3241_s0 + $0x80] sm:$0xff] }
  0x1b   :  { %752 = vmatpush1.msra.mxu1 %v301_v26  ;;  %508 = vmatprep.subr.mxu0 %v1706_v0  ;;  %v343_v16 = vld [vmem:[%s3240_s1 + $0x268] sm:$0xff]  ;;  %v36_v17 = vld [vmem:[%s3241_s0 + $0xb0] sm:$0xff]  ;;  %v38_v18 = vld [vmem:[%s3241_s0 + $0xc0] sm:$0xff] }
  0x1c   :  { %753 = vmatprep.subr.mxu1 %v1706_v0  ;;  %509 = vmatpush1.msra.mxu0 %v268_v27  ;;  %v35_v19 = vld [vmem:[%s3241_s0 + $0xa8] sm:$0xff]  ;;  %v37_v20 = vld [vmem:[%s3241_s0 + $0xb8] sm:$0xff]  ;;  %v342_v23 = vld [vmem:[%s3240_s1 + $0x260] sm:$0xff] }
  0x1d   :  { %754 = vmatpush1.msra.mxu1 %v300_v28  ;;  %510 = vmatprep.subr.mxu0 %v1706_v0  ;;  %v43_v21 = vld [vmem:[%s3241_s0 + $0xe8] sm:$0xff]  ;;  %v45_v22 = vld [vmem:[%s3241_s0 + $0xf8] sm:$0xff]  ;;  %v42_v24 = vld [vmem:[%s3241_s0 + $0xe0] sm:$0xff] }
  0x1e   :  { %755 = vmatprep.subr.mxu1 %v1706_v0  ;;  %511 = vmatpush1.msra.mxu0 %v267_v29  ;;  %v44_v25 = vld [vmem:[%s3241_s0 + $0xf0] sm:$0xff]  ;;  %v50_v26 = vld [vmem:[%s3241_s0 + $0x120] sm:$0xff]  ;;  %v341_v28 = vld [vmem:[%s3240_s1 + $0x258] sm:$0xff] }
  0x1f   :  { %756 = vmatpush1.msra.mxu1 %v299_v30  ;;  %512 = vmatprep.subr.mxu0 %v1706_v0  ;;  %v52_v27 = vld [vmem:[%s3241_s0 + $0x130] sm:$0xff]  ;;  %v49_v29 = vld [vmem:[%s3241_s0 + $0x118] sm:$0xff]  ;;  %v51_v30 = vld [vmem:[%s3241_s0 + $0x128] sm:$0xff] }
  0x20   :  { %757 = vmatprep.subr.mxu1 %v1706_v0  ;;  %513 = vmatpush1.msra.mxu0 %v266_v31  ;;  %v57_v31 = vld [vmem:[%s3241_s0 + $0x158] sm:$0xff] }
  0x21   :  { %758 = vmatpush1.msra.mxu1 %v298_v32  ;;  %514 = vmatprep.subr.mxu0 %v1706_v0  ;;  %v59_v32 = vld [vmem:[%s3241_s0 + $0x168] sm:$0xff] }
  0x22   :  { %759 = vmatprep.subr.mxu1 %v1706_v0  ;;  %515 = vmatpush2.msra.mxu0 %v297_v33  ;;  %v340_v33 = vld [vmem:[%s3240_s1 + $0x250] sm:$0xff] }
  0x23   :  { %760 = vmatpush2.msra.mxu1 %v329_v34  ;;  %516 = vmatprep.subr.mxu0 %v1706_v0  ;;  %v56_v34 = vld [vmem:[%s3241_s0 + $0x150] sm:$0xff] }
  0x24   :  { %761 = vmatprep.subr.mxu1 %v1706_v0  ;;  %517 = vmatpush2.msra.mxu0 %v296_v35  ;;  %v58_v35 = vld [vmem:[%s3241_s0 + $0x160] sm:$0xff] }
  0x25   :  { %762 = vmatpush2.msra.mxu1 %v328_v36  ;;  %518 = vmatprep.subr.mxu0 %v1706_v0  ;;  %v64_v36 = vld [vmem:[%s3241_s0 + $0x190] sm:$0xff] }
  0x26   :  { %763 = vmatprep.subr.mxu1 %v1706_v0  ;;  %519 = vmatpush2.msra.mxu0 %v295_v37  ;;  %v66_v37 = vld [vmem:[%s3241_s0 + $0x1a0] sm:$0xff] }
  0x27   :  { %764 = vmatpush2.msra.mxu1 %v327_v38  ;;  %520 = vmatprep.subr.mxu0 %v1706_v0  ;;  %v339_v38 = vld [vmem:[%s3240_s1 + $0x248] sm:$0xff] }
  0x28   :  { %765 = vmatprep.subr.mxu1 %v1706_v0  ;;  %521 = vmatpush2.msra.mxu0 %v294_v39  ;;  %v63_v39 = vld [vmem:[%s3241_s0 + $0x188] sm:$0xff] }
  0x29   :  { %766 = vmatpush2.msra.mxu1 %v326_v40  ;;  %522 = vmatprep.subr.mxu0 %v1706_v0  ;;  %v65_v40 = vld [vmem:[%s3241_s0 + $0x198] sm:$0xff] }
  0x2a   :  { %767 = vmatprep.subr.mxu1 %v1706_v0  ;;  %523 = vmatpush2.msra.mxu0 %v293_v41  ;;  %v71_v41 = vld [vmem:[%s3241_s0 + $0x1c8] sm:$0xff] }
  0x2b   :  { %768 = vmatpush2.msra.mxu1 %v325_v42  ;;  %524 = vmatprep.subr.mxu0 %v1706_v0  ;;  %v73_v42 = vld [vmem:[%s3241_s0 + $0x1d8] sm:$0xff] }
  0x2c   :  { %769 = vmatprep.subr.mxu1 %v1706_v0  ;;  %525 = vmatpush2.msra.mxu0 %v292_v43  ;;  %v338_v43 = vld [vmem:[%s3240_s1 + $0x240] sm:$0xff] }
  0x2d   :  { %770 = vmatpush2.msra.mxu1 %v324_v44  ;;  %526 = vmatprep.subr.mxu0 %v1706_v0  ;;  %v70_v44 = vld [vmem:[%s3241_s0 + $0x1c0] sm:$0xff] }
  0x2e   :  { %771 = vmatprep.subr.mxu1 %v1706_v0  ;;  %527 = vmatpush2.msra.mxu0 %v291_v45  ;;  %v72_v45 = vld [vmem:[%s3241_s0 + $0x1d0] sm:$0xff] }
  0x2f   :  { %772 = vmatpush2.msra.mxu1 %v323_v46  ;;  %528 = vmatprep.subr.mxu0 %v1706_v0  ;;  %v78_v46 = vld [vmem:[%s3241_s0 + $0x200] sm:$0xff] }
  0x30   :  { %773 = vmatprep.subr.mxu1 %v1706_v0  ;;  %529 = vmatpush2.msra.mxu0 %v290_v47  ;;  %v80_v47 = vld [vmem:[%s3241_s0 + $0x210] sm:$0xff] }
  0x31   :  { %774 = vmatpush2.msra.mxu1 %v322_v48  ;;  %530 = vmatprep.subr.mxu0 %v1706_v0  ;;  %v337_v48 = vld [vmem:[%s3240_s1 + $0x238] sm:$0xff] }
  0x32   :  { %775 = vmatprep.subr.mxu1 %v1706_v0  ;;  %531 = vmatpush2.msra.mxu0 %v289_v49  ;;  %v77_v49 = vld [vmem:[%s3241_s0 + $0x1f8] sm:$0xff] }
  0x33   :  { %776 = vmatpush2.msra.mxu1 %v321_v50  ;;  %532 = vmatprep.subr.mxu0 %v1706_v0  ;;  %v79_v50 = vld [vmem:[%s3241_s0 + $0x208] sm:$0xff] }
  0x34   :  { %777 = vmatprep.subr.mxu1 %v1706_v0  ;;  %533 = vmatpush2.msra.mxu0 %v288_v51  ;;  %v85_v51 = vld [vmem:[%s3241_s0 + $0x238] sm:$0xff] }
  0x35   :  { %778 = vmatpush2.msra.mxu1 %v320_v52  ;;  %534 = vmatprep.subr.mxu0 %v1706_v0  ;;  %v87_v52 = vld [vmem:[%s3241_s0 + $0x248] sm:$0xff] }
  0x36   :  { %779 = vmatprep.subr.mxu1 %v1706_v0  ;;  %535 = vmatpush2.msra.mxu0 %v287_v53  ;;  %v336_v53 = vld [vmem:[%s3240_s1 + $0x230] sm:$0xff] }
  0x37   :  { %780 = vmatpush2.msra.mxu1 %v319_v54  ;;  %536 = vmatprep.subr.mxu0 %v1706_v0  ;;  %v84_v54 = vld [vmem:[%s3241_s0 + $0x230] sm:$0xff] }
  0x38   :  { %781 = vmatprep.subr.mxu1 %v1706_v0  ;;  %537 = vmatpush2.msra.mxu0 %v286_v55  ;;  %v86_v55 = vld [vmem:[%s3241_s0 + $0x240] sm:$0xff] }
  0x39   :  { %782 = vmatpush2.msra.mxu1 %v318_v56  ;;  %538 = vmatprep.subr.mxu0 %v1706_v0  ;;  %v92_v56 = vld [vmem:[%s3241_s0 + $0x270] sm:$0xff] }
  0x3a   :  { %783 = vmatprep.subr.mxu1 %v1706_v0  ;;  %539 = vmatpush2.msra.mxu0 %v285_v57  ;;  %v94_v57 = vld [vmem:[%s3241_s0 + $0x280] sm:$0xff] }
  0x3b   :  { %784 = vmatpush2.msra.mxu1 %v317_v58  ;;  %540 = vmatprep.subr.mxu0 %v1706_v0  ;;  %v335_v58 = vld [vmem:[%s3240_s1 + $0x228] sm:$0xff] }
  0x3c   :  { %785 = vmatprep.subr.mxu1 %v1706_v0  ;;  %541 = vmatpush2.msra.mxu0 %v284_v59  ;;  %v91_v59 = vld [vmem:[%s3241_s0 + $0x268] sm:$0xff] }
  0x3d   :  { %786 = vmatpush2.msra.mxu1 %v316_v60  ;;  %542 = vmatprep.subr.mxu0 %v1706_v0  ;;  %v93_v60 = vld [vmem:[%s3241_s0 + $0x278] sm:$0xff] }
  0x3e   :  { %787 = vmatprep.subr.mxu1 %v1706_v0  ;;  %543 = vmatpush2.msra.mxu0 %v283_v61  ;;  %v99_v61 = vld [vmem:[%s3241_s0 + $0x2a8] sm:$0xff] }
  0x3f   :  { %788 = vmatpush2.msra.mxu1 %v315_v62  ;;  %544 = vmatprep.subr.mxu0 %v1706_v0  ;;  %v101_v62 = vld [vmem:[%s3241_s0 + $0x2b8] sm:$0xff] }
  0x40   :  { %789 = vmatprep.subr.mxu1 %v1706_v0  ;;  %545 = vmatpush2.msra.mxu0 %v282_v63  ;;  %v334_v63 = vld [vmem:[%s3240_s1 + $0x220] sm:$0xff] }
  0x41   :  { %546 = vmatprep.mubr.f32.mxu0 %v15_v1  ;;  %790 = vmatpush2.msra.mxu1 %v314_v2  ;;  %v98_v1 = vld [vmem:[%s3241_s0 + $0x2a0] sm:$0xff]  ;;  %v100_v2 = vld [vmem:[%s3241_s0 + $0x2b0] sm:$0xff] }
  0x42   :  { %791 = vmatprep.mubr.f32.mxu1 %v17_v3  ;;  %547 = vmatmul.mubr.f32.vlgmr.msra.gmra.mxu0 %v14_v4  ;;  %v106_v3 = vld [vmem:[%s3241_s0 + $0x2e0] sm:$0xff]  ;;  %v108_v4 = vld [vmem:[%s3241_s0 + $0x2f0] sm:$0xff] }
  0x43   :  { %792 = vmatmul.mubr.f32.vlgmr.msra.gmra.mxu1 %v16_v5  ;;  %972 = vmatprep.subr.mxu0 %v1706_v0  ;;  %v333_v5 = vld [vmem:[%s3240_s1 + $0x218] sm:$0xff] }
  0x44   :  { %1641 = vmatprep.subr.mxu1 %v1706_v0  ;;  %973 = vmatpush1.msra.mxu0 %v345_v6 }
  0x45   :  { %1673 = vmatpush1.msra.mxu1 %v345_v6  ;;  %551 = vmatprep.mubr.f32.mxu0 %v22_v7  ;;  %v105_v6 = vld [vmem:[%s3241_s0 + $0x2d8] sm:$0xff]  ;;  %v107_v7 = vld [vmem:[%s3241_s0 + $0x2e8] sm:$0xff] }
  0x46   :  { %796 = vmatprep.mubr.f32.mxu1 %v24_v8  ;;  %552 = vmatmul.mubr.f32.gmra.mxu0 %v21_v9  ;;  %v113_v8 = vld [vmem:[%s3241_s0 + $0x318] sm:$0xff]  ;;  %v115_v9 = vld [vmem:[%s3241_s0 + $0x328] sm:$0xff] }
  0x47   :  { %797 = vmatmul.mubr.f32.gmra.mxu1 %v23_v10  ;;  %974 = vmatprep.subr.mxu0 %v1706_v0  ;;  %v332_v10 = vld [vmem:[%s3240_s1 + $0x210] sm:$0xff] }
  0x48   :  { %1642 = vmatprep.subr.mxu1 %v1706_v0  ;;  %975 = vmatpush1.msra.mxu0 %v344_v11 }
  0x49   :  { %1674 = vmatpush1.msra.mxu1 %v344_v11  ;;  %556 = vmatprep.mubr.f32.mxu0 %v29_v12  ;;  %v112_v11 = vld [vmem:[%s3241_s0 + $0x310] sm:$0xff]  ;;  %v114_v12 = vld [vmem:[%s3241_s0 + $0x320] sm:$0xff] }
  0x4a   :  { %801 = vmatprep.mubr.f32.mxu1 %v31_v13  ;;  %557 = vmatmul.mubr.f32.gmra.mxu0 %v28_v14  ;;  %v120_v13 = vld [vmem:[%s3241_s0 + $0x350] sm:$0xff]  ;;  %v122_v14 = vld [vmem:[%s3241_s0 + $0x360] sm:$0xff] }
  0x4b   :  { %802 = vmatmul.mubr.f32.gmra.mxu1 %v30_v15  ;;  %976 = vmatprep.subr.mxu0 %v1706_v0  ;;  %v331_v15 = vld [vmem:[%s3240_s1 + $0x208] sm:$0xff] }
  0x4c   :  { %1643 = vmatprep.subr.mxu1 %v1706_v0  ;;  %977 = vmatpush1.msra.mxu0 %v343_v16 }
  0x4d   :  { %1675 = vmatpush1.msra.mxu1 %v343_v16  ;;  %561 = vmatprep.mubr.f32.mxu0 %v36_v17  ;;  %v119_v16 = vld [vmem:[%s3241_s0 + $0x348] sm:$0xff]  ;;  %v121_v17 = vld [vmem:[%s3241_s0 + $0x358] sm:$0xff] }
  0x4e   :  { %806 = vmatprep.mubr.f32.mxu1 %v38_v18  ;;  %562 = vmatmul.mubr.f32.gmra.mxu0 %v35_v19  ;;  %v127_v18 = vld [vmem:[%s3241_s0 + $0x388] sm:$0xff]  ;;  %v129_v19 = vld [vmem:[%s3241_s0 + $0x398] sm:$0xff] }
  0x4f   :  { %807 = vmatmul.mubr.f32.gmra.mxu1 %v37_v20  ;;  %978 = vmatprep.subr.mxu0 %v1706_v0  ;;  %v330_v20 = vld [vmem:[%s3240_s1 + $0x200] sm:$0xff] }
  0x50   :  { %1644 = vmatprep.subr.mxu1 %v1706_v0  ;;  %566 = vmatprep.mubr.f32.mxu0 %v43_v21  ;;  %v126_v21 = vld [vmem:[%s3241_s0 + $0x380] sm:$0xff] }
  0x51   :  { %811 = vmatprep.mubr.f32.mxu1 %v45_v22  ;;  %979 = vmatpush1.msra.mxu0 %v342_v23  ;;  %v128_v22 = vld [vmem:[%s3241_s0 + $0x390] sm:$0xff] }
  0x52   :  { %1676 = vmatpush1.msra.mxu1 %v342_v23  ;;  %567 = vmatmul.mubr.f32.gmra.mxu0 %v42_v24  ;;  %v134_v23 = vld [vmem:[%s3241_s0 + $0x3c0] sm:$0xff]  ;;  %v136_v24 = vld [vmem:[%s3241_s0 + $0x3d0] sm:$0xff] }
  0x53   :  { %812 = vmatmul.mubr.f32.gmra.mxu1 %v44_v25  ;;  %980 = vmatprep.subr.mxu0 %v1706_v0  ;;  %v361_v25 = vld [vmem:[%s3240_s1 + $0x2f8] sm:$0xff] }
  0x54   :  { %1645 = vmatprep.subr.mxu1 %v1706_v0  ;;  %571 = vmatprep.mubr.f32.mxu0 %v50_v26  ;;  %v133_v26 = vld [vmem:[%s3241_s0 + $0x3b8] sm:$0xff] }
  0x55   :  { %816 = vmatprep.mubr.f32.mxu1 %v52_v27  ;;  %981 = vmatpush1.msra.mxu0 %v341_v28  ;;  %v135_v27 = vld [vmem:[%s3241_s0 + $0x3c8] sm:$0xff] }
  0x56   :  { %1677 = vmatpush1.msra.mxu1 %v341_v28  ;;  %572 = vmatmul.mubr.f32.gmra.mxu0 %v49_v29  ;;  %v141_v28 = vld [vmem:[%s3241_s0 + $0x3f8] sm:$0xff]  ;;  %v143_v29 = vld [vmem:[%s3241_s0 + $0x408] sm:$0xff] }
  0x57   :  { %817 = vmatmul.mubr.f32.gmra.mxu1 %v51_v30  ;;  %576 = vmatprep.mubr.f32.mxu0 %v57_v31  ;;  %v360_v30 = vld [vmem:[%s3240_s1 + $0x2f0] sm:$0xff] }
  0x58   :  { %821 = vmatprep.mubr.f32.mxu1 %v59_v32  ;;  %982 = vmatprep.subr.mxu0 %v1706_v0  ;;  %v140_v31 = vld [vmem:[%s3241_s0 + $0x3f0] sm:$0xff]  ;;  %v142_v32 = vld [vmem:[%s3241_s0 + $0x400] sm:$0xff] }
  0x59   :  { %1646 = vmatprep.subr.mxu1 %v1706_v0  ;;  %983 = vmatpush1.msra.mxu0 %v340_v33 }
  0x5a   :  { %1678 = vmatpush1.msra.mxu1 %v340_v33  ;;  %577 = vmatmul.mubr.f32.gmra.mxu0 %v56_v34  ;;  %v148_v33 = vld [vmem:[%s3241_s0 + $0x430] sm:$0xff]  ;;  %v150_v34 = vld [vmem:[%s3241_s0 + $0x440] sm:$0xff] }
  0x5b   :  { %822 = vmatmul.mubr.f32.gmra.mxu1 %v58_v35  ;;  %581 = vmatprep.mubr.f32.mxu0 %v64_v36  ;;  %v359_v35 = vld [vmem:[%s3240_s1 + $0x2e8] sm:$0xff] }
  0x5c   :  { %826 = vmatprep.mubr.f32.mxu1 %v66_v37  ;;  %984 = vmatprep.subr.mxu0 %v1706_v0  ;;  %v147_v36 = vld [vmem:[%s3241_s0 + $0x428] sm:$0xff]  ;;  %v149_v37 = vld [vmem:[%s3241_s0 + $0x438] sm:$0xff] }
  0x5d   :  { %1647 = vmatprep.subr.mxu1 %v1706_v0  ;;  %985 = vmatpush1.msra.mxu0 %v339_v38 }
  0x5e   :  { %1679 = vmatpush1.msra.mxu1 %v339_v38  ;;  %582 = vmatmul.mubr.f32.gmra.mxu0 %v63_v39  ;;  %v155_v38 = vld [vmem:[%s3241_s0 + $0x468] sm:$0xff]  ;;  %v157_v39 = vld [vmem:[%s3241_s0 + $0x478] sm:$0xff] }
  0x5f   :  { %827 = vmatmul.mubr.f32.gmra.mxu1 %v65_v40  ;;  %586 = vmatprep.mubr.f32.mxu0 %v71_v41  ;;  %v358_v40 = vld [vmem:[%s3240_s1 + $0x2e0] sm:$0xff] }
  0x60   :  { %831 = vmatprep.mubr.f32.mxu1 %v73_v42  ;;  %986 = vmatprep.subr.mxu0 %v1706_v0  ;;  %v154_v41 = vld [vmem:[%s3241_s0 + $0x460] sm:$0xff]  ;;  %v156_v42 = vld [vmem:[%s3241_s0 + $0x470] sm:$0xff] }
  0x61   :  { %1648 = vmatprep.subr.mxu1 %v1706_v0  ;;  %987 = vmatpush1.msra.mxu0 %v338_v43 }
  0x62   :  { %1680 = vmatpush1.msra.mxu1 %v338_v43  ;;  %587 = vmatmul.mubr.f32.gmra.mxu0 %v70_v44  ;;  %v162_v43 = vld [vmem:[%s3241_s0 + $0x4a0] sm:$0xff]  ;;  %v164_v44 = vld [vmem:[%s3241_s0 + $0x4b0] sm:$0xff] }
  0x63   :  { %832 = vmatmul.mubr.f32.gmra.mxu1 %v72_v45  ;;  %591 = vmatprep.mubr.f32.mxu0 %v78_v46  ;;  %v357_v45 = vld [vmem:[%s3240_s1 + $0x2d8] sm:$0xff] }
  0x64   :  { %836 = vmatprep.mubr.f32.mxu1 %v80_v47  ;;  %988 = vmatprep.subr.mxu0 %v1706_v0  ;;  %v161_v46 = vld [vmem:[%s3241_s0 + $0x498] sm:$0xff]  ;;  %v163_v47 = vld [vmem:[%s3241_s0 + $0x4a8] sm:$0xff] }
  0x65   :  { %1649 = vmatprep.subr.mxu1 %v1706_v0  ;;  %989 = vmatpush1.msra.mxu0 %v337_v48 }
  0x66   :  { %1681 = vmatpush1.msra.mxu1 %v337_v48  ;;  %592 = vmatmul.mubr.f32.gmra.mxu0 %v77_v49  ;;  %v169_v48 = vld [vmem:[%s3241_s0 + $0x4d8] sm:$0xff]  ;;  %v171_v49 = vld [vmem:[%s3241_s0 + $0x4e8] sm:$0xff] }
  0x67   :  { %837 = vmatmul.mubr.f32.gmra.mxu1 %v79_v50  ;;  %596 = vmatprep.mubr.f32.mxu0 %v85_v51  ;;  %v356_v50 = vld [vmem:[%s3240_s1 + $0x2d0] sm:$0xff] }
  0x68   :  { %841 = vmatprep.mubr.f32.mxu1 %v87_v52  ;;  %990 = vmatprep.subr.mxu0 %v1706_v0  ;;  %v168_v51 = vld [vmem:[%s3241_s0 + $0x4d0] sm:$0xff]  ;;  %v170_v52 = vld [vmem:[%s3241_s0 + $0x4e0] sm:$0xff] }
  0x69   :  { %1650 = vmatprep.subr.mxu1 %v1706_v0  ;;  %991 = vmatpush1.msra.mxu0 %v336_v53 }
  0x6a   :  { %1682 = vmatpush1.msra.mxu1 %v336_v53  ;;  %597 = vmatmul.mubr.f32.gmra.mxu0 %v84_v54  ;;  %v176_v53 = vld [vmem:[%s3241_s0 + $0x510] sm:$0xff]  ;;  %v178_v54 = vld [vmem:[%s3241_s0 + $0x520] sm:$0xff] }
  0x6b   :  { %842 = vmatmul.mubr.f32.gmra.mxu1 %v86_v55  ;;  %601 = vmatprep.mubr.f32.mxu0 %v92_v56  ;;  %v355_v55 = vld [vmem:[%s3240_s1 + $0x2c8] sm:$0xff] }
  0x6c   :  { %846 = vmatprep.mubr.f32.mxu1 %v94_v57  ;;  %992 = vmatprep.subr.mxu0 %v1706_v0  ;;  %v175_v56 = vld [vmem:[%s3241_s0 + $0x508] sm:$0xff]  ;;  %v177_v57 = vld [vmem:[%s3241_s0 + $0x518] sm:$0xff] }
  0x6d   :  { %1651 = vmatprep.subr.mxu1 %v1706_v0  ;;  %993 = vmatpush1.msra.mxu0 %v335_v58 }
  0x6e   :  { %1683 = vmatpush1.msra.mxu1 %v335_v58  ;;  %602 = vmatmul.mubr.f32.gmra.mxu0 %v91_v59  ;;  %v183_v58 = vld [vmem:[%s3241_s0 + $0x548] sm:$0xff]  ;;  %v185_v59 = vld [vmem:[%s3241_s0 + $0x558] sm:$0xff] }
  0x6f   :  { %847 = vmatmul.mubr.f32.gmra.mxu1 %v93_v60  ;;  %606 = vmatprep.mubr.f32.mxu0 %v99_v61  ;;  %v354_v60 = vld [vmem:[%s3240_s1 + $0x2c0] sm:$0xff] }
  0x70   :  { %851 = vmatprep.mubr.f32.mxu1 %v101_v62  ;;  %994 = vmatprep.subr.mxu0 %v1706_v0  ;;  %v182_v61 = vld [vmem:[%s3241_s0 + $0x540] sm:$0xff]  ;;  %v184_v62 = vld [vmem:[%s3241_s0 + $0x550] sm:$0xff] }
  0x71   :  { %1652 = vmatprep.subr.mxu1 %v1706_v0  ;;  %995 = vmatpush1.msra.mxu0 %v334_v63 }
  0x72   :  { %1684 = vmatpush1.msra.mxu1 %v334_v63  ;;  %607 = vmatmul.mubr.f32.gmra.mxu0 %v98_v1  ;;  %v190_v63 = vld [vmem:[%s3241_s0 + $0x580] sm:$0xff]  ;;  %v192_v1 = vld [vmem:[%s3241_s0 + $0x590] sm:$0xff] }
  0x73   :  { %852 = vmatmul.mubr.f32.gmra.mxu1 %v100_v2  ;;  %611 = vmatprep.mubr.f32.mxu0 %v106_v3  ;;  %v353_v2 = vld [vmem:[%s3240_s1 + $0x2b8] sm:$0xff] }
  0x74   :  { %856 = vmatprep.mubr.f32.mxu1 %v108_v4  ;;  %996 = vmatprep.subr.mxu0 %v1706_v0  ;;  %v189_v3 = vld [vmem:[%s3241_s0 + $0x578] sm:$0xff]  ;;  %v191_v4 = vld [vmem:[%s3241_s0 + $0x588] sm:$0xff] }
  0x75   :  { %1653 = vmatprep.subr.mxu1 %v1706_v0  ;;  %997 = vmatpush1.msra.mxu0 %v333_v5 }
  0x76   :  { %1685 = vmatpush1.msra.mxu1 %v333_v5  ;;  %612 = vmatmul.mubr.f32.gmra.mxu0 %v105_v6  ;;  %v197_v5 = vld [vmem:[%s3241_s0 + $0x5b8] sm:$0xff]  ;;  %v199_v6 = vld [vmem:[%s3241_s0 + $0x5c8] sm:$0xff] }
  0x77   :  { %857 = vmatmul.mubr.f32.gmra.mxu1 %v107_v7  ;;  %616 = vmatprep.mubr.f32.mxu0 %v113_v8  ;;  %v352_v7 = vld [vmem:[%s3240_s1 + $0x2b0] sm:$0xff] }
  0x78   :  { %861 = vmatprep.mubr.f32.mxu1 %v115_v9  ;;  %998 = vmatprep.subr.mxu0 %v1706_v0  ;;  %v196_v8 = vld [vmem:[%s3241_s0 + $0x5b0] sm:$0xff]  ;;  %v198_v9 = vld [vmem:[%s3241_s0 + $0x5c0] sm:$0xff] }
  0x79   :  { %1654 = vmatprep.subr.mxu1 %v1706_v0  ;;  %999 = vmatpush1.msra.mxu0 %v332_v10 }
  0x7a   :  { %1686 = vmatpush1.msra.mxu1 %v332_v10  ;;  %617 = vmatmul.mubr.f32.gmra.mxu0 %v112_v11  ;;  %v204_v10 = vld [vmem:[%s3241_s0 + $0x5f0] sm:$0xff]  ;;  %v206_v11 = vld [vmem:[%s3241_s0 + $0x600] sm:$0xff] }
  0x7b   :  { %862 = vmatmul.mubr.f32.gmra.mxu1 %v114_v12  ;;  %621 = vmatprep.mubr.f32.mxu0 %v120_v13  ;;  %v351_v12 = vld [vmem:[%s3240_s1 + $0x2a8] sm:$0xff] }
  0x7c   :  { %866 = vmatprep.mubr.f32.mxu1 %v122_v14  ;;  %1000 = vmatprep.subr.mxu0 %v1706_v0  ;;  %v203_v13 = vld [vmem:[%s3241_s0 + $0x5e8] sm:$0xff]  ;;  %v205_v14 = vld [vmem:[%s3241_s0 + $0x5f8] sm:$0xff] }
  0x7d   :  { %1655 = vmatprep.subr.mxu1 %v1706_v0  ;;  %1001 = vmatpush1.msra.mxu0 %v331_v15 }
  0x7e   :  { %1687 = vmatpush1.msra.mxu1 %v331_v15  ;;  %622 = vmatmul.mubr.f32.gmra.mxu0 %v119_v16  ;;  %v211_v15 = vld [vmem:[%s3241_s0 + $0x628] sm:$0xff]  ;;  %v213_v16 = vld [vmem:[%s3241_s0 + $0x638] sm:$0xff] }
  0x7f   :  { %867 = vmatmul.mubr.f32.gmra.mxu1 %v121_v17  ;;  %626 = vmatprep.mubr.f32.mxu0 %v127_v18  ;;  %v350_v17 = vld [vmem:[%s3240_s1 + $0x2a0] sm:$0xff] }
  0x80   :  { %871 = vmatprep.mubr.f32.mxu1 %v129_v19  ;;  %1002 = vmatprep.subr.mxu0 %v1706_v0  ;;  %v210_v18 = vld [vmem:[%s3241_s0 + $0x620] sm:$0xff]  ;;  %v212_v19 = vld [vmem:[%s3241_s0 + $0x630] sm:$0xff] }
  0x81   :  { %1656 = vmatprep.subr.mxu1 %v1706_v0  ;;  %1003 = vmatpush1.msra.mxu0 %v330_v20 }
  0x82   :  { %1688 = vmatpush1.msra.mxu1 %v330_v20  ;;  %627 = vmatmul.mubr.f32.gmra.mxu0 %v126_v21  ;;  %v218_v20 = vld [vmem:[%s3241_s0 + $0x660] sm:$0xff]  ;;  %v220_v21 = vld [vmem:[%s3241_s0 + $0x670] sm:$0xff] }
  0x83   :  { %872 = vmatmul.mubr.f32.gmra.mxu1 %v128_v22  ;;  %631 = vmatprep.mubr.f32.mxu0 %v134_v23  ;;  %v349_v22 = vld [vmem:[%s3240_s1 + $0x298] sm:$0xff] }
  0x84   :  { %876 = vmatprep.mubr.f32.mxu1 %v136_v24  ;;  %1004 = vmatprep.subr.mxu0 %v1706_v0  ;;  %v217_v23 = vld [vmem:[%s3241_s0 + $0x658] sm:$0xff]  ;;  %v219_v24 = vld [vmem:[%s3241_s0 + $0x668] sm:$0xff] }
  0x85   :  { %1657 = vmatprep.subr.mxu1 %v1706_v0  ;;  %1005 = vmatpush2.msra.mxu0 %v361_v25 }
  0x86   :  { %1689 = vmatpush2.msra.mxu1 %v361_v25  ;;  %632 = vmatmul.mubr.f32.gmra.mxu0 %v133_v26  ;;  %v225_v25 = vld [vmem:[%s3241_s0 + $0x698] sm:$0xff]  ;;  %v227_v26 = vld [vmem:[%s3241_s0 + $0x6a8] sm:$0xff] }
  0x87   :  { %877 = vmatmul.mubr.f32.gmra.mxu1 %v135_v27  ;;  %636 = vmatprep.mubr.f32.mxu0 %v141_v28  ;;  %v348_v27 = vld [vmem:[%s3240_s1 + $0x290] sm:$0xff] }
  0x88   :  { %881 = vmatprep.mubr.f32.mxu1 %v143_v29  ;;  %1006 = vmatprep.subr.mxu0 %v1706_v0  ;;  %v224_v28 = vld [vmem:[%s3241_s0 + $0x690] sm:$0xff]  ;;  %v226_v29 = vld [vmem:[%s3241_s0 + $0x6a0] sm:$0xff] }
  0x89   :  { %1658 = vmatprep.subr.mxu1 %v1706_v0  ;;  %1007 = vmatpush2.msra.mxu0 %v360_v30 }
  0x8a   :  { %1690 = vmatpush2.msra.mxu1 %v360_v30  ;;  %637 = vmatmul.mubr.f32.gmra.mxu0 %v140_v31  ;;  %v232_v30 = vld [vmem:[%s3241_s0 + $0x6d0] sm:$0xff]  ;;  %v234_v31 = vld [vmem:[%s3241_s0 + $0x6e0] sm:$0xff] }
  0x8b   :  { %882 = vmatmul.mubr.f32.gmra.mxu1 %v142_v32  ;;  %641 = vmatprep.mubr.f32.mxu0 %v148_v33  ;;  %v347_v32 = vld [vmem:[%s3240_s1 + $0x288] sm:$0xff] }
  0x8c   :  { %886 = vmatprep.mubr.f32.mxu1 %v150_v34  ;;  %1008 = vmatprep.subr.mxu0 %v1706_v0  ;;  %v231_v33 = vld [vmem:[%s3241_s0 + $0x6c8] sm:$0xff]  ;;  %v233_v34 = vld [vmem:[%s3241_s0 + $0x6d8] sm:$0xff] }
  0x8d   :  { %1659 = vmatprep.subr.mxu1 %v1706_v0  ;;  %1009 = vmatpush2.msra.mxu0 %v359_v35 }
  0x8e   :  { %1691 = vmatpush2.msra.mxu1 %v359_v35  ;;  %642 = vmatmul.mubr.f32.gmra.mxu0 %v147_v36  ;;  %v239_v35 = vld [vmem:[%s3241_s0 + $0x708] sm:$0xff]  ;;  %v241_v36 = vld [vmem:[%s3241_s0 + $0x718] sm:$0xff] }
  0x8f   :  { %887 = vmatmul.mubr.f32.gmra.mxu1 %v149_v37  ;;  %646 = vmatprep.mubr.f32.mxu0 %v155_v38  ;;  %v346_v37 = vld [vmem:[%s3240_s1 + $0x280] sm:$0xff] }
  0x90   :  { %891 = vmatprep.mubr.f32.mxu1 %v157_v39  ;;  %1010 = vmatprep.subr.mxu0 %v1706_v0  ;;  %v238_v38 = vld [vmem:[%s3241_s0 + $0x700] sm:$0xff]  ;;  %v240_v39 = vld [vmem:[%s3241_s0 + $0x710] sm:$0xff] }
  0x91   :  { %1660 = vmatprep.subr.mxu1 %v1706_v0  ;;  %1011 = vmatpush2.msra.mxu0 %v358_v40 }
  0x92   :  { %1692 = vmatpush2.msra.mxu1 %v358_v40  ;;  %647 = vmatmul.mubr.f32.gmra.mxu0 %v154_v41  ;;  %v246_v40 = vld [vmem:[%s3241_s0 + $0x740] sm:$0xff]  ;;  %v248_v41 = vld [vmem:[%s3241_s0 + $0x750] sm:$0xff] }
  0x93   :  { %892 = vmatmul.mubr.f32.gmra.mxu1 %v156_v42  ;;  %651 = vmatprep.mubr.f32.mxu0 %v162_v43  ;;  %v365_v42 = vld [vmem:[%s3240_s1 + $0x318] sm:$0xff] }
  0x94   :  { %896 = vmatprep.mubr.f32.mxu1 %v164_v44  ;;  %1012 = vmatprep.subr.mxu0 %v1706_v0  ;;  %v245_v43 = vld [vmem:[%s3241_s0 + $0x738] sm:$0xff]  ;;  %v247_v44 = vld [vmem:[%s3241_s0 + $0x748] sm:$0xff] }
  0x95   :  { %1661 = vmatprep.subr.mxu1 %v1706_v0  ;;  %1013 = vmatpush2.msra.mxu0 %v357_v45 }
  0x96   :  { %1693 = vmatpush2.msra.mxu1 %v357_v45  ;;  %652 = vmatmul.mubr.f32.gmra.mxu0 %v161_v46  ;;  %v255_v45 = vld [vmem:[%s3241_s0 + $0x788] sm:$0xff]  ;;  %v252_v46 = vld [vmem:[%s3241_s0 + $0x770] sm:$0xff] }
  0x97   :  { %897 = vmatmul.mubr.f32.gmra.mxu1 %v163_v47  ;;  %656 = vmatprep.mubr.f32.mxu0 %v169_v48  ;;  %v254_v47 = vld [vmem:[%s3241_s0 + $0x780] sm:$0xff]  ;;  %v260_v48 = vld [vmem:[%s3241_s0 + $0x7b0] sm:$0xff] }
  0x98   :  { %901 = vmatprep.mubr.f32.mxu1 %v171_v49  ;;  %1014 = vmatprep.subr.mxu0 %v1706_v0  ;;  %v262_v49 = vld [vmem:[%s3241_s0 + $0x7c0] sm:$0xff] }
  0x99   :  { %1662 = vmatprep.subr.mxu1 %v1706_v0  ;;  %1015 = vmatpush2.msra.mxu0 %v356_v50 }
  0x9a   :  { %1694 = vmatpush2.msra.mxu1 %v356_v50  ;;  %657 = vmatmul.mubr.f32.gmra.mxu0 %v168_v51  ;;  %v259_v50 = vld [vmem:[%s3241_s0 + $0x7a8] sm:$0xff]  ;;  %v261_v51 = vld [vmem:[%s3241_s0 + $0x7b8] sm:$0xff] }
  0x9b   :  { %902 = vmatmul.mubr.f32.gmra.mxu1 %v170_v52  ;;  %661 = vmatprep.mubr.f32.mxu0 %v176_v53  ;;  %v19_v52 = vld [vmem:[%s3241_s0 + $0x28] sm:$0xff]  ;;  %v208_v53 = vld [vmem:[%s3241_s0 + $0x610] sm:$0xff] }
  0x9c   :  { %906 = vmatprep.mubr.f32.mxu1 %v178_v54  ;;  %1016 = vmatprep.subr.mxu0 %v1706_v0  ;;  %v18_v54 = vld [vmem:[%s3241_s0 + $0x20] sm:$0xff] }
  0x9d   :  { %1663 = vmatprep.subr.mxu1 %v1706_v0  ;;  %1017 = vmatpush2.msra.mxu0 %v355_v55 }
  0x9e   :  { %1695 = vmatpush2.msra.mxu1 %v355_v55  ;;  %662 = vmatmul.mubr.f32.gmra.mxu0 %v175_v56  ;;  %v207_v55 = vld [vmem:[%s3241_s0 + $0x608] sm:$0xff]  ;;  %v26_v56 = vld [vmem:[%s3241_s0 + $0x60] sm:$0xff] }
  0x9f   :  { %907 = vmatmul.mubr.f32.gmra.mxu1 %v177_v57  ;;  %666 = vmatprep.mubr.f32.mxu0 %v183_v58  ;;  %v215_v57 = vld [vmem:[%s3241_s0 + $0x648] sm:$0xff]  ;;  %v364_v58 = vld [vmem:[%s3240_s1 + $0x310] sm:$0xff] }
  0xa0   :  { %911 = vmatprep.mubr.f32.mxu1 %v185_v59  ;;  %1018 = vmatprep.subr.mxu0 %v1706_v0  ;;  %v25_v59 = vld [vmem:[%s3241_s0 + $0x58] sm:$0xff] }
  0xa1   :  { %1664 = vmatprep.subr.mxu1 %v1706_v0  ;;  %1019 = vmatpush2.msra.mxu0 %v354_v60 }
  0xa2   :  { %1696 = vmatpush2.msra.mxu1 %v354_v60  ;;  %667 = vmatmul.mubr.f32.gmra.mxu0 %v182_v61  ;;  %v214_v60 = vld [vmem:[%s3241_s0 + $0x640] sm:$0xff]  ;;  %v33_v61 = vld [vmem:[%s3241_s0 + $0x98] sm:$0xff] }
  0xa3   :  { %912 = vmatmul.mubr.f32.gmra.mxu1 %v184_v62  ;;  %671 = vmatprep.mubr.f32.mxu0 %v190_v63  ;;  %v222_v62 = vld [vmem:[%s3241_s0 + $0x680] sm:$0xff]  ;;  %v363_v63 = vld [vmem:[%s3240_s1 + $0x308] sm:$0xff] }
  0xa4   :  { %916 = vmatprep.mubr.f32.mxu1 %v192_v1  ;;  %1020 = vmatprep.subr.mxu0 %v1706_v0  ;;  %v32_v1 = vld [vmem:[%s3241_s0 + $0x90] sm:$0xff] }
  0xa5   :  { %1665 = vmatprep.subr.mxu1 %v1706_v0  ;;  %1021 = vmatpush2.msra.mxu0 %v353_v2 }
  0xa6   :  { %1697 = vmatpush2.msra.mxu1 %v353_v2  ;;  %672 = vmatmul.mubr.f32.gmra.mxu0 %v189_v3  ;;  %v221_v2 = vld [vmem:[%s3241_s0 + $0x678] sm:$0xff]  ;;  %v40_v3 = vld [vmem:[%s3241_s0 + $0xd0] sm:$0xff] }
  0xa7   :  { %917 = vmatmul.mubr.f32.gmra.mxu1 %v191_v4  ;;  %676 = vmatprep.mubr.f32.mxu0 %v197_v5  ;;  %v229_v4 = vld [vmem:[%s3241_s0 + $0x6b8] sm:$0xff]  ;;  %v362_v5 = vld [vmem:[%s3240_s1 + $0x300] sm:$0xff] }
  0xa8   :  { %921 = vmatprep.mubr.f32.mxu1 %v199_v6  ;;  %1022 = vmatprep.subr.mxu0 %v1706_v0  ;;  %v39_v6 = vld [vmem:[%s3241_s0 + $0xc8] sm:$0xff] }
  0xa9   :  { %1666 = vmatprep.subr.mxu1 %v1706_v0  ;;  %1023 = vmatpush2.msra.mxu0 %v352_v7 }
  0xaa   :  { %1698 = vmatpush2.msra.mxu1 %v352_v7  ;;  %677 = vmatmul.mubr.f32.gmra.mxu0 %v196_v8  ;;  %v228_v7 = vld [vmem:[%s3241_s0 + $0x6b0] sm:$0xff]  ;;  %v47_v8 = vld [vmem:[%s3241_s0 + $0x108] sm:$0xff] }
  0xab   :  { %922 = vmatmul.mubr.f32.gmra.mxu1 %v198_v9  ;;  %681 = vmatprep.mubr.f32.mxu0 %v204_v10  ;;  %v236_v9 = vld [vmem:[%s3241_s0 + $0x6f0] sm:$0xff]  ;;  %v46_v10 = vld [vmem:[%s3241_s0 + $0x100] sm:$0xff] }
  0xac   :  { %926 = vmatprep.mubr.f32.mxu1 %v206_v11  ;;  %1024 = vmatprep.subr.mxu0 %v1706_v0  ;;  %v235_v11 = vld [vmem:[%s3241_s0 + $0x6e8] sm:$0xff] }
  0xad   :  { %1667 = vmatprep.subr.mxu1 %v1706_v0  ;;  %1025 = vmatpush2.msra.mxu0 %v351_v12 }
  0xae   :  { %1699 = vmatpush2.msra.mxu1 %v351_v12  ;;  %682 = vmatmul.mubr.f32.gmra.mxu0 %v203_v13  ;;  %v54_v12 = vld [vmem:[%s3241_s0 + $0x140] sm:$0xff]  ;;  %v243_v13 = vld [vmem:[%s3241_s0 + $0x728] sm:$0xff] }
  0xaf   :  { %927 = vmatmul.mubr.f32.gmra.mxu1 %v205_v14  ;;  %686 = vmatprep.mubr.f32.mxu0 %v211_v15  ;;  %v53_v14 = vld [vmem:[%s3241_s0 + $0x138] sm:$0xff]  ;;  %v242_v15 = vld [vmem:[%s3241_s0 + $0x720] sm:$0xff] }
  0xb0   :  { %931 = vmatprep.mubr.f32.mxu1 %v213_v16  ;;  %1026 = vmatprep.subr.mxu0 %v1706_v0  ;;  %v61_v16 = vld [vmem:[%s3241_s0 + $0x178] sm:$0xff] }
  0xb1   :  { %1668 = vmatprep.subr.mxu1 %v1706_v0  ;;  %1027 = vmatpush2.msra.mxu0 %v350_v17 }
  0xb2   :  { %1700 = vmatpush2.msra.mxu1 %v350_v17  ;;  %687 = vmatmul.mubr.f32.gmra.mxu0 %v210_v18  ;;  %v250_v17 = vld [vmem:[%s3241_s0 + $0x760] sm:$0xff]  ;;  %v60_v18 = vld [vmem:[%s3241_s0 + $0x170] sm:$0xff] }
  0xb3   :  { %932 = vmatmul.mubr.f32.gmra.mxu1 %v212_v19  ;;  %691 = vmatprep.mubr.f32.mxu0 %v218_v20  ;;  %v249_v19 = vld [vmem:[%s3241_s0 + $0x758] sm:$0xff]  ;;  %v68_v20 = vld [vmem:[%s3241_s0 + $0x1b0] sm:$0xff] }
  0xb4   :  { %936 = vmatprep.mubr.f32.mxu1 %v220_v21  ;;  %1028 = vmatprep.subr.mxu0 %v1706_v0  ;;  %v257_v21 = vld [vmem:[%s3241_s0 + $0x798] sm:$0xff] }
  0xb5   :  { %1669 = vmatprep.subr.mxu1 %v1706_v0  ;;  %1029 = vmatpush2.msra.mxu0 %v349_v22 }
  0xb6   :  { %1701 = vmatpush2.msra.mxu1 %v349_v22  ;;  %692 = vmatmul.mubr.f32.gmra.mxu0 %v217_v23  ;;  %v67_v22 = vld [vmem:[%s3241_s0 + $0x1a8] sm:$0xff]  ;;  %v256_v23 = vld [vmem:[%s3241_s0 + $0x790] sm:$0xff] }
  0xb7   :  { %937 = vmatmul.mubr.f32.gmra.mxu1 %v219_v24  ;;  %696 = vmatprep.mubr.f32.mxu0 %v225_v25  ;;  %v75_v24 = vld [vmem:[%s3241_s0 + $0x1e8] sm:$0xff]  ;;  %v264_v25 = vld [vmem:[%s3241_s0 + $0x7d0] sm:$0xff] }
  0xb8   :  { %941 = vmatprep.mubr.f32.mxu1 %v227_v26  ;;  %1030 = vmatprep.subr.mxu0 %v1706_v0  ;;  %v74_v26 = vld [vmem:[%s3241_s0 + $0x1e0] sm:$0xff] }
  0xb9   :  { %1670 = vmatprep.subr.mxu1 %v1706_v0  ;;  %1031 = vmatpush2.msra.mxu0 %v348_v27 }
  0xba   :  { %1702 = vmatpush2.msra.mxu1 %v348_v27  ;;  %697 = vmatmul.mubr.f32.gmra.mxu0 %v224_v28  ;;  %v263_v27 = vld [vmem:[%s3241_s0 + $0x7c8] sm:$0xff]  ;;  %v82_v28 = vld [vmem:[%s3241_s0 + $0x220] sm:$0xff] }
  0xbb   :  { %942 = vmatmul.mubr.f32.gmra.mxu1 %v226_v29  ;;  %701 = vmatprep.mubr.f32.mxu0 %v232_v30  ;;  %v20_v29 = vld [vmem:[%s3241_s0 + $0x30] sm:$0xff]  ;;  %v81_v30 = vld [vmem:[%s3241_s0 + $0x218] sm:$0xff] }
  0xbc   :  { %946 = vmatprep.mubr.f32.mxu1 %v234_v31  ;;  %1032 = vmatprep.subr.mxu0 %v1706_v0  ;;  %v27_v31 = vld [vmem:[%s3241_s0 + $0x68] sm:$0xff] }
  0xbd   :  { %1671 = vmatprep.subr.mxu1 %v1706_v0  ;;  %1033 = vmatpush2.msra.mxu0 %v347_v32 }
  0xbe   :  { %1703 = vmatpush2.msra.mxu1 %v347_v32  ;;  %702 = vmatmul.mubr.f32.gmra.mxu0 %v231_v33  ;;  %v89_v32 = vld [vmem:[%s3241_s0 + $0x258] sm:$0xff]  ;;  %v34_v33 = vld [vmem:[%s3241_s0 + $0xa0] sm:$0xff] }
  0xbf   :  { %947 = vmatmul.mubr.f32.gmra.mxu1 %v233_v34  ;;  %706 = vmatprep.mubr.f32.mxu0 %v239_v35  ;;  %v88_v34 = vld [vmem:[%s3241_s0 + $0x250] sm:$0xff]  ;;  %v41_v35 = vld [vmem:[%s3241_s0 + $0xd8] sm:$0xff] }
  0xc0   :  { %951 = vmatprep.mubr.f32.mxu1 %v241_v36  ;;  %1034 = vmatprep.subr.mxu0 %v1706_v0  ;;  %v96_v36 = vld [vmem:[%s3241_s0 + $0x290] sm:$0xff] }
  0xc1   :  { %1672 = vmatprep.subr.mxu1 %v1706_v0  ;;  %1035 = vmatpush2.msra.mxu0 %v346_v37  ;;  %v253_v0 = vld [vmem:[%s3241_s0 + $0x778] sm:$0xff] }
  0xc2   :  { %1704 = vmatpush2.msra.mxu1 %v346_v37  ;;  %707 = vmatmul.mubr.f32.gmra.mxu0 %v238_v38  ;;  %v48_v37 = vld [vmem:[%s3241_s0 + $0x110] sm:$0xff]  ;;  %v95_v38 = vld [vmem:[%s3241_s0 + $0x288] sm:$0xff] }
  0xc3   :  { %952 = vmatmul.mubr.f32.gmra.mxu1 %v240_v39  ;;  %711 = vmatprep.mubr.f32.mxu0 %v246_v40  ;;  %v55_v39 = vld [vmem:[%s3241_s0 + $0x148] sm:$0xff] }
  0xc4   :  { %956 = vmatprep.mubr.f32.mxu1 %v248_v41  ;;  %1579 = vmatprep.subr.mxu1 %v365_v42  ;;  %v103_v40 = vld [vmem:[%s3241_s0 + $0x2c8] sm:$0xff]  ;;  %v62_v41 = vld [vmem:[%s3241_s0 + $0x180] sm:$0xff] }
  0xc6   :  { %712 = vmatmul.mubr.f32.gmra.mxu0 %v245_v43  ;;  %v69_v43 = vld [vmem:[%s3241_s0 + $0x1b8] sm:$0xff] }
  0xc7   :  { %957 = vmatmul.mubr.f32.gmra.mxu1 %v247_v44  ;;  %716 = vmatprep.mubr.f32.mxu0 %v253_v0  ;;  %v2753_v44 = vld [vmem:[%s3242_s2] ss:$0 sm:$0xff] }
  0xc8   :  { %961 = vmatprep.mubr.f32.mxu1 %v255_v45  ;;  %v110_v0 = vld [vmem:[%s3241_s0 + $0x300] sm:$0xff]  ;;  %v76_v45 = vld [vmem:[%s3241_s0 + $0x1f0] sm:$0xff] }
  0xca   :  { %717 = vmatmul.mubr.f32.gmra.mxu0 %v252_v46 }
  0xcb   :  { %962 = vmatmul.mubr.f32.gmra.mxu1 %v254_v47  ;;  %721 = vmatprep.mubr.f32.mxu0 %v260_v48 }
  0xcc   :  { %966 = vmatprep.mubr.f32.mxu1 %v262_v49  ;;  %v109_v49 = vld [vmem:[%s3241_s0 + $0x2f8] sm:$0xff] }
  0xce   :  { %722 = vmatmul.mubr.f32.gmra.mxu0 %v259_v50  ;;  %v83_v50 = vld [vmem:[%s3241_s0 + $0x228] sm:$0xff] }
  0xcf   :  { %967 = vmatmul.mubr.f32.gmra.mxu1 %v261_v51  ;;  %1036 = vmatprep.mubr.f32.mxu0 %v19_v52 }
  0xd0   :  { %1171 = vmatprep.mubr.f32.mxu1 %v208_v53  ;;  %v117_v53 = vld [vmem:[%s3241_s0 + $0x338] sm:$0xff] }
  0xd2   :  { %1037 = vmatmul.mubr.f32.vlgmr.msra.gmra.mxu0 %v18_v54  ;;  %v90_v54 = vld [vmem:[%s3241_s0 + $0x260] sm:$0xff] }
  0xd3   :  { %1172 = vmatmul.mubr.f32.vlgmr.msra.gmra.mxu1 %v207_v55  ;;  %1041 = vmatprep.mubr.f32.mxu0 %v26_v56 }
  0xd4   :  { %1580 = vmatpush3.msra.mxu1 %v365_v42  ;;  %1176 = vmatprep.mubr.f32.mxu1 %v215_v57  ;;  %v102_v42 = vld [vmem:[%s3241_s0 + $0x2c0] sm:$0xff] }
  0xd5   :  { %1581 = vmatprep.subr.mxu1 %v364_v58 }
  0xd6   :  { %1582 = vmatpush3.msra.mxu1 %v364_v58  ;;  %1042 = vmatmul.mubr.f32.gmra.mxu0 %v25_v59  ;;  %v116_v59 = vld [vmem:[%s3241_s0 + $0x330] sm:$0xff] }
  0xd7   :  { %1177 = vmatmul.mubr.f32.gmra.mxu1 %v214_v60  ;;  %1046 = vmatprep.mubr.f32.mxu0 %v33_v61  ;;  %v97_v60 = vld [vmem:[%s3241_s0 + $0x298] sm:$0xff] }
  0xd8   :  { %1181 = vmatprep.mubr.f32.mxu1 %v222_v62  ;;  %1583 = vmatprep.subr.mxu1 %v363_v63 }
  0xd9   :  { %1584 = vmatpush3.msra.mxu1 %v363_v63  ;;  %v124_v63 = vld [vmem:[%s3241_s0 + $0x370] sm:$0xff] }
  0xda   :  { %1047 = vmatmul.mubr.f32.gmra.mxu0 %v32_v1  ;;  %1585 = vmatprep.subr.mxu1 %v362_v5  ;;  %v104_v1 = vld [vmem:[%s3241_s0 + $0x2d0] sm:$0xff] }
  0xdb   :  { %1182 = vmatmul.mubr.f32.gmra.mxu1 %v221_v2  ;;  %1051 = vmatprep.mubr.f32.mxu0 %v40_v3 }
  0xdc   :  { %1186 = vmatprep.mubr.f32.mxu1 %v229_v4  ;;  %1586 = vmatpush3.msra.mxu1 %v362_v5 }
  0xde   :  { %1052 = vmatmul.mubr.f32.gmra.mxu0 %v39_v6  ;;  %v123_v6 = vld [vmem:[%s3241_s0 + $0x368] sm:$0xff] }
  0xdf   :  { %1187 = vmatmul.mubr.f32.gmra.mxu1 %v228_v7  ;;  %1056 = vmatprep.mubr.f32.mxu0 %v47_v8  ;;  %v111_v7 = vld [vmem:[%s3241_s0 + $0x308] sm:$0xff] }
  0xe0   :  { %1191 = vmatprep.mubr.f32.mxu1 %v236_v9 }
  0xe2   :  { %1057 = vmatmul.mubr.f32.gmra.mxu0 %v46_v10  ;;  %v131_v10 = vld [vmem:[%s3241_s0 + $0x3a8] sm:$0xff] }
  0xe3   :  { %1192 = vmatmul.mubr.f32.gmra.mxu1 %v235_v11  ;;  %1061 = vmatprep.mubr.f32.mxu0 %v54_v12  ;;  %v118_v11 = vld [vmem:[%s3241_s0 + $0x340] sm:$0xff] }
  0xe4   :  { %1196 = vmatprep.mubr.f32.mxu1 %v243_v13 }
  0xe6   :  { %1062 = vmatmul.mubr.f32.gmra.mxu0 %v53_v14 }
  0xe7   :  { %1197 = vmatmul.mubr.f32.gmra.mxu1 %v242_v15  ;;  %1066 = vmatprep.mubr.f32.mxu0 %v61_v16  ;;  %v130_v16 = vld [vmem:[%s3241_s0 + $0x3a0] sm:$0xff] }
  0xe8   :  { %1201 = vmatprep.mubr.f32.mxu1 %v250_v17  ;;  %v125_v17 = vld [vmem:[%s3241_s0 + $0x378] sm:$0xff] }
  0xea   :  { %1067 = vmatmul.mubr.f32.gmra.mxu0 %v60_v18 }
  0xeb   :  { %1202 = vmatmul.mubr.f32.gmra.mxu1 %v249_v19  ;;  %1071 = vmatprep.mubr.f32.mxu0 %v68_v20  ;;  %v138_v20 = vld [vmem:[%s3241_s0 + $0x3e0] sm:$0xff] }
  0xec   :  { %1206 = vmatprep.mubr.f32.mxu1 %v257_v21  ;;  %v132_v21 = vld [vmem:[%s3241_s0 + $0x3b0] sm:$0xff] }
  0xee   :  { %1072 = vmatmul.mubr.f32.gmra.mxu0 %v67_v22 }
  0xef   :  { %1207 = vmatmul.mubr.f32.gmra.mxu1 %v256_v23  ;;  %1076 = vmatprep.mubr.f32.mxu0 %v75_v24 }
  0xf0   :  { %1211 = vmatprep.mubr.f32.mxu1 %v264_v25 }
  0xf2   :  { %1077 = vmatmul.mubr.f32.gmra.mxu0 %v74_v26  ;;  %v137_v26 = vld [vmem:[%s3241_s0 + $0x3d8] sm:$0xff] }
  0xf3   :  { %1212 = vmatmul.mubr.f32.gmra.mxu1 %v263_v27  ;;  %1081 = vmatprep.mubr.f32.mxu0 %v82_v28  ;;  %v139_v27 = vld [vmem:[%s3241_s0 + $0x3e8] sm:$0xff] }
  0xf4   :  { %1587 = vmatprep.mubr.msk.f32.mxu1 %vm373_vm0, %v20_v29 }
  0xf6   :  { %1082 = vmatmul.mubr.f32.gmra.mxu0 %v81_v30  ;;  %v145_v30 = vld [vmem:[%s3241_s0 + $0x418] sm:$0xff] }
  0xf7   :  { %1588 = vmatmul.mubr.msk.f32.vlgmr.msra.gmra.mxu1 %vm373_vm0, %v27_v31  ;;  %1086 = vmatprep.mubr.f32.mxu0 %v89_v32  ;;  %v146_v31 = vld [vmem:[%s3241_s0 + $0x420] sm:$0xff] }
  0xf8   :  { %1590 = vmatprep.mubr.msk.f32.mxu1 %vm373_vm0, %v34_v33 }
  0xfa   :  { %1087 = vmatmul.mubr.f32.gmra.mxu0 %v88_v34 }
  0xfb   :  { %1591 = vmatmul.mubr.msk.f32.gmra.mxu1 %vm373_vm0, %v41_v35  ;;  %1091 = vmatprep.mubr.f32.mxu0 %v96_v36  ;;  %v144_v36 = vld [vmem:[%s3241_s0 + $0x410] sm:$0xff] }
  0xfc   :  { %1593 = vmatprep.mubr.msk.f32.mxu1 %vm373_vm0, %v48_v37  ;;  %v153_v37 = vld [vmem:[%s3241_s0 + $0x458] sm:$0xff] }
  0xfe   :  { %1092 = vmatmul.mubr.f32.gmra.mxu0 %v95_v38 }
  0xff   :  { %1594 = vmatmul.mubr.msk.f32.gmra.mxu1 %vm373_vm0, %v55_v39  ;;  %1096 = vmatprep.mubr.f32.mxu0 %v103_v40  ;;  %v152_v40 = vld [vmem:[%s3241_s0 + $0x450] sm:$0xff] }
 0x100   :  { %1596 = vmatprep.mubr.msk.f32.mxu1 %vm373_vm0, %v62_v41  ;;  %v160_v41 = vld [vmem:[%s3241_s0 + $0x490] sm:$0xff] }
 0x102   :  { %v548_v46 = vpop.f32.mrf.mxu0  ;;  %1097 = vmatmul.mubr.f32.gmra.mxu0 %v102_v42 }
 0x103   :  { %v793_v47 = vpop.f32.mrf.mxu1  ;;  %1597 = vmatmul.mubr.msk.f32.gmra.mxu1 %vm373_vm0, %v69_v43  ;;  %v549_v48 = vadd.f32 %v2753_v44, %v548_v46  ;;  %1101 = vmatprep.mubr.f32.mxu0 %v110_v0  ;;  %v151_v46 = vld [vmem:[%s3241_s0 + $0x448] sm:$0xff] }
 0x104   :  { %1599 = vmatprep.mubr.msk.f32.mxu1 %vm373_vm0, %v76_v45  ;;  %v550_v51 = vpop.f32.mrf.mxu0 }
 0x105   :  { %v795_v52 = vpop.f32.mrf.mxu1  ;;  %v2776_v55 = vadd.f32 %v793_v47, %v549_v48  ;;  %v167_v47 = vld [vmem:[%s3241_s0 + $0x4c8] sm:$0xff]  ;;  %v174_v51 = vld [vmem:[%s3241_s0 + $0x500] sm:$0xff] }
 0x106   :  { %v553_v56 = vpop.f32.mrf.mxu0  ;;  %1102 = vmatmul.mubr.f32.gmra.mxu0 %v109_v49 }
 0x107   :  { %v798_v57 = vpop.f32.mrf.mxu1  ;;  %1600 = vmatmul.mubr.msk.f32.gmra.mxu1 %vm373_vm0, %v83_v50  ;;  %v554_v58 = vadd.f32 %v2753_v44, %v553_v56  ;;  %1106 = vmatprep.mubr.f32.mxu0 %v117_v53  ;;  %v159_v50 = vld [vmem:[%s3241_s0 + $0x488] sm:$0xff] }
 0x108   :  { %1602 = vmatprep.mubr.msk.f32.mxu1 %vm373_vm0, %v90_v54  ;;  %v555_v61 = vpop.f32.mrf.mxu0 }
 0x109   :  { %v800_v62 = vpop.f32.mrf.mxu1  ;;  %v2793_v2 = vadd.f32 %v798_v57, %v554_v58  ;;  %v158_v57 = vld [vmem:[%s3241_s0 + $0x480] sm:$0xff]  ;;  %v181_v58 = vld [vmem:[%s3241_s0 + $0x538] sm:$0xff] }
 0x10a   :  { %v558_v3 = vpop.f32.mrf.mxu0  ;;  %1107 = vmatmul.mubr.f32.gmra.mxu0 %v116_v59  ;;  %v166_v61 = vld [vmem:[%s3241_s0 + $0x4c0] sm:$0xff]  ;;  %v188_v62 = vld [vmem:[%s3241_s0 + $0x570] sm:$0xff] }
 0x10b   :  { %v803_v4 = vpop.f32.mrf.mxu1  ;;  %1603 = vmatmul.mubr.msk.f32.gmra.mxu1 %vm373_vm0, %v97_v60  ;;  %v559_v5 = vadd.f32 %v2753_v44, %v558_v3  ;;  %1111 = vmatprep.mubr.f32.mxu0 %v124_v63 }
 0x10c   :  { %1605 = vmatprep.mubr.msk.f32.mxu1 %vm373_vm0, %v104_v1  ;;  %v560_v8 = vpop.f32.mrf.mxu0 }
 0x10d   :  { %v805_v9 = vpop.f32.mrf.mxu1  ;;  %v2810_v12 = vadd.f32 %v803_v4, %v559_v5  ;;  %v165_v5 = vld [vmem:[%s3241_s0 + $0x4b8] sm:$0xff] }
 0x10e   :  { %v563_v13 = vpop.f32.mrf.mxu0  ;;  %1112 = vmatmul.mubr.f32.gmra.mxu0 %v123_v6  ;;  %v195_v6 = vld [vmem:[%s3241_s0 + $0x5a8] sm:$0xff]  ;;  %v173_v9 = vld [vmem:[%s3241_s0 + $0x4f8] sm:$0xff] }
 0x10f   :  { %v808_v14 = vpop.f32.mrf.mxu1  ;;  %1606 = vmatmul.mubr.msk.f32.gmra.mxu1 %vm373_vm0, %v111_v7  ;;  %v564_v15 = vadd.f32 %v2753_v44, %v563_v13  ;;  %1116 = vmatprep.mubr.f32.mxu0 %v131_v10  ;;  %v202_v10 = vld [vmem:[%s3241_s0 + $0x5e0] sm:$0xff] }
 0x110   :  { %1608 = vmatprep.mubr.msk.f32.mxu1 %vm373_vm0, %v118_v11  ;;  %v565_v18 = vpop.f32.mrf.mxu0 }
 0x111   :  { %v810_v19 = vpop.f32.mrf.mxu1  ;;  %v2827_v22 = vadd.f32 %v808_v14, %v564_v15 }
 0x112   :  { %v568_v23 = vpop.f32.mrf.mxu0  ;;  %1117 = vmatmul.mubr.f32.gmra.mxu0 %v130_v16  ;;  %v172_v16 = vld [vmem:[%s3241_s0 + $0x4f0] sm:$0xff] }
 0x113   :  { %v813_v24 = vpop.f32.mrf.mxu1  ;;  %1609 = vmatmul.mubr.msk.f32.gmra.mxu1 %vm373_vm0, %v125_v17  ;;  %v569_v25 = vadd.f32 %v2753_v44, %v568_v23  ;;  %1121 = vmatprep.mubr.f32.mxu0 %v138_v20  ;;  %v209_v17 = vld [vmem:[%s3241_s0 + $0x618] sm:$0xff]  ;;  %v180_v20 = vld [vmem:[%s3241_s0 + $0x530] sm:$0xff] }
 0x114   :  { %1611 = vmatprep.mubr.msk.f32.mxu1 %vm373_vm0, %v132_v21  ;;  %v570_v28 = vpop.f32.mrf.mxu0  ;;  %v216_v21 = vld [vmem:[%s3241_s0 + $0x650] sm:$0xff] }
 0x115   :  { %v815_v29 = vpop.f32.mrf.mxu1  ;;  %v2844_v32 = vadd.f32 %v813_v24, %v569_v25  ;;  %v223_v28 = vld [vmem:[%s3241_s0 + $0x688] sm:$0xff] }
 0x116   :  { %v573_v33 = vpop.f32.mrf.mxu0  ;;  %1122 = vmatmul.mubr.f32.gmra.mxu0 %v137_v26 }
 0x117   :  { %v818_v34 = vpop.f32.mrf.mxu1  ;;  %1612 = vmatmul.mubr.msk.f32.gmra.mxu1 %vm373_vm0, %v139_v27  ;;  %v574_v35 = vadd.f32 %v2753_v44, %v573_v33  ;;  %1126 = vmatprep.mubr.f32.mxu0 %v145_v30  ;;  %v179_v27 = vld [vmem:[%s3241_s0 + $0x528] sm:$0xff]  ;;  %v230_v33 = vld [vmem:[%s3241_s0 + $0x6c0] sm:$0xff] }
 0x118   :  { %1614 = vmatprep.mubr.msk.f32.mxu1 %vm373_vm0, %v146_v31  ;;  %v575_v38 = vpop.f32.mrf.mxu0  ;;  %v187_v31 = vld [vmem:[%s3241_s0 + $0x568] sm:$0xff] }
 0x119   :  { %v820_v39 = vpop.f32.mrf.mxu1  ;;  %v2861_v42 = vadd.f32 %v818_v34, %v574_v35  ;;  %v186_v38 = vld [vmem:[%s3241_s0 + $0x560] sm:$0xff] }
 0x11a   :  { %v578_v43 = vpop.f32.mrf.mxu0  ;;  %1127 = vmatmul.mubr.f32.gmra.mxu0 %v144_v36  ;;  %v237_v39 = vld [vmem:[%s3241_s0 + $0x6f8] sm:$0xff] }
 0x11b   :  { %v823_v0 = vpop.f32.mrf.mxu1  ;;  %1615 = vmatmul.mubr.msk.f32.gmra.mxu1 %vm373_vm0, %v153_v37  ;;  %v579_v45 = vadd.f32 %v2753_v44, %v578_v43  ;;  %1131 = vmatprep.mubr.f32.mxu0 %v152_v40  ;;  %v194_v43 = vld [vmem:[%s3241_s0 + $0x5a0] sm:$0xff] }
 0x11c   :  { %1617 = vmatprep.mubr.msk.f32.mxu1 %vm373_vm0, %v160_v41  ;;  %v580_v48 = vpop.f32.mrf.mxu0 }
 0x11d   :  { %v825_v49 = vpop.f32.mrf.mxu1  ;;  %v2878_v52 = vadd.f32 %v823_v0, %v579_v45  ;;  %v244_v0 = vld [vmem:[%s3241_s0 + $0x730] sm:$0xff] }
 0x11e   :  { %v583_v53 = vpop.f32.mrf.mxu0  ;;  %1132 = vmatmul.mubr.f32.gmra.mxu0 %v151_v46  ;;  %v193_v49 = vld [vmem:[%s3241_s0 + $0x598] sm:$0xff] }
 0x11f   :  { %v828_v54 = vpop.f32.mrf.mxu1  ;;  %1618 = vmatmul.mubr.msk.f32.gmra.mxu1 %vm373_vm0, %v167_v47  ;;  %v584_v56 = vadd.f32 %v2753_v44, %v583_v53  ;;  %1136 = vmatprep.mubr.f32.mxu0 %v159_v50  ;;  %v251_v50 = vld [vmem:[%s3241_s0 + $0x768] sm:$0xff] }
 0x120   :  { %1620 = vmatprep.mubr.msk.f32.mxu1 %vm373_vm0, %v174_v51  ;;  %v585_v59 = vpop.f32.mrf.mxu0 }
 0x121   :  { %v830_v60 = vpop.f32.mrf.mxu1  ;;  %v2895_v63 = vadd.f32 %v828_v54, %v584_v56  ;;  %v201_v54 = vld [vmem:[%s3241_s0 + $0x5d8] sm:$0xff]  ;;  %v258_v56 = vld [vmem:[%s3241_s0 + $0x7a0] sm:$0xff] }
 0x122   :  { %v588_v1 = vpop.f32.mrf.mxu0  ;;  %1137 = vmatmul.mubr.f32.gmra.mxu0 %v158_v57 }
 0x123   :  { %v833_v3 = vpop.f32.mrf.mxu1  ;;  %1621 = vmatmul.mubr.msk.f32.gmra.mxu1 %vm373_vm0, %v181_v58  ;;  %v589_v4 = vadd.f32 %v2753_v44, %v588_v1  ;;  %1141 = vmatprep.mubr.f32.mxu0 %v166_v61  ;;  %v200_v61 = vld [vmem:[%s3241_s0 + $0x5d0] sm:$0xff] }
 0x124   :  { %1623 = vmatprep.mubr.msk.f32.mxu1 %vm373_vm0, %v188_v62  ;;  %v590_v7 = vpop.f32.mrf.mxu0  ;;  %v265_v62 = vld [vmem:[%s3241_s0 + $0x7d8] sm:$0xff] }
 0x125   :  { %v835_v8 = vpop.f32.mrf.mxu1  ;;  %v2912_v11 = vadd.f32 %v833_v3, %v589_v4 }
 0x126   :  { %v593_v13 = vpop.f32.mrf.mxu0  ;;  %1142 = vmatmul.mubr.f32.gmra.mxu0 %v165_v5 }
 0x127   :  { %v838_v14 = vpop.f32.mrf.mxu1  ;;  %1624 = vmatmul.mubr.msk.f32.gmra.mxu1 %vm373_vm0, %v195_v6  ;;  %v594_v15 = vadd.f32 %v2753_v44, %v593_v13  ;;  %1146 = vmatprep.mubr.f32.mxu0 %v173_v9 }
 0x128   :  { %1626 = vmatprep.mubr.msk.f32.mxu1 %vm373_vm0, %v202_v10  ;;  %v595_v18 = vpop.f32.mrf.mxu0 }
 0x129   :  { %v840_v19 = vpop.f32.mrf.mxu1  ;;  %v2929_v23 = vadd.f32 %v838_v14, %v594_v15 }
 0x12a   :  { %v598_v24 = vpop.f32.mrf.mxu0  ;;  %1147 = vmatmul.mubr.f32.gmra.mxu0 %v172_v16 }
 0x12b   :  { %v843_v25 = vpop.f32.mrf.mxu1  ;;  %1627 = vmatmul.mubr.msk.f32.gmra.mxu1 %vm373_vm0, %v209_v17  ;;  %v599_v26 = vadd.f32 %v2753_v44, %v598_v24  ;;  %1151 = vmatprep.mubr.f32.mxu0 %v180_v20 }
 0x12c   :  { %1629 = vmatprep.mubr.msk.f32.mxu1 %vm373_vm0, %v216_v21  ;;  %v600_v29 = vpop.f32.mrf.mxu0 }
 0x12d   :  { %v845_v30 = vpop.f32.mrf.mxu1  ;;  %v2946_v34 = vadd.f32 %v843_v25, %v599_v26 }
 0x12e   :  { %v603_v35 = vpop.f32.mrf.mxu0  ;;  %1152 = vmatmul.mubr.f32.gmra.mxu0 %v179_v27 }
 0x12f   :  { %v848_v36 = vpop.f32.mrf.mxu1  ;;  %1630 = vmatmul.mubr.msk.f32.gmra.mxu1 %vm373_vm0, %v223_v28  ;;  %v604_v37 = vadd.f32 %v2753_v44, %v603_v35  ;;  %1156 = vmatprep.mubr.f32.mxu0 %v187_v31 }
 0x130   :  { %1632 = vmatprep.mubr.msk.f32.mxu1 %vm373_vm0, %v230_v33  ;;  %v605_v40 = vpop.f32.mrf.mxu0 }
 0x131   :  { %v850_v41 = vpop.f32.mrf.mxu1  ;;  %v2963_v45 = vadd.f32 %v848_v36, %v604_v37 }
 0x132   :  { %v608_v46 = vpop.f32.mrf.mxu0  ;;  %1157 = vmatmul.mubr.f32.gmra.mxu0 %v186_v38 }
 0x133   :  { %v853_v47 = vpop.f32.mrf.mxu1  ;;  %1633 = vmatmul.mubr.msk.f32.gmra.mxu1 %vm373_vm0, %v237_v39  ;;  %v609_v48 = vadd.f32 %v2753_v44, %v608_v46  ;;  %1161 = vmatprep.mubr.f32.mxu0 %v194_v43 }
 0x134   :  { %1635 = vmatprep.mubr.msk.f32.mxu1 %vm373_vm0, %v244_v0  ;;  %v610_v51 = vpop.f32.mrf.mxu0 }
 0x135   :  { %v855_v53 = vpop.f32.mrf.mxu1  ;;  %v2980_v57 = vadd.f32 %v853_v47, %v609_v48 }
 0x136   :  { %v613_v58 = vpop.f32.mrf.mxu0  ;;  %1162 = vmatmul.mubr.f32.gmra.mxu0 %v193_v49 }
 0x137   :  { %v858_v59 = vpop.f32.mrf.mxu1  ;;  %1636 = vmatmul.mubr.msk.f32.gmra.mxu1 %vm373_vm0, %v251_v50  ;;  %v614_v60 = vadd.f32 %v2753_v44, %v613_v58  ;;  %1166 = vmatprep.mubr.f32.mxu0 %v201_v54 }
 0x138   :  { %1638 = vmatprep.mubr.msk.f32.mxu1 %vm373_vm0, %v258_v56  ;;  %v615_v1 = vpop.f32.mrf.mxu0 }
 0x139   :  { %v860_v3 = vpop.f32.mrf.mxu1  ;;  %v2991_v4 = vadd.f32 %v858_v59, %v614_v60 }
 0x13a   :  { %v618_v5 = vpop.f32.mrf.mxu0  ;;  %1167 = vmatmul.mubr.f32.gmra.mxu0 %v200_v61 }
 0x13b   :  { %v863_v6 = vpop.f32.mrf.mxu1  ;;  %1639 = vmatmul.mubr.msk.f32.gmra.mxu1 %vm373_vm0, %v265_v62  ;;  %v619_v7 = vadd.f32 %v2753_v44, %v618_v5 }
 0x13c   :  { %v620_v8 = vpop.f32.mrf.mxu0 }
 0x13d   :  { %v865_v9 = vpop.f32.mrf.mxu1  ;;  %v2995_v10 = vadd.f32 %v863_v6, %v619_v7 }
 0x13e   :  { %v623_v13 = vpop.f32.mrf.mxu0 }
 0x13f   :  { %v868_v14 = vpop.f32.mrf.mxu1  ;;  %v624_v15 = vadd.f32 %v2753_v44, %v623_v13 }
 0x140   :  { %v625_v16 = vpop.f32.mrf.mxu0 }
 0x141   :  { %v870_v17 = vpop.f32.mrf.mxu1  ;;  %v2998_v18 = vadd.f32 %v868_v14, %v624_v15 }
 0x142   :  { %v628_v19 = vpop.f32.mrf.mxu0 }
 0x143   :  { %v873_v20 = vpop.f32.mrf.mxu1  ;;  %v629_v21 = vadd.f32 %v2753_v44, %v628_v19 }
 0x144   :  { %v630_v24 = vpop.f32.mrf.mxu0 }
 0x145   :  { %v875_v25 = vpop.f32.mrf.mxu1  ;;  %v3001_v26 = vadd.f32 %v873_v20, %v629_v21 }
 0x146   :  { %v633_v27 = vpop.f32.mrf.mxu0 }
 0x147   :  { %v878_v28 = vpop.f32.mrf.mxu1  ;;  %v634_v29 = vadd.f32 %v2753_v44, %v633_v27 }
 0x148   :  { %v635_v30 = vpop.f32.mrf.mxu0 }
 0x149   :  { %v880_v31 = vpop.f32.mrf.mxu1  ;;  %v3004_v33 = vadd.f32 %v878_v28, %v634_v29 }
 0x14a   :  { %v638_v35 = vpop.f32.mrf.mxu0 }
 0x14b   :  { %v883_v36 = vpop.f32.mrf.mxu1  ;;  %v639_v37 = vadd.f32 %v2753_v44, %v638_v35 }
 0x14c   :  { %v640_v38 = vpop.f32.mrf.mxu0 }
 0x14d   :  { %v885_v39 = vpop.f32.mrf.mxu1  ;;  %v3007_v40 = vadd.f32 %v883_v36, %v639_v37 }
 0x14e   :  { %v643_v41 = vpop.f32.mrf.mxu0 }
 0x14f   :  { %v888_v43 = vpop.f32.mrf.mxu1  ;;  %v644_v0 = vadd.f32 %v2753_v44, %v643_v41 }
 0x150   :  { %v645_v46 = vpop.f32.mrf.mxu0 }
 0x151   :  { %v890_v47 = vpop.f32.mrf.mxu1  ;;  %v3010_v48 = vadd.f32 %v888_v43, %v644_v0 }
 0x152   :  { %v648_v49 = vpop.f32.mrf.mxu0 }
 0x153   :  { %v893_v50 = vpop.f32.mrf.mxu1  ;;  %v649_v51 = vadd.f32 %v2753_v44, %v648_v49 }
 0x154   :  { %v650_v53 = vpop.f32.mrf.mxu0 }
 0x155   :  { %v895_v54 = vpop.f32.mrf.mxu1  ;;  %v3013_v56 = vadd.f32 %v893_v50, %v649_v51 }
 0x156   :  { %v653_v58 = vpop.f32.mrf.mxu0 }
 0x157   :  { %v898_v59 = vpop.f32.mrf.mxu1  ;;  %v654_v60 = vadd.f32 %v2753_v44, %v653_v58 }
 0x158   :  { %v655_v61 = vpop.f32.mrf.mxu0 }
 0x159   :  { %v900_v62 = vpop.f32.mrf.mxu1  ;;  %v3016_v1 = vadd.f32 %v898_v59, %v654_v60 }
 0x15a   :  { %v658_v3 = vpop.f32.mrf.mxu0 }
 0x15b   :  { %v903_v5 = vpop.f32.mrf.mxu1  ;;  %v659_v6 = vadd.f32 %v2753_v44, %v658_v3 }
 0x15c   :  { %v660_v7 = vpop.f32.mrf.mxu0 }
 0x15d   :  { %v905_v8 = vpop.f32.mrf.mxu1  ;;  %v3019_v9 = vadd.f32 %v903_v5, %v659_v6 }
 0x15e   :  { %v663_v13 = vpop.f32.mrf.mxu0 }
 0x15f   :  { %v908_v14 = vpop.f32.mrf.mxu1  ;;  %v664_v15 = vadd.f32 %v2753_v44, %v663_v13 }
 0x160   :  { %v665_v16 = vpop.f32.mrf.mxu0 }
 0x161   :  { %v910_v17 = vpop.f32.mrf.mxu1  ;;  %v3022_v19 = vadd.f32 %v908_v14, %v664_v15 }
 0x162   :  { %v668_v20 = vpop.f32.mrf.mxu0 }
 0x163   :  { %v913_v21 = vpop.f32.mrf.mxu1  ;;  %v669_v24 = vadd.f32 %v2753_v44, %v668_v20 }
 0x164   :  { %v670_v25 = vpop.f32.mrf.mxu0 }
 0x165   :  { %v915_v27 = vpop.f32.mrf.mxu1  ;;  %v3025_v28 = vadd.f32 %v913_v21, %v669_v24 }
 0x166   :  { %v673_v29 = vpop.f32.mrf.mxu0 }
 0x167   :  { %v918_v30 = vpop.f32.mrf.mxu1  ;;  %v674_v31 = vadd.f32 %v2753_v44, %v673_v29 }
 0x168   :  { %v675_v35 = vpop.f32.mrf.mxu0 }
 0x169   :  { %v920_v36 = vpop.f32.mrf.mxu1  ;;  %v3028_v37 = vadd.f32 %v918_v30, %v674_v31 }
 0x16a   :  { %v678_v38 = vpop.f32.mrf.mxu0 }
 0x16b   :  { %v923_v39 = vpop.f32.mrf.mxu1  ;;  %v679_v41 = vadd.f32 %v2753_v44, %v678_v38 }
 0x16c   :  { %v680_v43 = vpop.f32.mrf.mxu0 }
 0x16d   :  { %v925_v0 = vpop.f32.mrf.mxu1  ;;  %v3031_v46 = vadd.f32 %v923_v39, %v679_v41 }
 0x16e   :  { %v683_v47 = vpop.f32.mrf.mxu0 }
 0x16f   :  { %v928_v49 = vpop.f32.mrf.mxu1  ;;  %v684_v50 = vadd.f32 %v2753_v44, %v683_v47 }
 0x170   :  { %v685_v51 = vpop.f32.mrf.mxu0 }
 0x171   :  { %v930_v53 = vpop.f32.mrf.mxu1  ;;  %v929_v54 = vadd.f32 %v928_v49, %v684_v50 }
 0x172   :  { %v688_v58 = vpop.f32.mrf.mxu0 }
 0x173   :  { %v933_v59 = vpop.f32.mrf.mxu1  ;;  %v689_v60 = vadd.f32 %v2753_v44, %v688_v58 }
 0x174   :  { %v690_v61 = vpop.f32.mrf.mxu0 }
 0x175   :  { %v935_v62 = vpop.f32.mrf.mxu1  ;;  %v934_v3 = vadd.f32 %v933_v59, %v689_v60 }
 0x176   :  { %v693_v5 = vpop.f32.mrf.mxu0 }
 0x177   :  { %v938_v6 = vpop.f32.mrf.mxu1  ;;  %v694_v7 = vadd.f32 %v2753_v44, %v693_v5 }
 0x178   :  { %v695_v8 = vpop.f32.mrf.mxu0 }
 0x179   :  { %v940_v13 = vpop.f32.mrf.mxu1  ;;  %v939_v14 = vadd.f32 %v938_v6, %v694_v7 }
 0x17a   :  { %v698_v15 = vpop.f32.mrf.mxu0 }
 0x17b   :  { %v943_v16 = vpop.f32.mrf.mxu1  ;;  %v699_v17 = vadd.f32 %v2753_v44, %v698_v15 }
 0x17c   :  { %v700_v20 = vpop.f32.mrf.mxu0 }
 0x17d   :  { %v945_v21 = vpop.f32.mrf.mxu1  ;;  %v944_v24 = vadd.f32 %v943_v16, %v699_v17 }
 0x17e   :  { %v703_v25 = vpop.f32.mrf.mxu0 }
 0x17f   :  { %v948_v27 = vpop.f32.mrf.mxu1  ;;  %v704_v29 = vadd.f32 %v2753_v44, %v703_v25 }
 0x180   :  { %v705_v30 = vpop.f32.mrf.mxu0 }
 0x181   :  { %v950_v31 = vpop.f32.mrf.mxu1  ;;  %v949_v35 = vadd.f32 %v948_v27, %v704_v29 }
 0x182   :  { %v708_v36 = vpop.f32.mrf.mxu0 }
 0x183   :  { %v953_v38 = vpop.f32.mrf.mxu1  ;;  %v709_v39 = vadd.f32 %v2753_v44, %v708_v36 }
 0x184   :  { %v710_v41 = vpop.f32.mrf.mxu0 }
 0x185   :  { %v955_v43 = vpop.f32.mrf.mxu1  ;;  %v954_v0 = vadd.f32 %v953_v38, %v709_v39 }
 0x186   :  { %v713_v47 = vpop.f32.mrf.mxu0 }
 0x187   :  { %v958_v49 = vpop.f32.mrf.mxu1  ;;  %v714_v50 = vadd.f32 %v2753_v44, %v713_v47 }
 0x188   :  { %v715_v51 = vpop.f32.mrf.mxu0 }
 0x189   :  { %v960_v53 = vpop.f32.mrf.mxu1  ;;  %v959_v58 = vadd.f32 %v958_v49, %v714_v50 }
 0x18a   :  { %v718_v59 = vpop.f32.mrf.mxu0 }
 0x18b   :  { %v963_v60 = vpop.f32.mrf.mxu1  ;;  %v719_v61 = vadd.f32 %v2753_v44, %v718_v59 }
 0x18c   :  { %v720_v62 = vpop.f32.mrf.mxu0 }
 0x18d   :  { %v965_v5 = vpop.f32.mrf.mxu1  ;;  %v964_v6 = vadd.f32 %v963_v60, %v719_v61 }
 0x18e   :  { %v723_v7 = vpop.f32.mrf.mxu0 }
 0x18f   :  { %v968_v8 = vpop.f32.mrf.mxu1  ;;  %v724_v13 = vadd.f32 %v2753_v44, %v723_v7 }
 0x190   :  { %v725_v15 = vpop.f32.mrf.mxu0 }
 0x191   :  { %v970_v16 = vpop.f32.mrf.mxu1  ;;  %v969_v17 = vadd.f32 %v968_v8, %v724_v13 }
 0x192   :  { %v1038_v20 = vpop.f32.mrf.mxu0 }
 0x193   :  { %v1173_v21 = vpop.f32.mrf.mxu1 }
 0x194   :  { %v3042_v25 = vadd.f32 %v1173_v21, %v929_v54  ;;  %v1040_v27 = vpop.f32.mrf.mxu0 }
 0x195   :  { %v1175_v29 = vpop.f32.mrf.mxu1 }
 0x196   :  { %v1043_v30 = vpop.f32.mrf.mxu0 }
 0x197   :  { %v1178_v31 = vpop.f32.mrf.mxu1 }
 0x198   :  { %v3044_v36 = vadd.f32 %v1178_v31, %v934_v3  ;;  %v1045_v38 = vpop.f32.mrf.mxu0 }
 0x199   :  { %v1180_v39 = vpop.f32.mrf.mxu1 }
 0x19a   :  { %v1048_v41 = vpop.f32.mrf.mxu0 }
 0x19b   :  { %v1183_v43 = vpop.f32.mrf.mxu1 }
 0x19c   :  { %v3046_v47 = vadd.f32 %v1183_v43, %v939_v14  ;;  %v1050_v44 = vpop.f32.mrf.mxu0 }
 0x19d   :  { %v1185_v49 = vpop.f32.mrf.mxu1 }
 0x19e   :  { %v1053_v50 = vpop.f32.mrf.mxu0 }
 0x19f   :  { %v1188_v51 = vpop.f32.mrf.mxu1 }
 0x1a0   :  { %v3048_v53 = vadd.f32 %v1188_v51, %v944_v24  ;;  %v1055_v54 = vpop.f32.mrf.mxu0 }
 0x1a1   :  { %v1190_v59 = vpop.f32.mrf.mxu1 }
 0x1a2   :  { %v1058_v60 = vpop.f32.mrf.mxu0  ;;  %v1044_v59 = vadd.f32 %v1043_v30, %v2793_v2 }
 0x1a3   :  { %v1193_v61 = vpop.f32.mrf.mxu1 }
 0x1a4   :  { %v3050_v62 = vadd.f32 %v1193_v61, %v949_v35  ;;  %v1060_v3 = vpop.f32.mrf.mxu0 }
 0x1a5   :  { %v1195_v5 = vpop.f32.mrf.mxu1 }
 0x1a6   :  { %v1063_v7 = vpop.f32.mrf.mxu0 }
 0x1a7   :  { %v1198_v8 = vpop.f32.mrf.mxu1 }
 0x1a8   :  { %v3052_v13 = vadd.f32 %v1198_v8, %v954_v0  ;;  %v1065_v14 = vpop.f32.mrf.mxu0 }
 0x1a9   :  { %v1200_v15 = vpop.f32.mrf.mxu1 }
 0x1aa   :  { %v1068_v16 = vpop.f32.mrf.mxu0 }
 0x1ab   :  { %v1203_v21 = vpop.f32.mrf.mxu1 }
 0x1ac   :  { %v3054_v27 = vadd.f32 %v1203_v21, %v959_v58  ;;  %v1070_v24 = vpop.f32.mrf.mxu0  ;;  %v1039_v58 = vadd.f32 %v1038_v20, %v2776_v55 }
 0x1ad   :  { %v1205_v29 = vpop.f32.mrf.mxu1  ;;  %v1049_v24 = vadd.f32 %v1048_v41, %v2810_v12  ;;  %v1059_v12 = vadd.f32 %v1058_v60, %v2844_v32  ;;  %v1069_v32 = vadd.f32 %v1068_v16, %v2878_v52 }
 0x1ae   :  { %v1073_v31 = vpop.f32.mrf.mxu0 }
 0x1af   :  { %v1208_v38 = vpop.f32.mrf.mxu1 }
 0x1b0   :  { %v3056_v39 = vadd.f32 %v1208_v38, %v964_v6  ;;  %v1075_v35 = vpop.f32.mrf.mxu0  ;;  %v1054_v6 = vadd.f32 %v1053_v50, %v2827_v22  ;;  %v1064_v22 = vadd.f32 %v1063_v7, %v2861_v42  ;;  %v1074_v42 = vadd.f32 %v1073_v31, %v2895_v63 }
 0x1b1   :  { %v1210_v43 = vpop.f32.mrf.mxu1 }
 0x1b2   :  { %v1078_v44 = vpop.f32.mrf.mxu0 }
 0x1b3   :  { %v1213_v49 = vpop.f32.mrf.mxu1  ;;  %v1079_v52 = vadd.f32 %v1078_v44, %v2912_v11 }
 0x1b4   :  { %v3058_v51 = vadd.f32 %v1213_v49, %v969_v17  ;;  %v1080_v0 = vpop.f32.mrf.mxu0 }
 0x1b5   :  { %v1215_v54 = vpop.f32.mrf.mxu1 }
 0x1b6   :  { %v1083_v61 = vpop.f32.mrf.mxu0 }
 0x1b7   :  { %v1589_v3 = vpop.f32.mrf.mxu1  ;;  %v1084_v63 = vadd.f32 %v1083_v61, %v2929_v23 }
 0x1b8   :  { %v1289_v5 = vadd.f32 %v1589_v3, %v1044_v59  ;;  %v1085_v8 = vpop.f32.mrf.mxu0 }
 0x1b9   :  { %v1283_v14 = vpop.f32.mrf.mxu1 }
 0x1ba   :  { %1463 = vst.msk [vmem:[%s3243_s3 + $0x8] sm:$0xff] %vm373_vm0, %v1289_v5  ;;  %v1284_v17 = vadd.f32 %v1283_v14, %v1039_v58  ;;  %v1088_v15 = vpop.f32.mrf.mxu0 }
 0x1bb   :  { %v1592_v21 = vpop.f32.mrf.mxu1  ;;  %v1089_v11 = vadd.f32 %v1088_v15, %v2946_v34 }
 0x1bc   :  { %1462 = vst.msk [vmem:[%s3243_s3] sm:$0xff] %vm373_vm0, %v1284_v17  ;;  %v1299_v55 = vadd.f32 %v1592_v21, %v1054_v6  ;;  %v1090_v2 = vpop.f32.mrf.mxu0 }
 0x1bd   :  { %v1293_v20 = vpop.f32.mrf.mxu1 }
 0x1be   :  { %1465 = vst.msk [vmem:[%s3243_s3 + $0x18] sm:$0xff] %vm373_vm0, %v1299_v55  ;;  %v1294_v30 = vadd.f32 %v1293_v20, %v1049_v24  ;;  %v1093_v50 = vpop.f32.mrf.mxu0 }
 0x1bf   :  { %v1595_v29 = vpop.f32.mrf.mxu1  ;;  %v1094_v23 = vadd.f32 %v1093_v50, %v2963_v45 }
 0x1c0   :  { %1464 = vst.msk [vmem:[%s3243_s3 + $0x10] sm:$0xff] %vm373_vm0, %v1294_v30  ;;  %v1309_v41 = vadd.f32 %v1595_v29, %v1064_v22  ;;  %v1095_v38 = vpop.f32.mrf.mxu0 }
 0x1c1   :  { %v1303_v35 = vpop.f32.mrf.mxu1 }
 0x1c2   :  { %1467 = vst.msk [vmem:[%s3243_s3 + $0x28] sm:$0xff] %vm373_vm0, %v1309_v41  ;;  %v1304_v7 = vadd.f32 %v1303_v35, %v1059_v12  ;;  %v1098_v43 = vpop.f32.mrf.mxu0 }
 0x1c3   :  { %v1598_v49 = vpop.f32.mrf.mxu1  ;;  %v1099_v34 = vadd.f32 %v1098_v43, %v2980_v57 }
 0x1c4   :  { %1466 = vst.msk [vmem:[%s3243_s3 + $0x20] sm:$0xff] %vm373_vm0, %v1304_v7  ;;  %v1319_v60 = vadd.f32 %v1598_v49, %v1074_v42  ;;  %v1100_v0 = vpop.f32.mrf.mxu0 }
 0x1c5   :  { %v1313_v54 = vpop.f32.mrf.mxu1 }
 0x1c6   :  { %1469 = vst.msk [vmem:[%s3243_s3 + $0x38] sm:$0xff] %vm373_vm0, %v1319_v60  ;;  %v1314_v31 = vadd.f32 %v1313_v54, %v1069_v32  ;;  %v1103_v59 = vpop.f32.mrf.mxu0 }
 0x1c7   :  { %v1601_v3 = vpop.f32.mrf.mxu1  ;;  %v1104_v45 = vadd.f32 %v1103_v59, %v2991_v4 }
 0x1c8   :  { %1468 = vst.msk [vmem:[%s3243_s3 + $0x30] sm:$0xff] %vm373_vm0, %v1314_v31  ;;  %v1329_v16 = vadd.f32 %v1601_v3, %v1084_v63  ;;  %v1105_v58 = vpop.f32.mrf.mxu0 }
 0x1c9   :  { %v1323_v5 = vpop.f32.mrf.mxu1 }
 0x1ca   :  { %1471 = vst.msk [vmem:[%s3243_s3 + $0x48] sm:$0xff] %vm373_vm0, %v1329_v16  ;;  %v1324_v61 = vadd.f32 %v1323_v5, %v1079_v52  ;;  %v1108_v8 = vpop.f32.mrf.mxu0 }
 0x1cb   :  { %v1604_v14 = vpop.f32.mrf.mxu1  ;;  %v1109_v57 = vadd.f32 %v1108_v8, %v2995_v10 }
 0x1cc   :  { %1470 = vst.msk [vmem:[%s3243_s3 + $0x40] sm:$0xff] %vm373_vm0, %v1324_v61  ;;  %v1339_v44 = vadd.f32 %v1604_v14, %v1094_v23  ;;  %v1110_v6 = vpop.f32.mrf.mxu0 }
 0x1cd   :  { %v1333_v17 = vpop.f32.mrf.mxu1 }
 0x1ce   :  { %1473 = vst.msk [vmem:[%s3243_s3 + $0x58] sm:$0xff] %vm373_vm0, %v1339_v44  ;;  %v1334_v21 = vadd.f32 %v1333_v17, %v1089_v11  ;;  %v1113_v24 = vpop.f32.mrf.mxu0 }
 0x1cf   :  { %v1607_v55 = vpop.f32.mrf.mxu1  ;;  %v1114_v4 = vadd.f32 %v1113_v24, %v2998_v18 }
 0x1d0   :  { %1472 = vst.msk [vmem:[%s3243_s3 + $0x50] sm:$0xff] %vm373_vm0, %v1334_v21  ;;  %v1349_v15 = vadd.f32 %v1607_v55, %v1104_v45  ;;  %v1115_v2 = vpop.f32.mrf.mxu0 }
 0x1d1   :  { %v1343_v20 = vpop.f32.mrf.mxu1 }
 0x1d2   :  { %1475 = vst.msk [vmem:[%s3243_s3 + $0x68] sm:$0xff] %vm373_vm0, %v1349_v15  ;;  %v1344_v22 = vadd.f32 %v1343_v20, %v1099_v34  ;;  %v1118_v30 = vpop.f32.mrf.mxu0 }
 0x1d3   :  { %v1610_v50 = vpop.f32.mrf.mxu1  ;;  %v1119_v42 = vadd.f32 %v1118_v30, %v3001_v26 }
 0x1d4   :  { %1474 = vst.msk [vmem:[%s3243_s3 + $0x60] sm:$0xff] %vm373_vm0, %v1344_v22  ;;  %v1359_v29 = vadd.f32 %v1610_v50, %v1114_v4  ;;  %v1120_v12 = vpop.f32.mrf.mxu0 }
 0x1d5   :  { %v1353_v41 = vpop.f32.mrf.mxu1 }
 0x1d6   :  { %1477 = vst.msk [vmem:[%s3243_s3 + $0x78] sm:$0xff] %vm373_vm0, %v1359_v29  ;;  %v1354_v18 = vadd.f32 %v1353_v41, %v1109_v57  ;;  %v1123_v38 = vpop.f32.mrf.mxu0 }
 0x1d7   :  { %v1613_v35 = vpop.f32.mrf.mxu1  ;;  %v1124_v10 = vadd.f32 %v1123_v38, %v3004_v33 }
 0x1d8   :  { %1476 = vst.msk [vmem:[%s3243_s3 + $0x70] sm:$0xff] %vm373_vm0, %v1354_v18  ;;  %v1125_v7 = vpop.f32.mrf.mxu0 }
 0x1d9   :  { %v1363_v43 = vpop.f32.mrf.mxu1  ;;  %v1369_v49 = vadd.f32 %v1613_v35, %v1124_v10 }
 0x1da   :  { %v1364_v32 = vadd.f32 %v1363_v43, %v1119_v42  ;;  %v1128_v60 = vpop.f32.mrf.mxu0 }
 0x1db   :  { %v1616_v0 = vpop.f32.mrf.mxu1  ;;  %1479 = vst.msk [vmem:[%s3243_s3 + $0x88] sm:$0xff] %vm373_vm0, %v1369_v49  ;;  %v1129_v26 = vadd.f32 %v1128_v60, %v3007_v40 }
 0x1dc   :  { %1478 = vst.msk [vmem:[%s3243_s3 + $0x80] sm:$0xff] %vm373_vm0, %v1364_v32  ;;  %v1130_v54 = vpop.f32.mrf.mxu0 }
 0x1dd   :  { %v1373_v33 = vpop.f32.mrf.mxu1 }
 0x1de   :  { %v1374_v63 = vadd.f32 %v1373_v33, %v1129_v26  ;;  %v1133_v31 = vpop.f32.mrf.mxu0 }
 0x1df   :  { %v1619_v59 = vpop.f32.mrf.mxu1  ;;  %v1134_v3 = vadd.f32 %v1133_v31, %v3010_v48 }
 0x1e0   :  { %1480 = vst.msk [vmem:[%s3243_s3 + $0x90] sm:$0xff] %vm373_vm0, %v1374_v63  ;;  %v1135_v52 = vpop.f32.mrf.mxu0 }
 0x1e1   :  { %v1383_v16 = vpop.f32.mrf.mxu1  ;;  %v1379_v58 = vadd.f32 %v1616_v0, %v1134_v3 }
 0x1e2   :  { %v1138_v5 = vpop.f32.mrf.mxu0 }
 0x1e3   :  { %v1622_v23 = vpop.f32.mrf.mxu1  ;;  %1481 = vst.msk [vmem:[%s3243_s3 + $0x98] sm:$0xff] %vm373_vm0, %v1379_v58  ;;  %v1139_v40 = vadd.f32 %v1138_v5, %v3013_v56 }
 0x1e4   :  { %v1140_v61 = vpop.f32.mrf.mxu0 }
 0x1e5   :  { %v1393_v8 = vpop.f32.mrf.mxu1  ;;  %v1384_v14 = vadd.f32 %v1383_v16, %v1139_v40 }
 0x1e6   :  { %v1143_v11 = vpop.f32.mrf.mxu0 }
 0x1e7   :  { %v1625_v44 = vpop.f32.mrf.mxu1  ;;  %1482 = vst.msk [vmem:[%s3243_s3 + $0xa0] sm:$0xff] %vm373_vm0, %v1384_v14  ;;  %v1144_v48 = vadd.f32 %v1143_v11, %v3016_v1 }
 0x1e8   :  { %v1145_v6 = vpop.f32.mrf.mxu0 }
 0x1e9   :  { %v1403_v17 = vpop.f32.mrf.mxu1  ;;  %v1389_v45 = vadd.f32 %v1619_v59, %v1144_v48 }
 0x1ea   :  { %v1148_v21 = vpop.f32.mrf.mxu0 }
 0x1eb   :  { %v1628_v24 = vpop.f32.mrf.mxu1  ;;  %1483 = vst.msk [vmem:[%s3243_s3 + $0xa8] sm:$0xff] %vm373_vm0, %v1389_v45  ;;  %v1149_v56 = vadd.f32 %v1148_v21, %v3019_v9 }
 0x1ec   :  { %v1419_v55 = vadd.f32 %v1628_v24, %v3042_v25  ;;  %v1150_v34 = vpop.f32.mrf.mxu0 }
 0x1ed   :  { %v1413_v15 = vpop.f32.mrf.mxu1  ;;  %v1394_v2 = vadd.f32 %v1393_v8, %v1149_v56 }
 0x1ee   :  { %1489 = vst.msk [vmem:[%s3243_s3 + $0xd8] sm:$0xff] %vm373_vm0, %v1419_v55  ;;  %v1153_v1 = vpop.f32.mrf.mxu0 }
 0x1ef   :  { %v1631_v20 = vpop.f32.mrf.mxu1  ;;  %1484 = vst.msk [vmem:[%s3243_s3 + $0xb0] sm:$0xff] %vm373_vm0, %v1394_v2  ;;  %v1154_v4 = vadd.f32 %v1153_v1, %v3022_v19 }
 0x1f0   :  { %v1429_v9 = vadd.f32 %v1631_v20, %v3046_v47  ;;  %v1155_v25 = vpop.f32.mrf.mxu0 }
 0x1f1   :  { %v1423_v22 = vpop.f32.mrf.mxu1  ;;  %v1399_v30 = vadd.f32 %v1622_v23, %v1154_v4 }
 0x1f2   :  { %1491 = vst.msk [vmem:[%s3243_s3 + $0xe8] sm:$0xff] %vm373_vm0, %v1429_v9  ;;  %v1424_v50 = vadd.f32 %v1423_v22, %v3044_v36  ;;  %v1158_v57 = vpop.f32.mrf.mxu0 }
 0x1f3   :  { %v1634_v29 = vpop.f32.mrf.mxu1  ;;  %1485 = vst.msk [vmem:[%s3243_s3 + $0xb8] sm:$0xff] %vm373_vm0, %v1399_v30  ;;  %v1159_v19 = vadd.f32 %v1158_v57, %v3025_v28 }
 0x1f4   :  { %1490 = vst.msk [vmem:[%s3243_s3 + $0xe0] sm:$0xff] %vm373_vm0, %v1424_v50  ;;  %v1439_v47 = vadd.f32 %v1634_v29, %v3050_v62  ;;  %v1160_v12 = vpop.f32.mrf.mxu0 }
 0x1f5   :  { %v1433_v41 = vpop.f32.mrf.mxu1  ;;  %v1404_v18 = vadd.f32 %v1403_v17, %v1159_v19 }
 0x1f6   :  { %1493 = vst.msk [vmem:[%s3243_s3 + $0xf8] sm:$0xff] %vm373_vm0, %v1439_v47  ;;  %v1434_v36 = vadd.f32 %v1433_v41, %v3048_v53  ;;  %v1163_v38 = vpop.f32.mrf.mxu0 }
 0x1f7   :  { %v1637_v35 = vpop.f32.mrf.mxu1  ;;  %1486 = vst.msk [vmem:[%s3243_s3 + $0xc0] sm:$0xff] %vm373_vm0, %v1404_v18  ;;  %v1164_v28 = vadd.f32 %v1163_v38, %v3028_v37 }
 0x1f8   :  { %1492 = vst.msk [vmem:[%s3243_s3 + $0xf0] sm:$0xff] %vm373_vm0, %v1434_v36  ;;  %v1449_v62 = vadd.f32 %v1637_v35, %v3054_v27  ;;  %v1165_v42 = vpop.f32.mrf.mxu0 }
 0x1f9   :  { %v1443_v10 = vpop.f32.mrf.mxu1  ;;  %v1409_v7 = vadd.f32 %v1625_v44, %v1164_v28 }
 0x1fa   :  { %1495 = vst.msk [vmem:[%s3243_s3 + $0x108] sm:$0xff] %vm373_vm0, %v1449_v62  ;;  %v1444_v53 = vadd.f32 %v1443_v10, %v3052_v13  ;;  %v1168_v43 = vpop.f32.mrf.mxu0 }
 0x1fb   :  { %v1640_v49 = vpop.f32.mrf.mxu1  ;;  %1487 = vst.msk [vmem:[%s3243_s3 + $0xc8] sm:$0xff] %vm373_vm0, %v1409_v7  ;;  %v1169_v37 = vadd.f32 %v1168_v43, %v3031_v46 }
 0x1fc   :  { %1494 = vst.msk [vmem:[%s3243_s3 + $0x100] sm:$0xff] %vm373_vm0, %v1444_v53  ;;  %v1459_v27 = vadd.f32 %v1640_v49, %v3058_v51  ;;  %v1170_v32 = vpop.f32.mrf.mxu0 }
 0x1fd   :  { %v1453_v60 = vpop.f32.mrf.mxu1  ;;  %v1414_v0 = vadd.f32 %v1413_v15, %v1169_v37 }
 0x1fe   :  { %1497 = vst.msk [vmem:[%s3243_s3 + $0x118] sm:$0xff] %vm373_vm0, %v1459_v27  ;;  %v1454_v13 = vadd.f32 %v1453_v60, %v3056_v39 }
 0x1ff   :  { %1488 = vst.msk [vmem:[%s3243_s3 + $0xd0] sm:$0xff] %vm373_vm0, %v1414_v0 }
 0x200   :  { %1496 = vst.msk [vmem:[%s3243_s3 + $0x110] sm:$0xff] %vm373_vm0, %v1454_v13 }

// kernel: tile.7
= control target key start
LH: loop header
LB: loop body
LE: loop exit
PB: predicated region body
PF: predicated region fallthrough
CT: control target
= control target key end

     0   :  { %vm17_vm0 = vcmask 392192   ;;  %s62_s0 = inlined_call_operand.vmem [shape: f32[3,2,48], index: 0, kind: input, shape index: {}]   ;;  %s63_s1 = inlined_call_operand.vmem [shape: f32[6,48], index: 1, kind: output, shape index: {}]  }
   0x1   :  { %v30_v0 = vld [vmem:[%s62_s0 + $0x4] sm:$0x3]  ;;  %v31_v1 = vld [vmem:[%s62_s0 + $0x2] sm:$0x3]  ;;  %v14_v2 = vld [vmem:[%s62_s0] sm:$0x3] }
   0x2   :  { %9 = vst [vmem:[#allocation0] sm:$0x3] %v30_v0  ;;  %13 = vst [vmem:[#allocation0 + $0x10] sm:$0x3] %v31_v1 }
   0x3   :  { %15 = vst [vmem:[#allocation0 + $0x8] sm:$0x3] %v14_v2 }
   0x9   :  { %v20_v4 = vld [vmem:[#allocation0 + $0x10] sm:$0x3]   ;;  %v25_v5 = vld [vmem:[#allocation0] sm:$0x3]  }
   0xa   :  { %v16_v3 = vld [vmem:[#allocation0 + $0x8] sm:$0x3]   ;;  %32 = vst.msk [vmem:[%s63_s1 + $0x2] sm:$0x3] %vm17_vm0, %v20_v4   ;;  %33 = vst.msk [vmem:[%s63_s1 + $0x4] sm:$0x3] %vm17_vm0, %v25_v5  }
   0xb   :  { %18 = vst.msk [vmem:[%s63_s1] sm:$0x3] %vm17_vm0, %v16_v3  }

// kernel: _lambda_.5
= control target key start
LH: loop header
LB: loop body
LE: loop exit
PB: predicated region body
PF: predicated region fallthrough
CT: control target
= control target key end

     0   :  { %s1615_s27 = smov 0   ;;  %s1816_s0 = inlined_call_operand.vmem [shape: f32[2,24,6], index: 0, kind: input, shape index: {}]   ;;  %s1817_s1 = inlined_call_operand.vmem [shape: f32[6,34], index: 1, kind: input, shape index: {}]   ;;  %s1818_s2 = inlined_call_operand.vmem [shape: f32[1,34], index: 2, kind: input, shape index: {}]   ;;  %s1819_s3 = inlined_call_operand.vmem [shape: f32[32,2], index: 3, kind: input, shape index: {}]   ;;  %s1820_s4 = inlined_call_operand.vmem [shape: f32[1,2], index: 4, kind: input, shape index: {}]   ;;  %s1821_s5 = inlined_call_operand.vmem [shape: f32[2,6], index: 5, kind: input, shape index: {}]   ;;  %s1822_s6 = inlined_call_operand.vmem [shape: f32[2,2], index: 6, kind: input, shape index: {}]   ;;  %s1823_s7 = inlined_call_operand.vmem [shape: f32[1,2], index: 7, kind: input, shape index: {}]   ;;  %s1824_s8 = inlined_call_operand.vmem [shape: f32[2,24,2], index: 8, kind: output, shape index: {}]  }
   0x1 LB: > { %s1307_s28 = sadd.s32 4294967295, %s1559_s27   ;;  %p1311_p0 = scmp.ge.s32.totalorder %s1559_s27, 1  ;;  %s1559_s27 = sphi %s1615_s27, %s18_s27  }
   0x2   : > { %p262_p1 = scmp.lt.s32.totalorder %s1559_s27, 3 }
   0x4   : > { %p263_p2 = pnand %p1311_p0, %p262_p1 }
   0x5   : > { %p296_p3 = scmp.lt.s32.totalorder (!%p263_p2), %s1307_s28, 1  ;;  %s1563_s23 = smov (!%p263_p2), 96  }
   0x6   : > { %266 = sbr.rel (%p263_p2) target bundleno = 2072 (0x818), region = 52  ;;  %s1564_s30 = smov (!%p263_p2), 126  }
   0x7   : > { %s1565_s9 = smov (!%p263_p2), 125   ;;  %s1566_s10 = smov (!%p263_p2), 127  }
   0x8   : > { %s1567_s12 = smov (!%p263_p2), 124   ;;  %s1568_s13 = smov (!%p263_p2), 123  }
   0x9   : > { %s1569_s16 = smov (!%p263_p2), 1  }
   0xb   : > { %v309_v0 = vld [vmem:[%s1817_s1] sm:$0x3f]  ;;  %vm332_vm0 = vcmask 1045504   ;;  %v1561_v1 = vmov 0.0   ;;  %vm1562_vm1 = vmmov 0   ;;  %v314_v2 = vld [vmem:[%s1819_s3 + $0x18] sm:$0xff] }
   0xc   : > { %1395 = vmatprep.subr.mxu0 %v1561_v1  ;;  %1397 = vmatprep.mubr.msk.f32.mxu0 %vm1562_vm1, %v1561_v1  ;;  %s1826_s28 = smov (!%p296_p3, %s1307_s28), 1  ;;  %vm322_vm2 = vcmask 48128   ;;  %v313_v6 = vld [vmem:[%s1819_s3 + $0x10] sm:$0xff]  ;;  %v312_v7 = vld [vmem:[%s1819_s3 + $0x8] sm:$0xff]  ;;  %v311_v8 = vld [vmem:[%s1819_s3] sm:$0xff]  ;;  %vm425_vm3 = vcmask 261120  }
   0xd   : > { %1396 = vmatpush3.msk.msra.mxu0 %vm332_vm0, %v309_v0  ;;  %1406 = vmatprep.subr.mxu1 %v1561_v1  ;;  %s1505_s11 = smul.u32 24, %s1826_s28  ;;  %v1314_v9 = vld [vmem:[%s1818_s2] ss:$0 sm:$0xff]  ;;  %vm530_vm4 = vcmask 15360   ;;  %vm581_vm5 = vcmask 1041408   ;;  %vm674_vm6 = vcmask 7168  }
   0xe   : > { %1407 = vmatpush3.msra.mxu1 %v314_v2  ;;  %1414 = vmatprep.mubr.msk.f32.mxu1 %vm1562_vm1, %v1561_v1  ;;  %v1319_v22 = vld [vmem:[%s1820_s4] ss:$0 sm:$0xff]  ;;  %vm767_vm7 = vcmask 195584  }
   0xf   : > { %1408 = vmatprep.subr.mxu1 %v1561_v1  ;;  %1423 = vmatprep.subr.mxu0 %v1561_v1  ;;  %s300_s14 = scalar_lea.vmem %s1816_s0, %s1505_s11  ;;  %v571_v56 = vld [vmem:[%s1821_s5] sm:$0x3]  ;;  %s305_s21 = scalar_lea.vmem %s1824_s8, %s1505_s11 }
  0x10   : > { %v306_v3 = vld [vmem:[%s300_s14] sm:$0xff]  ;;  %v307_v4 = vld [vmem:[%s300_s14 + $0x8] sm:$0xff]  ;;  %v308_v5 = vld [vmem:[%s300_s14 + $0x10] sm:$0xff]  ;;  %1409 = vmatpush3.msra.mxu1 %v313_v6 }
  0x11   : > { %1398 = vmatmul.mubr.msk.f32.vlgmr.msra.gmra.mxu0 %vm322_vm2, %v306_v3  ;;  %1410 = vmatprep.subr.mxu1 %v1561_v1 }
  0x12   : > { %1400 = vmatprep.mubr.msk.f32.mxu0 %vm1562_vm1, %v1561_v1  ;;  %1411 = vmatpush3.msra.mxu1 %v312_v7 }
  0x13   : > { %1412 = vmatprep.subr.mxu1 %v1561_v1  ;;  %1424 = vmatpush3.msk.msra.mxu0 %vm581_vm5, %v571_v56 }
  0x14   : > { %1413 = vmatpush3.msra.mxu1 %v311_v8  ;;  %1449 = vmatprep.subr.mxu0 %v1561_v1 }
  0x15   : > { %1401 = vmatmul.mubr.msk.f32.gmra.mxu0 %vm322_vm2, %v307_v4  ;;  %1434 = vmatprep.subr.mxu1 %v1561_v1 }
  0x16   : > { %1403 = vmatprep.mubr.msk.f32.mxu0 %vm1562_vm1, %v1561_v1 }
  0x19   : > { %1404 = vmatmul.mubr.msk.f32.gmra.mxu0 %vm322_vm2, %v308_v5 }
  0x1a   : > { %1425 = vmatprep.mubr.msk.f32.mxu0 %vm1562_vm1, %v1561_v1 }
  0xd1   : > { %v402_v10 = vpop.f32.mrf.mxu0 }
  0xd2   : > { %v403_v11 = vadd.f32 %v1314_v9, %v402_v10 }
  0xd3   : > { %v1399_v12 = vpop.f32.mrf.mxu0 }
  0xd4   : > { %v416_v13 = vmax.f32 %v403_v11, 0.0  ;;  %518 = vrot.lane.b32.xlu0 %v403_v11, %s1563_s23 }
  0xd5   : > { %v407_v14 = vpop.f32.mrf.mxu0 }
  0xd6   : > { %v408_v15 = vadd.f32 %v1314_v9, %v407_v14  ;;  %1415 = vmatmul.mubr.msk.f32.vlgmr.msra.gmra.mxu1 %vm425_vm3, %v416_v13 }
  0xd7   : > { %v1402_v16 = vpop.f32.mrf.mxu0  ;;  %1417 = vmatprep.mubr.msk.f32.mxu1 %vm1562_vm1, %v1561_v1 }
  0xd8   : > { %v417_v17 = vmax.f32 %v408_v15, 0.0  ;;  %520 = vrot.lane.b32.xlu0 %v408_v15, %s1563_s23 }
  0xd9   : > { %v412_v18 = vpop.f32.mrf.mxu0 }
  0xda   : > { %v413_v19 = vadd.f32 %v1314_v9, %v412_v18  ;;  %1418 = vmatmul.mubr.msk.f32.gmra.mxu1 %vm425_vm3, %v417_v17 }
  0xdb   : > { %v1405_v20 = vpop.f32.mrf.mxu0  ;;  %1420 = vmatprep.mubr.msk.f32.mxu1 %vm1562_vm1, %v1561_v1 }
  0xdc   : > { %v418_v21 = vmax.f32 %v413_v19, 0.0  ;;  %522 = vrot.lane.b32.xlu1 %v413_v19, %s1563_s23 }
  0xde   : > { %1421 = vmatmul.mubr.msk.f32.gmra.mxu1 %vm425_vm3, %v418_v21 }
  0xdf   : > { %1440 = vmatprep.mubr.msk.f32.mxu1 %vm1562_vm1, %v1561_v1 }
 0x146   : > { %v519_v23 = vpop.permute.xlu0 %518 }
 0x14a   : > { %v521_v31 = vpop.permute.xlu0 %520 }
 0x14e   : > { %v523_v37 = vpop.permute.xlu1 %522 }
 0x196   : > { %v501_v24 = vpop.f32.mrf.mxu1 }
 0x197   : > { %v502_v25 = vadd.f32 %v1319_v22, %v501_v24 }
 0x198   : > { %v1416_v26 = vpop.f32.mrf.mxu1 }
 0x199   : > { %v527_v27 = vadd.f32 %v519_v23, %v502_v25 }
 0x19a   : > { %v506_v28 = vpop.f32.mrf.mxu1 }
 0x19b   : > { %v507_v29 = vadd.f32 %v1319_v22, %v506_v28  ;;  %v531_v30 = vsel %vm530_vm4, %v527_v27, 0.0 }
 0x19c   : > { %v1419_v32 = vpop.f32.mrf.mxu1  ;;  %532 = vadd.xlane.f32.xlu1 %v531_v30 }
 0x19d   : > { %v528_v33 = vadd.f32 %v521_v31, %v507_v29 }
 0x19e   : > { %v511_v34 = vpop.f32.mrf.mxu1 }
 0x19f   : > { %v512_v35 = vadd.f32 %v1319_v22, %v511_v34  ;;  %v534_v36 = vsel %vm530_vm4, %v528_v33, 0.0 }
 0x1a0   : > { %535 = vadd.xlane.f32.xlu0 %v534_v36  ;;  %v1422_v38 = vpop.f32.mrf.mxu1 }
 0x1a1   : > { %v529_v39 = vadd.f32 %v523_v37, %v512_v35 }
 0x1a3   : > { %v537_v40 = vsel %vm530_vm4, %v529_v39, 0.0 }
 0x1a4   : > { %538 = vadd.xlane.f32.xlu0 %v537_v40 }
 0x225   : > { %v533_v41 = vpop.xlane.xlu1 %532 }
 0x226   : > { %v541_v42 = vmul.f32 0.5, %v533_v41 }
 0x228   : > { %v544_v43 = vsub.f32 %v527_v27, %v541_v42 }
 0x229   : > { %v536_v44 = vpop.xlane.xlu0 %535 }
 0x22a   : > { %v542_v45 = vmul.f32 0.5, %v536_v44  ;;  %v547_v46 = vmul.f32 %v544_v43, %v544_v43 }
 0x22c   : > { %v545_v47 = vsub.f32 %v528_v33, %v542_v45  ;;  %v550_v48 = vsel %vm530_vm4, %v547_v46, 0.0 }
 0x22d   : > { %551 = vadd.xlane.f32.xlu1 %v550_v48  ;;  %v539_v49 = vpop.xlane.xlu0 %538 }
 0x22e   : > { %v543_v50 = vmul.f32 0.5, %v539_v49  ;;  %v548_v51 = vmul.f32 %v545_v47, %v545_v47 }
 0x230   : > { %v546_v52 = vsub.f32 %v529_v39, %v543_v50  ;;  %v553_v53 = vsel %vm530_vm4, %v548_v51, 0.0 }
 0x231   : > { %554 = vadd.xlane.f32.xlu0 %v553_v53 }
 0x232   : > { %v549_v54 = vmul.f32 %v546_v52, %v546_v52 }
 0x234   : > { %v556_v55 = vsel %vm530_vm4, %v549_v54, 0.0 }
 0x235   : > { %557 = vadd.xlane.f32.xlu1 %v556_v55 }
 0x2b6   : > { %v552_v57 = vpop.xlane.xlu1 %551 }
 0x2b7   : > { %v559_v58 = vmul.f32 0.5, %v552_v57 }
 0x2b9   : > { %v562_v59 = vadd.f32 1e-05, %v559_v58 }
 0x2ba   : > { %v555_v60 = vpop.xlane.xlu0 %554 }
 0x2bb   : > { %1523 = vrsqrt.f32 %v562_v59  ;;  %v560_v61 = vmul.f32 0.5, %v555_v60 }
 0x2bd   : > { %v563_v62 = vadd.f32 1e-05, %v560_v61 }
 0x2be   : > { %v558_v63 = vpop.xlane.xlu1 %557 }
 0x2bf   : > { %1525 = vrsqrt.f32 %v563_v62  ;;  %v561_v0 = vmul.f32 0.5, %v558_v63 }
 0x2c1   : > { %v564_v2 = vadd.f32 1e-05, %v561_v0 }
 0x2c3   : > { %1527 = vrsqrt.f32 %v564_v2 }
 0x2c8   : > { %v1524_v3 = vpop.eup %1523 }
 0x2c9   : > { %v568_v4 = vmul.f32 %v1524_v3, %v544_v43 }
 0x2cb   : > { %1426 = vmatmul.mubr.msk.f32.vlgmr.msra.gmra.mxu0 %vm530_vm4, %v568_v4 }
 0x2cc   : > { %v1526_v5 = vpop.eup %1525  ;;  %1428 = vmatprep.mubr.msk.f32.mxu0 %vm1562_vm1, %v1561_v1 }
 0x2cd   : > { %v569_v6 = vmul.f32 %v1526_v5, %v545_v47 }
 0x2cf   : > { %1429 = vmatmul.mubr.msk.f32.gmra.mxu0 %vm530_vm4, %v569_v6 }
 0x2d0   : > { %v1528_v7 = vpop.eup %1527  ;;  %1431 = vmatprep.mubr.msk.f32.mxu0 %vm1562_vm1, %v1561_v1 }
 0x2d1   : > { %v570_v8 = vmul.f32 %v1528_v7, %v546_v52 }
 0x2d3   : > { %1432 = vmatmul.mubr.msk.f32.gmra.mxu0 %vm530_vm4, %v570_v8 }
 0x2d4   : > { %1455 = vmatprep.mubr.msk.f32.mxu0 %vm1562_vm1, %v1561_v1 }
 0x38b   : > { %v1698_v9 = vpop.f32.mrf.mxu0 }
 0x38d   : > { %v1427_v10 = vpop.f32.mrf.mxu0 }
 0x38f   : > { %v1700_v11 = vpop.f32.mrf.mxu0 }
 0x390   : > { %670 = vrot.lane.b32.xlu1 %v1700_v11, %s1564_s30 }
 0x391   : > { %v1430_v12 = vpop.f32.mrf.mxu0 }
 0x393   : > { %v1703_v13 = vpop.f32.mrf.mxu0 }
 0x394   : > { %668 = vrot.lane.b32.xlu1 %v1698_v9, %s1564_s30  ;;  %672 = vrot.lane.b32.xlu0 %v1703_v13, %s1564_s30 }
 0x395   : > { %v1433_v14 = vpop.f32.mrf.mxu0 }
 0x398   : > { %907 = vrot.lane.b32.xlu1 %v1700_v11, %s1565_s9  ;;  %909 = vrot.lane.b32.xlu0 %v1703_v13, %s1565_s9 }
 0x39c   : > { %899 = vrot.lane.b32.xlu1 %v1698_v9, %s1566_s10  ;;  %905 = vrot.lane.b32.xlu0 %v1698_v9, %s1565_s9 }
 0x3a0   : > { %903 = vrot.lane.b32.xlu1 %v1703_v13, %s1566_s10  ;;  %901 = vrot.lane.b32.xlu0 %v1700_v11, %s1566_s10 }
 0x402   : > { %v671_v16 = vpop.permute.xlu1 %670 }
 0x406   : > { %v673_v15 = vpop.permute.xlu0 %672  ;;  %v669_v17 = vpop.permute.xlu1 %668 }
 0x407   : > { %1435 = vmatpush3.xpose.msk.msra.mxu1 %vm674_vm6, %v673_v15 }
 0x408   : > { %1436 = vmatprep.subr.mxu1 %v1561_v1 }
 0x40a   : > { %v910_v18 = vpop.permute.xlu0 %909  ;;  %v908_v19 = vpop.permute.xlu1 %907 }
 0x40b   : > { %1437 = vmatpush3.xpose.msk.msra.mxu1 %vm674_vm6, %v671_v16 }
 0x40c   : > { %1438 = vmatprep.subr.mxu1 %v1561_v1 }
 0x40e   : > { %v906_v20 = vpop.permute.xlu0 %905  ;;  %v900_v21 = vpop.permute.xlu1 %899 }
 0x40f   : > { %1439 = vmatpush3.xpose.msk.msra.mxu1 %vm674_vm6, %v669_v17 }
 0x410   : > { %1464 = vmatprep.subr.mxu1 %v1561_v1 }
 0x412   : > { %1441 = vmatmul.mubr.msk.f32.vlgmr.msra.gmra.mxu1 %vm674_vm6, %v1698_v9  ;;  %v902_v22 = vpop.permute.xlu0 %901  ;;  %v904_v23 = vpop.permute.xlu1 %903 }
 0x413   : > { %1465 = vmatpush3.xpose.msk.msra.mxu1 %vm674_vm6, %v910_v18  ;;  %1443 = vmatprep.mubr.msk.f32.mxu1 %vm1562_vm1, %v1561_v1 }
 0x414   : > { %1466 = vmatprep.subr.mxu1 %v1561_v1 }
 0x416   : > { %1444 = vmatmul.mubr.msk.f32.gmra.mxu1 %vm674_vm6, %v1700_v11 }
 0x417   : > { %1467 = vmatpush3.xpose.msk.msra.mxu1 %vm674_vm6, %v908_v19  ;;  %1446 = vmatprep.mubr.msk.f32.mxu1 %vm1562_vm1, %v1561_v1 }
 0x418   : > { %1468 = vmatprep.subr.mxu1 %v1561_v1 }
 0x41a   : > { %1447 = vmatmul.mubr.msk.f32.gmra.mxu1 %vm674_vm6, %v1703_v13 }
 0x41b   : > { %1469 = vmatpush3.xpose.msk.msra.mxu1 %vm674_vm6, %v906_v20  ;;  %1470 = vmatprep.mubr.msk.f32.mxu1 %vm1562_vm1, %v1561_v1 }
 0x41c   : > { %1494 = vmatprep.subr.mxu1 %v1561_v1 }
 0x41e   : > { %1471 = vmatmul.mubr.msk.f32.vlgmr.msra.gmra.mxu1 %vm674_vm6, %v900_v21 }
 0x41f   : > { %1473 = vmatprep.mubr.msk.f32.mxu1 %vm1562_vm1, %v1561_v1 }
 0x422   : > { %1474 = vmatmul.mubr.msk.f32.gmra.mxu1 %vm674_vm6, %v902_v22 }
 0x423   : > { %1476 = vmatprep.mubr.msk.f32.mxu1 %vm1562_vm1, %v1561_v1 }
 0x426   : > { %1477 = vmatmul.mubr.msk.f32.gmra.mxu1 %vm674_vm6, %v904_v23 }
 0x427   : > { %1496 = vmatprep.mubr.msk.f32.mxu1 %vm1562_vm1, %v1561_v1 }
 0x4d2   : > { %v753_v24 = vpop.f32.mrf.mxu1 }
 0x4d3   : > { %v768_v25 = vsel %vm767_vm7, %v753_v24, -inf }
 0x4d4   : > { %769 = vmax.xlane.f32.xlu0 %v768_v25  ;;  %v1442_v26 = vpop.f32.mrf.mxu1 }
 0x4d6   : > { %v758_v27 = vpop.f32.mrf.mxu1 }
 0x4d7   : > { %v771_v28 = vsel %vm767_vm7, %v758_v27, -inf }
 0x4d8   : > { %772 = vmax.xlane.f32.xlu1 %v771_v28  ;;  %v1445_v29 = vpop.f32.mrf.mxu1 }
 0x4da   : > { %v763_v30 = vpop.f32.mrf.mxu1 }
 0x4db   : > { %v774_v31 = vsel %vm767_vm7, %v763_v30, -inf }
 0x4dc   : > { %775 = vmax.xlane.f32.xlu0 %v774_v31  ;;  %v1448_v32 = vpop.f32.mrf.mxu1 }
 0x4de   : > { %v989_v33 = vpop.f32.mrf.mxu1 }
 0x4df   : > { %v1003_v34 = vsel %vm767_vm7, %v989_v33, -inf }
 0x4e0   : > { %1004 = vmax.xlane.f32.xlu0 %v1003_v34  ;;  %v1472_v35 = vpop.f32.mrf.mxu1 }
 0x4e2   : > { %v994_v36 = vpop.f32.mrf.mxu1 }
 0x4e3   : > { %v1006_v37 = vsel %vm767_vm7, %v994_v36, -inf }
 0x4e4   : > { %1007 = vmax.xlane.f32.xlu1 %v1006_v37  ;;  %v1475_v38 = vpop.f32.mrf.mxu1 }
 0x4e6   : > { %v999_v39 = vpop.f32.mrf.mxu1 }
 0x4e7   : > { %v1009_v40 = vsel %vm767_vm7, %v999_v39, -inf }
 0x4e8   : > { %1010 = vmax.xlane.f32.xlu0 %v1009_v40  ;;  %v1478_v41 = vpop.f32.mrf.mxu1 }
 0x4f5   : > { %805 = vrot.lane.b32.xlu1 %v1703_v13, %s1567_s12 }
 0x4f9   : > { %801 = vrot.lane.b32.xlu1 %v1698_v9, %s1567_s12 }
 0x4fd   : > { %1040 = vrot.lane.b32.xlu1 %v1703_v13, %s1568_s13 }
 0x4fe   : > { %803 = vrot.lane.b32.xlu0 %v1700_v11, %s1567_s12 }
 0x55d   : > { %v770_v42 = vpop.xlane.xlu0 %769 }
 0x55e   : > { %v777_v43 = vsub.f32 %v753_v24, %v770_v42 }
 0x560   : > { %v780_v44 = vmul.f32 1.442695, %v777_v43 }
 0x561   : > { %v773_v45 = vpop.xlane.xlu1 %772 }
 0x562   : > { %1529 = vpow2.f32 %v780_v44  ;;  %v778_v46 = vsub.f32 %v758_v27, %v773_v45 }
 0x564   : > { %v782_v47 = vmul.f32 1.442695, %v778_v46 }
 0x565   : > { %v776_v48 = vpop.xlane.xlu0 %775 }
 0x566   : > { %1531 = vpow2.f32 %v782_v47  ;;  %v779_v49 = vsub.f32 %v763_v30, %v776_v48 }
 0x568   : > { %v784_v50 = vmul.f32 1.442695, %v779_v49 }
 0x569   : > { %v1005_v51 = vpop.xlane.xlu0 %1004 }
 0x56a   : > { %1533 = vpow2.f32 %v784_v50  ;;  %v1012_v52 = vsub.f32 %v989_v33, %v1005_v51  ;;  %v1149_v33 = vld [vmem:[%s1822_s6] sm:$0x3] }
 0x56b   : > { %1495 = vmatpush3.msk.msra.mxu1 %vm581_vm5, %v1149_v33 }
 0x56c   : > { %v1015_v53 = vmul.f32 1.442695, %v1012_v52  ;;  %v1345_v52 = vld [vmem:[%s1823_s7] ss:$0 sm:$0xff] }
 0x56d   : > { %v1008_v54 = vpop.xlane.xlu1 %1007 }
 0x56e   : > { %1535 = vpow2.f32 %v1015_v53  ;;  %v1013_v55 = vsub.f32 %v994_v36, %v1008_v54 }
 0x56f   : > { %v1530_v56 = vpop.eup %1529 }
 0x570   : > { %v1017_v57 = vmul.f32 1.442695, %v1013_v55  ;;  %v786_v58 = vsel %vm767_vm7, %v1530_v56, 0.0 }
 0x571   : > { %v806_v59 = vpop.permute.xlu1 %805  ;;  %787 = vadd.xlane.f32.xlu1 %v786_v58  ;;  %v1011_v60 = vpop.xlane.xlu0 %1010 }
 0x572   : > { %1537 = vpow2.f32 %v1017_v57  ;;  %v1014_v61 = vsub.f32 %v999_v39, %v1011_v60  ;;  %1450 = vmatpush3.msra.mxu0 %v806_v59 }
 0x573   : > { %v1532_v62 = vpop.eup %1531  ;;  %1451 = vmatprep.subr.mxu0 %v1561_v1 }
 0x574   : > { %v1019_v63 = vmul.f32 1.442695, %v1014_v61  ;;  %v789_v0 = vsel %vm767_vm7, %v1532_v62, 0.0 }
 0x575   : > { %790 = vadd.xlane.f32.xlu0 %v789_v0  ;;  %v804_v2 = vpop.permute.xlu0 %803  ;;  %v802_v4 = vpop.permute.xlu1 %801 }
 0x576   : > { %1539 = vpow2.f32 %v1019_v63  ;;  %1452 = vmatpush3.msra.mxu0 %v804_v2 }
 0x577   : > { %v1534_v3 = vpop.eup %1533  ;;  %1453 = vmatprep.subr.mxu0 %v1561_v1 }
 0x578   : > { %1454 = vmatpush3.msra.mxu0 %v802_v4  ;;  %v792_v5 = vsel %vm767_vm7, %v1534_v3, 0.0 }
 0x579   : > { %793 = vadd.xlane.f32.xlu1 %v792_v5  ;;  %1479 = vmatprep.subr.mxu0 %v1561_v1  ;;  %v1041_v14 = vpop.permute.xlu1 %1040 }
 0x57b   : > { %v1536_v6 = vpop.eup %1535 }
 0x57c   : > { %v1021_v7 = vsel %vm767_vm7, %v1536_v6, 0.0 }
 0x57d   : > { %1022 = vadd.xlane.f32.xlu0 %v1021_v7 }
 0x57f   : > { %v1538_v8 = vpop.eup %1537 }
 0x580   : > { %v1024_v10 = vsel %vm767_vm7, %v1538_v8, 0.0 }
 0x581   : > { %1025 = vadd.xlane.f32.xlu1 %v1024_v10 }
 0x583   : > { %v1540_v12 = vpop.eup %1539 }
 0x584   : > { %v1027_v13 = vsel %vm767_vm7, %v1540_v12, 0.0 }
 0x585   : > { %1028 = vadd.xlane.f32.xlu0 %v1027_v13 }
 0x592   : > { %1036 = vrot.lane.b32.xlu1 %v1698_v9, %s1568_s13 }
 0x59b   : > { %1038 = vrot.lane.b32.xlu0 %v1700_v11, %s1568_s13 }
 0x5fa   : > { %v788_v15 = vpop.xlane.xlu1 %787 }
 0x5fb   : > { %1541 = vrcp.f32 %v788_v15 }
 0x5fe   : > { %v791_v16 = vpop.xlane.xlu0 %790 }
 0x5ff   : > { %1543 = vrcp.f32 %v791_v16 }
 0x602   : > { %v794_v17 = vpop.xlane.xlu1 %793 }
 0x603   : > { %1545 = vrcp.f32 %v794_v17 }
 0x606   : > { %v1023_v18 = vpop.xlane.xlu0 %1022 }
 0x607   : > { %1547 = vrcp.f32 %v1023_v18 }
 0x608   : > { %v1542_v19 = vpop.eup %1541 }
 0x609   : > { %v798_v20 = vmul.f32 %v1542_v19, %v1530_v56 }
 0x60a   : > { %v1026_v21 = vpop.xlane.xlu1 %1025 }
 0x60b   : > { %1549 = vrcp.f32 %v1026_v21  ;;  %1456 = vmatmul.mubr.msk.f32.vlgmr.msra.gmra.mxu0 %vm767_vm7, %v798_v20 }
 0x60c   : > { %v1544_v22 = vpop.eup %1543  ;;  %1480 = vmatpush3.msra.mxu0 %v1041_v14  ;;  %1458 = vmatprep.mubr.msk.f32.mxu0 %vm1562_vm1, %v1561_v1 }
 0x60d   : > { %v799_v9 = vmul.f32 %v1544_v22, %v1532_v62  ;;  %1481 = vmatprep.subr.mxu0 %v1561_v1 }
 0x60e   : > { %v1029_v11 = vpop.xlane.xlu0 %1028  ;;  %v1037_v28 = vpop.permute.xlu1 %1036 }
 0x60f   : > { %1551 = vrcp.f32 %v1029_v11  ;;  %1459 = vmatmul.mubr.msk.f32.gmra.mxu0 %vm767_vm7, %v799_v9 }
 0x610   : > { %v1546_v23 = vpop.eup %1545  ;;  %1461 = vmatprep.mubr.msk.f32.mxu0 %vm1562_vm1, %v1561_v1 }
 0x611   : > { %v800_v24 = vmul.f32 %v1546_v23, %v1534_v3 }
 0x612   : > { %v1039_v25 = vpop.permute.xlu0 %1038 }
 0x613   : > { %1462 = vmatmul.mubr.msk.f32.gmra.mxu0 %vm767_vm7, %v800_v24 }
 0x614   : > { %v1548_v26 = vpop.eup %1547  ;;  %1482 = vmatpush3.msra.mxu0 %v1039_v25  ;;  %1485 = vmatprep.mubr.msk.f32.mxu0 %vm1562_vm1, %v1561_v1 }
 0x615   : > { %v1033_v27 = vmul.f32 %v1548_v26, %v1536_v6  ;;  %1483 = vmatprep.subr.mxu0 %v1561_v1 }
 0x616   : > { %1484 = vmatpush3.msra.mxu0 %v1037_v28 }
 0x617   : > { %1486 = vmatmul.mubr.msk.f32.vlgmr.msra.gmra.mxu0 %vm767_vm7, %v1033_v27 }
 0x618   : > { %v1550_v29 = vpop.eup %1549  ;;  %1488 = vmatprep.mubr.msk.f32.mxu0 %vm1562_vm1, %v1561_v1 }
 0x619   : > { %v1034_v30 = vmul.f32 %v1550_v29, %v1538_v8 }
 0x61b   : > { %1489 = vmatmul.mubr.msk.f32.gmra.mxu0 %vm767_vm7, %v1034_v30 }
 0x61c   : > { %v1552_v31 = vpop.eup %1551  ;;  %1491 = vmatprep.mubr.msk.f32.mxu0 %vm1562_vm1, %v1561_v1 }
 0x61d   : > { %v1035_v32 = vmul.f32 %v1552_v31, %v1540_v12 }
 0x61f   : > { %1492 = vmatmul.mubr.msk.f32.gmra.mxu0 %vm767_vm7, %v1035_v32 }
 0x6cb   : > { %v885_v34 = vpop.f32.mrf.mxu0 }
 0x6cd   : > { %v1457_v35 = vpop.f32.mrf.mxu0 }
 0x6cf   : > { %v890_v36 = vpop.f32.mrf.mxu0 }
 0x6d1   : > { %v1460_v37 = vpop.f32.mrf.mxu0 }
 0x6d3   : > { %v895_v38 = vpop.f32.mrf.mxu0 }
 0x6d5   : > { %v1463_v39 = vpop.f32.mrf.mxu0 }
 0x6d7   : > { %v1120_v40 = vpop.f32.mrf.mxu0 }
 0x6d8   : > { %1137 = vrot.lane.b32.xlu0 %v1120_v40, %s1569_s16 }
 0x6d9   : > { %v1487_v41 = vpop.f32.mrf.mxu0 }
 0x6db   : > { %v1125_v42 = vpop.f32.mrf.mxu0 }
 0x6dc   : > { %1139 = vrot.lane.b32.xlu1 %v1125_v42, %s1569_s16 }
 0x6dd   : > { %v1490_v43 = vpop.f32.mrf.mxu0 }
 0x6df   : > { %v1130_v44 = vpop.f32.mrf.mxu0 }
 0x6e0   : > { %1141 = vrot.lane.b32.xlu0 %v1130_v44, %s1569_s16 }
 0x6e1   : > { %v1493_v45 = vpop.f32.mrf.mxu0 }
 0x74a   : > { %v1138_v46 = vpop.permute.xlu0 %1137 }
 0x74b   : > { %v1146_v47 = vsel %vm674_vm6, %v885_v34, %v1138_v46 }
 0x74c   : > { %1497 = vmatmul.mubr.msk.f32.vlgmr.msra.gmra.mxu1 %vm530_vm4, %v1146_v47 }
 0x74d   : > { %1499 = vmatprep.mubr.msk.f32.mxu1 %vm1562_vm1, %v1561_v1 }
 0x74e   : > { %v1140_v48 = vpop.permute.xlu1 %1139 }
 0x74f   : > { %v1147_v49 = vsel %vm674_vm6, %v890_v36, %v1140_v48 }
 0x750   : > { %1500 = vmatmul.mubr.msk.f32.gmra.mxu1 %vm530_vm4, %v1147_v49 }
 0x751   : > { %1502 = vmatprep.mubr.msk.f32.mxu1 %vm1562_vm1, %v1561_v1 }
 0x752   : > { %v1142_v50 = vpop.permute.xlu0 %1141 }
 0x753   : > { %v1148_v51 = vsel %vm674_vm6, %v895_v38, %v1142_v50 }
 0x754   : > { %1503 = vmatmul.mubr.msk.f32.gmra.mxu1 %vm530_vm4, %v1148_v51 }
 0x80c   : > { %v1235_v53 = vpop.f32.mrf.mxu1 }
 0x80d   : > { %v1236_v54 = vadd.f32 %v1345_v52, %v1235_v53 }
 0x80e   : > { %v1498_v55 = vpop.f32.mrf.mxu1 }
 0x80f   : > { %1249 = vst.msk [vmem:[%s305_s21] sm:$0xff] %vm530_vm4, %v1236_v54 }
 0x810   : > { %v1240_v1 = vpop.f32.mrf.mxu1 }
 0x811   : > { %v1241_v56 = vadd.f32 %v1345_v52, %v1240_v1 }
 0x812   : > { %v1501_v57 = vpop.f32.mrf.mxu1 }
 0x813   : > { %1250 = vst.msk [vmem:[%s305_s21 + $0x8] sm:$0xff] %vm530_vm4, %v1241_v56 }
 0x814   : > { %v1245_v58 = vpop.f32.mrf.mxu1 }
 0x815   : > { %v1246_v59 = vadd.f32 %v1345_v52, %v1245_v58 }
 0x816   : > { %v1504_v60 = vpop.f32.mrf.mxu1 }
 0x817   : > { %1251 = vst.msk [vmem:[%s305_s21 + $0x10] sm:$0xff] %vm530_vm4, %v1246_v59 }
 0x818 PF: > { %s18_s27 = sadd.s32 1, %s1559_s27  }
 0x819   : > { %p15_p4 = scmp.ge.s32.totalorder %s18_s27, 4  }
 0x81b   :  { %17 = sbr.rel (!%p15_p4) target bundleno = 1 (0x1), region = 82 }

// kernel: _lambda_.8
= control target key start
LH: loop header
LB: loop body
LE: loop exit
PB: predicated region body
PF: predicated region fallthrough
CT: control target
= control target key end

     0   :  { %v1099_v0 = vmov 0.0   ;;  %vm1100_vm0 = vmmov 0   ;;  %vm88_vm1 = vcmask 523264   ;;  %vm169_vm2 = vcmask 261120   ;;  %s1442_s2 = inlined_call_operand.vmem [shape: f32[64,64], index: 2, kind: input, shape index: {}]   ;;  %s1443_s4 = inlined_call_operand.vmem [shape: f32[32,32], index: 4, kind: input, shape index: {}]   ;;  %s1444_s0 = inlined_call_operand.vmem [shape: f32[6,64], index: 0, kind: input, shape index: {}]   ;;  %s1445_s3 = inlined_call_operand.vmem [shape: f32[1,64], index: 3, kind: input, shape index: {}]   ;;  %s1446_s5 = inlined_call_operand.vmem [shape: f32[1,32], index: 5, kind: input, shape index: {}]   ;;  %s1447_s6 = inlined_call_operand.vmem [shape: f32[32,64], index: 6, kind: input, shape index: {}]   ;;  %s1448_s8 = inlined_call_operand.vmem [shape: f32[32,32], index: 8, kind: input, shape index: {}]   ;;  %s1449_s7 = inlined_call_operand.vmem [shape: f32[1,64], index: 7, kind: input, shape index: {}]   ;;  %s1450_s9 = inlined_call_operand.vmem [shape: f32[1,32], index: 9, kind: input, shape index: {}]   ;;  %s1451_s10 = inlined_call_operand.vmem [shape: f32[32,64], index: 10, kind: input, shape index: {}]   ;;  %s1452_s12 = inlined_call_operand.vmem [shape: f32[32,32], index: 12, kind: input, shape index: {}]   ;;  %s1453_s11 = inlined_call_operand.vmem [shape: f32[1,64], index: 11, kind: input, shape index: {}]   ;;  %s1454_s13 = inlined_call_operand.vmem [shape: f32[1,32], index: 13, kind: input, shape index: {}]   ;;  %s1455_s14 = inlined_call_operand.vmem [shape: f32[32,40], index: 14, kind: input, shape index: {}]   ;;  %s1456_s16 = inlined_call_operand.vmem [shape: f32[32,8], index: 16, kind: input, shape index: {}]   ;;  %s1457_s15 = inlined_call_operand.vmem [shape: f32[1,40], index: 15, kind: input, shape index: {}]   ;;  %s1458_s18 = inlined_call_operand.vmem [shape: f32[16,8], index: 18, kind: input, shape index: {}]   ;;  %s1459_s1 = inlined_call_operand.vmem [shape: f32[6,16], index: 1, kind: input, shape index: {}]   ;;  %s1460_s17 = inlined_call_operand.vmem [shape: f32[1,8], index: 17, kind: input, shape index: {}]   ;;  %s1461_s19 = inlined_call_operand.vmem [shape: f32[1,8], index: 19, kind: input, shape index: {}]   ;;  %s1462_s21 = inlined_call_operand.vmem [shape: f32[6,8], index: 21, kind: output, shape index: {1}]   ;;  %s1463_s20 = inlined_call_operand.vmem [shape: f32[6,8], index: 20, kind: output, shape index: {0}]  }
   0x1   :  { %1467 = sst [smem:[#allocation2_spill]] %s1442_s2  ;;  %985 = vmatprep.subr.mxu0 %v1099_v0  ;;  %1001 = vmatprep.mubr.msk.f32.mxu0 %vm1100_vm0, %v1099_v0  ;;  %vm248_vm3 = vcmask 259072   ;;  %v271_v35 = vld [vmem:[%s1448_s8 + $0x18] sm:$0xff]  ;;  %v270_v41 = vld [vmem:[%s1448_s8 + $0x10] sm:$0xff]  ;;  %v269_v42 = vld [vmem:[%s1448_s8 + $0x8] sm:$0xff]  ;;  %vm837_vm4 = vcmask 130048  }
   0x2   :  { %1468 = sst [smem:[#allocation3_spill]] %s1443_s4  ;;  %1004 = vmatprep.subr.mxu1 %v1099_v0  ;;  %1012 = vmatprep.mubr.msk.f32.mxu1 %vm1100_vm0, %v1099_v0  ;;  %v268_v43 = vld [vmem:[%s1448_s8] sm:$0xff]  ;;  %v453_v61 = vld [vmem:[%s1451_s10 + $0x18] sm:$0xff]  ;;  %v452_v62 = vld [vmem:[%s1451_s10 + $0x10] sm:$0xff]  ;;  %vm811_vm5 = vcmask 62464  }
   0x3   :  { %1469 = sst [smem:[#allocation4_spill]] %s1444_s0  ;;  %v924_v44 = vld [vmem:[%s1449_s7] ss:$0 sm:$0xff]  ;;  %v451_v63 = vld [vmem:[%s1451_s10 + $0x8] sm:$0xff] }
   0x4   :  { %1470 = sst [smem:[#allocation5_spill]] %s1445_s3  ;;  %s1101_s3 = smov 96   ;;  %v926_v49 = vld [vmem:[%s1450_s9] ss:$0 sm:$0xff] }
   0x5   :  { %1471 = sst [smem:[#allocation6_spill]] %s1446_s5 }
   0x6   :  { %1472 = sst [smem:[#allocation7_spill]] %s1447_s6 }
   0x7   :  { %s1473_s26 = sld [smem:[#allocation2_spill]] }
   0x8   :  { %s1474_s30 = sld [smem:[#allocation3_spill]] }
   0x9   :  { %s1475_s5 = sld [smem:[#allocation4_spill]] }
   0xa   :  { %s1476_s27 = sld [smem:[#allocation5_spill]] }
   0xb   :  { %s1477_s29 = sld [smem:[#allocation6_spill]] }
   0xc   :  { %s1478_s6 = sld [smem:[#allocation7_spill]] }
   0xd   :  { %v75_v1 = vld [vmem:[%s1473_s26 + $0x38] sm:$0xff]  ;;  %v74_v2 = vld [vmem:[%s1473_s26 + $0x30] sm:$0xff]  ;;  %v73_v3 = vld [vmem:[%s1473_s26 + $0x28] sm:$0xff] }
   0xe   :  { %986 = vmatpush3.msra.mxu0 %v75_v1  ;;  %v80_v4 = vld [vmem:[%s1474_s30 + $0x18] sm:$0xff]  ;;  %v72_v5 = vld [vmem:[%s1473_s26 + $0x20] sm:$0xff]  ;;  %v70_v7 = vld [vmem:[%s1473_s26 + $0x10] sm:$0xff] }
   0xf   :  { %987 = vmatprep.subr.mxu0 %v1099_v0  ;;  %1005 = vmatpush3.msra.mxu1 %v80_v4  ;;  %v71_v6 = vld [vmem:[%s1473_s26 + $0x18] sm:$0xff]  ;;  %v69_v8 = vld [vmem:[%s1473_s26 + $0x8] sm:$0xff]  ;;  %v68_v9 = vld [vmem:[%s1473_s26] sm:$0xff] }
  0x10   :  { %988 = vmatpush3.msra.mxu0 %v74_v2  ;;  %1006 = vmatprep.subr.mxu1 %v1099_v0  ;;  %v67_v10 = vld [vmem:[%s1475_s5] sm:$0x3f]  ;;  %v79_v11 = vld [vmem:[%s1474_s30 + $0x10] sm:$0xff]  ;;  %v78_v12 = vld [vmem:[%s1474_s30 + $0x8] sm:$0xff] }
  0x11   :  { %989 = vmatprep.subr.mxu0 %v1099_v0  ;;  %1007 = vmatpush3.msra.mxu1 %v79_v11  ;;  %v77_v13 = vld [vmem:[%s1474_s30] sm:$0xff]  ;;  %v458_v2 = vld [vmem:[%s1452_s12 + $0x18] sm:$0xff] }
  0x12   :  { %990 = vmatpush3.msra.mxu0 %v73_v3  ;;  %1008 = vmatprep.subr.mxu1 %v1099_v0  ;;  %v920_v14 = vld [vmem:[%s1476_s27] ss:$0 sm:$0xff]  ;;  %v266_v31 = vld [vmem:[%s1478_s6 + $0x18] sm:$0xff]  ;;  %v265_v32 = vld [vmem:[%s1478_s6 + $0x10] sm:$0xff] }
  0x13   :  { %991 = vmatprep.subr.mxu0 %v1099_v0  ;;  %1009 = vmatpush3.msra.mxu1 %v78_v12  ;;  %v922_v19 = vld [vmem:[%s1477_s29] ss:$0 sm:$0xff]  ;;  %v264_v33 = vld [vmem:[%s1478_s6 + $0x8] sm:$0xff] }
  0x14   :  { %992 = vmatpush3.msra.mxu0 %v72_v5  ;;  %1010 = vmatprep.subr.mxu1 %v1099_v0  ;;  %v263_v34 = vld [vmem:[%s1478_s6] sm:$0xff] }
  0x15   :  { %993 = vmatprep.subr.mxu0 %v1099_v0  ;;  %1011 = vmatpush3.msra.mxu1 %v77_v13  ;;  %v450_v1 = vld [vmem:[%s1451_s10] sm:$0xff] }
  0x16   :  { %994 = vmatpush3.msra.mxu0 %v71_v6  ;;  %1015 = vmatprep.subr.mxu1 %v1099_v0  ;;  %v928_v11 = vld [vmem:[%s1453_s11] ss:$0 sm:$0xff] }
  0x17   :  { %995 = vmatprep.subr.mxu0 %v1099_v0 }
  0x18   :  { %996 = vmatpush3.msra.mxu0 %v70_v7 }
  0x19   :  { %997 = vmatprep.subr.mxu0 %v1099_v0 }
  0x1a   :  { %998 = vmatpush3.msra.mxu0 %v69_v8  ;;  %v457_v8 = vld [vmem:[%s1452_s12 + $0x10] sm:$0xff] }
  0x1b   :  { %999 = vmatprep.subr.mxu0 %v1099_v0 }
  0x1c   :  { %1000 = vmatpush3.msra.mxu0 %v68_v9  ;;  %v456_v9 = vld [vmem:[%s1452_s12 + $0x8] sm:$0xff] }
  0x1d   :  { %1002 = vmatmul.mubr.msk.f32.vlgmr.msra.gmra.mxu0 %vm88_vm1, %v67_v10  ;;  %1026 = vmatprep.subr.mxu0 %v1099_v0  ;;  %v455_v10 = vld [vmem:[%s1452_s12] sm:$0xff] }
  0x1e   :  { %1034 = vmatprep.mubr.msk.f32.mxu0 %vm1100_vm0, %v1099_v0  ;;  %1027 = vmatpush3.msra.mxu0 %v271_v35 }
  0x1f   :  { %1028 = vmatprep.subr.mxu0 %v1099_v0 }
  0x20   :  { %1029 = vmatpush3.msra.mxu0 %v270_v41  ;;  %v932_v41 = vld [vmem:[%s1457_s15] ss:$0 sm:$0xff] }
  0x21   :  { %1030 = vmatprep.subr.mxu0 %v1099_v0 }
  0x22   :  { %1031 = vmatpush3.msra.mxu0 %v269_v42 }
  0x23   :  { %1032 = vmatprep.subr.mxu0 %v1099_v0 }
  0x24   :  { %1033 = vmatpush3.msra.mxu0 %v268_v43 }
  0x25   :  { %1048 = vmatprep.subr.mxu0 %v1099_v0 }
  0xdd   :  { %v158_v15 = vpop.f32.mrf.mxu0 }
  0xde   :  { %v159_v16 = vadd.f32 %v920_v14, %v158_v15 }
  0xdf   :  { %v1003_v17 = vpop.f32.mrf.mxu0 }
  0xe0   :  { %v162_v18 = vmax.f32 %v159_v16, 0.0  ;;  %244 = vrot.lane.b32.xlu0 %v159_v16, %s1101_s3  ;;  %v930_v16 = vld [vmem:[%s1454_s13] ss:$0 sm:$0xff] }
  0xe2   :  { %1013 = vmatmul.mubr.msk.f32.vlgmr.msra.gmra.mxu1 %vm169_vm2, %v162_v18 }
  0xe3   :  { %1023 = vmatprep.mubr.msk.f32.mxu1 %vm1100_vm0, %v1099_v0  ;;  %1016 = vmatpush3.msra.mxu1 %v266_v31  ;;  %v637_v31 = vld [vmem:[%s1455_s14] sm:$0xff] }
  0xe4   :  { %1017 = vmatprep.subr.mxu1 %v1099_v0 }
  0xe5   :  { %1018 = vmatpush3.msra.mxu1 %v265_v32  ;;  %v645_v32 = vld [vmem:[%s1456_s16 + $0x18] sm:$0xff] }
  0xe6   :  { %1019 = vmatprep.subr.mxu1 %v1099_v0 }
  0xe7   :  { %1020 = vmatpush3.msra.mxu1 %v264_v33 }
  0xe8   :  { %1021 = vmatprep.subr.mxu1 %v1099_v0 }
  0xe9   :  { %1022 = vmatpush3.msra.mxu1 %v263_v34 }
  0xea   :  { %1037 = vmatprep.subr.mxu1 %v1099_v0 }
 0x152   :  { %v245_v22 = vpop.permute.xlu0 %244 }
 0x1a2   :  { %v239_v20 = vpop.f32.mrf.mxu1 }
 0x1a3   :  { %v240_v21 = vadd.f32 %v922_v19, %v239_v20 }
 0x1a4   :  { %v1014_v23 = vpop.f32.mrf.mxu1 }
 0x1a5   :  { %v247_v24 = vadd.f32 %v245_v22, %v240_v21 }
 0x1a7   :  { %v249_v25 = vsel %vm248_vm3, %v247_v24, 0.0 }
 0x1a8   :  { %250 = vadd.xlane.f32.xlu0 %v249_v25 }
 0x231   :  { %v251_v26 = vpop.xlane.xlu0 %250 }
 0x232   :  { %v253_v27 = vmul.f32 0.03125, %v251_v26 }
 0x234   :  { %v254_v28 = vsub.f32 %v247_v24, %v253_v27 }
 0x236   :  { %v255_v29 = vmul.f32 %v254_v28, %v254_v28 }
 0x238   :  { %v256_v30 = vsel %vm248_vm3, %v255_v29, 0.0  ;;  %v639_v29 = vld [vmem:[%s1455_s14 + $0x10] sm:$0xff] }
 0x239   :  { %257 = vadd.xlane.f32.xlu1 %v256_v30  ;;  %v638_v30 = vld [vmem:[%s1455_s14 + $0x8] sm:$0xff] }
 0x2c2   :  { %v258_v36 = vpop.xlane.xlu1 %257 }
 0x2c3   :  { %v259_v37 = vmul.f32 0.03125, %v258_v36 }
 0x2c5   :  { %v260_v38 = vadd.f32 1e-05, %v259_v37 }
 0x2c7   :  { %1091 = vrsqrt.f32 %v260_v38  ;;  %v644_v38 = vld [vmem:[%s1456_s16 + $0x10] sm:$0xff] }
 0x2d4   :  { %v1092_v39 = vpop.eup %1091 }
 0x2d5   :  { %v262_v40 = vmul.f32 %v1092_v39, %v254_v28  ;;  %v640_v28 = vld [vmem:[%s1455_s14 + $0x18] sm:$0xff]  ;;  %v643_v39 = vld [vmem:[%s1456_s16 + $0x8] sm:$0xff] }
 0x2d7   :  { %1024 = vmatmul.mubr.msk.f32.vlgmr.msra.gmra.mxu1 %vm169_vm2, %v262_v40  ;;  %v642_v40 = vld [vmem:[%s1456_s16] sm:$0xff] }
 0x2d8   :  { %1045 = vmatprep.mubr.msk.f32.mxu1 %vm1100_vm0, %v1099_v0  ;;  %1038 = vmatpush3.msra.mxu1 %v453_v61  ;;  %v936_v61 = vld [vmem:[%s1461_s19] ss:$0 sm:$0xff] }
 0x2d9   :  { %1039 = vmatprep.subr.mxu1 %v1099_v0 }
 0x2da   :  { %1040 = vmatpush3.msra.mxu1 %v452_v62 }
 0x2db   :  { %1041 = vmatprep.subr.mxu1 %v1099_v0 }
 0x2dc   :  { %1042 = vmatpush3.msra.mxu1 %v451_v63 }
 0x2dd   :  { %1043 = vmatprep.subr.mxu1 %v1099_v0 }
 0x2de   :  { %1044 = vmatpush3.msra.mxu1 %v450_v1 }
 0x2df   :  { %1059 = vmatprep.subr.mxu1 %v1099_v0 }
 0x397   :  { %v348_v45 = vpop.f32.mrf.mxu1 }
 0x398   :  { %v349_v46 = vadd.f32 %v924_v44, %v348_v45 }
 0x399   :  { %v1025_v47 = vpop.f32.mrf.mxu1 }
 0x39a   :  { %v352_v48 = vmax.f32 %v349_v46, 0.0  ;;  %433 = vrot.lane.b32.xlu1 %v349_v46, %s1101_s3  ;;  %v829_v46 = vld [vmem:[%s1458_s18 + $0x8] sm:$0xff]  ;;  %v828_v47 = vld [vmem:[%s1458_s18] sm:$0xff] }
 0x39c   :  { %1035 = vmatmul.mubr.msk.f32.vlgmr.msra.gmra.mxu0 %vm169_vm2, %v352_v48  ;;  %v827_v48 = vld [vmem:[%s1459_s1] sm:$0x3f] }
 0x39d   :  { %1056 = vmatprep.mubr.msk.f32.mxu0 %vm1100_vm0, %v1099_v0  ;;  %1049 = vmatpush3.msra.mxu0 %v458_v2 }
 0x39e   :  { %1050 = vmatprep.subr.mxu0 %v1099_v0 }
 0x39f   :  { %1051 = vmatpush3.msra.mxu0 %v457_v8 }
 0x3a0   :  { %1052 = vmatprep.subr.mxu0 %v1099_v0 }
 0x3a1   :  { %1053 = vmatpush3.msra.mxu0 %v456_v9 }
 0x3a2   :  { %1054 = vmatprep.subr.mxu0 %v1099_v0 }
 0x3a3   :  { %1055 = vmatpush3.msra.mxu0 %v455_v10 }
 0x3a4   :  { %1070 = vmatprep.subr.mxu0 %v1099_v0 }
 0x40c   :  { %v434_v52 = vpop.permute.xlu1 %433 }
 0x45c   :  { %v428_v50 = vpop.f32.mrf.mxu0 }
 0x45d   :  { %v429_v51 = vadd.f32 %v926_v49, %v428_v50  ;;  %v934_v49 = vld [vmem:[%s1460_s17] ss:$0 sm:$0xff] }
 0x45e   :  { %v1036_v53 = vpop.f32.mrf.mxu0 }
 0x45f   :  { %v436_v54 = vadd.f32 %v434_v52, %v429_v51 }
 0x461   :  { %v437_v55 = vsel %vm248_vm3, %v436_v54, 0.0 }
 0x462   :  { %438 = vadd.xlane.f32.xlu1 %v437_v55 }
 0x4eb   :  { %v439_v56 = vpop.xlane.xlu1 %438 }
 0x4ec   :  { %v440_v57 = vmul.f32 0.03125, %v439_v56 }
 0x4ee   :  { %v441_v58 = vsub.f32 %v436_v54, %v440_v57 }
 0x4f0   :  { %v442_v59 = vmul.f32 %v441_v58, %v441_v58 }
 0x4f2   :  { %v443_v60 = vsel %vm248_vm3, %v442_v59, 0.0 }
 0x4f3   :  { %444 = vadd.xlane.f32.xlu0 %v443_v60 }
 0x57c   :  { %v445_v3 = vpop.xlane.xlu0 %444 }
 0x57d   :  { %v446_v4 = vmul.f32 0.03125, %v445_v3 }
 0x57f   :  { %v447_v5 = vadd.f32 1e-05, %v446_v4 }
 0x581   :  { %1093 = vrsqrt.f32 %v447_v5 }
 0x58e   :  { %v1094_v6 = vpop.eup %1093 }
 0x58f   :  { %v449_v7 = vmul.f32 %v1094_v6, %v441_v58 }
 0x591   :  { %1046 = vmatmul.mubr.msk.f32.vlgmr.msra.gmra.mxu1 %vm169_vm2, %v449_v7 }
 0x592   :  { %1067 = vmatprep.mubr.msk.f32.mxu1 %vm1100_vm0, %v1099_v0  ;;  %1060 = vmatpush3.msra.mxu1 %v640_v28 }
 0x593   :  { %1061 = vmatprep.subr.mxu1 %v1099_v0 }
 0x594   :  { %1062 = vmatpush3.msra.mxu1 %v639_v29 }
 0x595   :  { %1063 = vmatprep.subr.mxu1 %v1099_v0 }
 0x596   :  { %1064 = vmatpush3.msra.mxu1 %v638_v30 }
 0x597   :  { %1065 = vmatprep.subr.mxu1 %v1099_v0 }
 0x598   :  { %1066 = vmatpush3.msra.mxu1 %v637_v31 }
 0x599   :  { %1081 = vmatprep.subr.mxu1 %v1099_v0 }
 0x651   :  { %v535_v12 = vpop.f32.mrf.mxu1 }
 0x652   :  { %v536_v13 = vadd.f32 %v928_v11, %v535_v12 }
 0x653   :  { %v1047_v14 = vpop.f32.mrf.mxu1 }
 0x654   :  { %v539_v15 = vmax.f32 %v536_v13, 0.0  ;;  %620 = vrot.lane.b32.xlu0 %v536_v13, %s1101_s3 }
 0x656   :  { %1057 = vmatmul.mubr.msk.f32.vlgmr.msra.gmra.mxu0 %vm169_vm2, %v539_v15 }
 0x657   :  { %1078 = vmatprep.mubr.msk.f32.mxu0 %vm1100_vm0, %v1099_v0  ;;  %1071 = vmatpush3.msra.mxu0 %v645_v32 }
 0x658   :  { %1072 = vmatprep.subr.mxu0 %v1099_v0 }
 0x659   :  { %1073 = vmatpush3.msra.mxu0 %v644_v38 }
 0x65a   :  { %1074 = vmatprep.subr.mxu0 %v1099_v0 }
 0x65b   :  { %1075 = vmatpush3.msra.mxu0 %v643_v39 }
 0x65c   :  { %1076 = vmatprep.subr.mxu0 %v1099_v0 }
 0x65d   :  { %1077 = vmatpush3.msra.mxu0 %v642_v40 }
 0x6c6   :  { %v621_v19 = vpop.permute.xlu0 %620 }
 0x716   :  { %v615_v17 = vpop.f32.mrf.mxu0 }
 0x717   :  { %v616_v18 = vadd.f32 %v930_v16, %v615_v17 }
 0x718   :  { %v1058_v20 = vpop.f32.mrf.mxu0 }
 0x719   :  { %v623_v21 = vadd.f32 %v621_v19, %v616_v18 }
 0x71b   :  { %v624_v22 = vsel %vm248_vm3, %v623_v21, 0.0 }
 0x71c   :  { %625 = vadd.xlane.f32.xlu1 %v624_v22 }
 0x7a5   :  { %v626_v23 = vpop.xlane.xlu1 %625 }
 0x7a6   :  { %v627_v24 = vmul.f32 0.03125, %v626_v23 }
 0x7a8   :  { %v628_v25 = vsub.f32 %v623_v21, %v627_v24 }
 0x7aa   :  { %v629_v26 = vmul.f32 %v628_v25, %v628_v25 }
 0x7ac   :  { %v630_v27 = vsel %vm248_vm3, %v629_v26, 0.0 }
 0x7ad   :  { %631 = vadd.xlane.f32.xlu0 %v630_v27 }
 0x836   :  { %v632_v33 = vpop.xlane.xlu0 %631 }
 0x837   :  { %v633_v34 = vmul.f32 0.03125, %v632_v33 }
 0x839   :  { %v634_v35 = vadd.f32 1e-05, %v633_v34 }
 0x83b   :  { %1095 = vrsqrt.f32 %v634_v35 }
 0x848   :  { %v1096_v36 = vpop.eup %1095 }
 0x849   :  { %v636_v37 = vmul.f32 %v1096_v36, %v628_v25 }
 0x84b   :  { %1068 = vmatmul.mubr.msk.f32.vlgmr.msra.gmra.mxu1 %vm169_vm2, %v636_v37 }
 0x84c   :  { %1085 = vmatprep.mubr.msk.f32.mxu1 %vm1100_vm0, %v1099_v0  ;;  %1082 = vmatpush3.msra.mxu1 %v829_v46 }
 0x84d   :  { %1083 = vmatprep.subr.mxu1 %v1099_v0 }
 0x84e   :  { %1084 = vmatpush3.msra.mxu1 %v828_v47 }
 0x84f   :  { %1086 = vmatmul.mubr.msk.f32.vlgmr.msra.gmra.mxu1 %vm837_vm4, %v827_v48 }
 0x90b   :  { %v722_v42 = vpop.f32.mrf.mxu1 }
 0x90c   :  { %v723_v43 = vadd.f32 %v932_v41, %v722_v42 }
 0x90d   :  { %v1069_v44 = vpop.f32.mrf.mxu1 }
 0x90e   :  { %v726_v45 = vmax.f32 %v723_v43, 0.0  ;;  %807 = vrot.lane.b32.xlu1 %v723_v43, %s1101_s3 }
 0x90f   :  { %v907_v60 = vpop.f32.mrf.mxu1 }
 0x910   :  { %1079 = vmatmul.mubr.msk.f32.vlgmr.msra.gmra.mxu0 %vm169_vm2, %v726_v45  ;;  %v908_v63 = vadd.f32 %v936_v61, %v907_v60 }
 0x911   :  { %v1087_v62 = vpop.f32.mrf.mxu1 }
 0x912   :  { %911 = vst.msk [vmem:[%s1462_s21] sm:$0x3f] %vm811_vm5, %v908_v63 }
 0x980   :  { %v808_v52 = vpop.permute.xlu1 %807 }
 0x9d0   :  { %v802_v50 = vpop.f32.mrf.mxu0 }
 0x9d1   :  { %v803_v51 = vadd.f32 %v934_v49, %v802_v50 }
 0x9d2   :  { %v1080_v53 = vpop.f32.mrf.mxu0 }
 0x9d3   :  { %v810_v54 = vadd.f32 %v808_v52, %v803_v51 }
 0x9d5   :  { %v812_v55 = vsel %vm811_vm5, %v810_v54, 0.0 }
 0x9d6   :  { %813 = vadd.xlane.f32.xlu1 %v812_v55 }
 0xa5f   :  { %v814_v56 = vpop.xlane.xlu1 %813 }
 0xa60   :  { %v816_v57 = vmul.f32 0.125, %v814_v56 }
 0xa62   :  { %v817_v58 = vsub.f32 %v810_v54, %v816_v57 }
 0xa64   :  { %v818_v59 = vmul.f32 %v817_v58, %v817_v58 }
 0xa66   :  { %v819_v0 = vsel %vm811_vm5, %v818_v59, 0.0 }
 0xa67   :  { %820 = vadd.xlane.f32.xlu0 %v819_v0 }
 0xaf0   :  { %v821_v1 = vpop.xlane.xlu0 %820 }
 0xaf1   :  { %v822_v2 = vmul.f32 0.125, %v821_v1 }
 0xaf3   :  { %v823_v3 = vadd.f32 1e-05, %v822_v2 }
 0xaf5   :  { %1097 = vrsqrt.f32 %v823_v3 }
 0xb02   :  { %v1098_v4 = vpop.eup %1097 }
 0xb03   :  { %v825_v5 = vmul.f32 %v1098_v4, %v817_v58 }
 0xb05   :  { %826 = vst.msk [vmem:[%s1463_s20] sm:$0x3f] %vm811_vm5, %v825_v5 }

// kernel: _lambda_.9
= control target key start
LH: loop header
LB: loop body
LE: loop exit
PB: predicated region body
PF: predicated region fallthrough
CT: control target
= control target key end

     0   :  { %vm60_vm0 = vcmask 1042432   ;;  %vm41_vm1 = vcmask 23552   ;;  %s441_s17 = smov 96   ;;  %vm171_vm2 = vcmask 261120   ;;  %vm357_vm3 = vcmask 7168   ;;  %s541_s1 = inlined_call_operand.vmem [shape: f32[3,33], index: 1, kind: input, shape index: {}]   ;;  %s542_s0 = inlined_call_operand.vmem [shape: f32[48,3], index: 0, kind: input, shape index: {}]   ;;  %s543_s3 = inlined_call_operand.vmem [shape: f32[32,1], index: 3, kind: input, shape index: {}]   ;;  %s544_s2 = inlined_call_operand.vmem [shape: f32[1,33], index: 2, kind: input, shape index: {}]   ;;  %s545_s4 = inlined_call_operand.<no memory space> [shape: f32[1,1], index: 4, kind: input, shape index: {}]   ;;  %s546_s5 = inlined_call_operand.vmem [shape: f32[48,1], index: 5, kind: output, shape index: {}]  }
   0x1   :  { %v28_v0 = vld [vmem:[%s541_s1] sm:$0x7]  ;;  %v23_v2 = vld [vmem:[%s542_s0 + $0x8] sm:$0xff]  ;;  %v24_v3 = vld [vmem:[%s542_s0 + $0x10] sm:$0xff]  ;;  %v10_v15 = vstv %s545_s4 }
   0x2   :  { %v22_v1 = vld [vmem:[%s542_s0] sm:$0xff]  ;;  %400 = vmatprep.subr.msk.mxu0 %vm60_vm0, %v28_v0  ;;  %v25_v4 = vld [vmem:[%s542_s0 + $0x18] sm:$0xff]  ;;  %v27_v6 = vld [vmem:[%s542_s0 + $0x28] sm:$0xff]  ;;  %11 = vst [vmem:[#allocation2] sm:$0x1] %v10_v15 }
   0x3   :  { %402 = vmatprep.mubr.msk.f32.mxu0 %vm41_vm1, %v22_v1  ;;  %401 = vmatpush3.msk.msra.mxu0 %vm60_vm0, %v28_v0  ;;  %v26_v5 = vld [vmem:[%s542_s0 + $0x20] sm:$0xff]  ;;  %v33_v7 = vld [vmem:[%s543_s3 + $0x18] sm:$0xff]  ;;  %v32_v8 = vld [vmem:[%s543_s3 + $0x10] sm:$0xff] }
   0x4   :  { %403 = vmatmul.mubr.msk.f32.vlgmr.msra.gmra.mxu0 %vm41_vm1, %v23_v2  ;;  %411 = vmatprep.subr.mxu1 %v33_v7  ;;  %v31_v9 = vld [vmem:[%s543_s3 + $0x8] sm:$0xff]  ;;  %v30_v10 = vld [vmem:[%s543_s3] sm:$0xff] }
   0x5   :  { %405 = vmatprep.mubr.msk.f32.mxu0 %vm41_vm1, %v24_v3  ;;  %412 = vmatpush3.msra.mxu1 %v33_v7  ;;  %v368_v11 = vld [vmem:[%s544_s2] ss:$0 sm:$0xff] }
   0x6   :  { %413 = vmatprep.subr.mxu1 %v32_v8 }
   0x7   :  { %414 = vmatpush3.msra.mxu1 %v32_v8 }
   0x8   :  { %406 = vmatmul.mubr.msk.f32.gmra.mxu0 %vm41_vm1, %v25_v4  ;;  %415 = vmatprep.subr.mxu1 %v31_v9 }
   0x9   :  { %408 = vmatprep.mubr.msk.f32.mxu0 %vm41_vm1, %v26_v5  ;;  %416 = vmatpush3.msra.mxu1 %v31_v9  ;;  %v376_v32 = vld [vmem:[#allocation2] ss:$0 sm:$0xff] }
   0xa   :  { %417 = vmatprep.subr.mxu1 %v30_v10 }
   0xb   :  { %418 = vmatpush3.msra.mxu1 %v30_v10 }
   0xc   :  { %409 = vmatmul.mubr.msk.f32.gmra.mxu0 %vm41_vm1, %v27_v6 }
  0xc4   :  { %v404_v12 = vpop.f32.mrf.mxu0 }
  0xc5   :  { %v136_v13 = vadd.f32 %v404_v12, %v368_v11 }
  0xc6   :  { %v130_v14 = vpop.f32.mrf.mxu0 }
  0xc7   :  { %v131_v16 = vadd.f32 %v368_v11, %v130_v14  ;;  %293 = vrot.lane.b32.xlu0 %v136_v13, %s441_s17  ;;  %v160_v21 = vmax.f32 %v136_v13, 0.0 }
  0xc8   :  { %v407_v17 = vpop.f32.mrf.mxu0 }
  0xc9   :  { %v146_v18 = vadd.f32 %v407_v17, %v368_v11  ;;  %v159_v19 = vmax.f32 %v131_v16, 0.0 }
  0xca   :  { %v140_v20 = vpop.f32.mrf.mxu0 }
  0xcb   :  { %v141_v22 = vadd.f32 %v368_v11, %v140_v20  ;;  %297 = vrot.lane.b32.xlu1 %v146_v18, %s441_s17  ;;  %291 = vrot.lane.b32.xlu0 %v131_v16, %s441_s17  ;;  %v162_v26 = vmax.f32 %v146_v18, 0.0 }
  0xcc   :  { %419 = vmatprep.mubr.msk.f32.mxu1 %vm171_vm2, %v159_v19  ;;  %v410_v23 = vpop.f32.mrf.mxu0 }
  0xcd   :  { %v161_v24 = vmax.f32 %v141_v22, 0.0  ;;  %420 = vmatmul.mubr.msk.f32.vlgmr.msra.gmra.mxu1 %vm171_vm2, %v160_v21  ;;  %v156_v27 = vadd.f32 %v410_v23, %v368_v11 }
  0xce   :  { %v150_v25 = vpop.f32.mrf.mxu0 }
  0xcf   :  { %v151_v28 = vadd.f32 %v368_v11, %v150_v25  ;;  %295 = vrot.lane.b32.xlu1 %v141_v22, %s441_s17  ;;  %422 = vmatprep.mubr.msk.f32.mxu1 %vm171_vm2, %v161_v24  ;;  %v164_v30 = vmax.f32 %v156_v27, 0.0 }
  0xd1   :  { %v163_v29 = vmax.f32 %v151_v28, 0.0  ;;  %423 = vmatmul.mubr.msk.f32.gmra.mxu1 %vm171_vm2, %v162_v26  ;;  %299 = vrot.lane.b32.xlu0 %v151_v28, %s441_s17 }
  0xd3   :  { %301 = vrot.lane.b32.xlu1 %v156_v27, %s441_s17  ;;  %425 = vmatprep.mubr.msk.f32.mxu1 %vm171_vm2, %v163_v29 }
  0xd5   :  { %426 = vmatmul.mubr.msk.f32.gmra.mxu1 %vm171_vm2, %v164_v30 }
 0x139   :  { %v294_v31 = vpop.permute.xlu0 %293 }
 0x13d   :  { %v298_v33 = vpop.permute.xlu1 %297  ;;  %v292_v39 = vpop.permute.xlu0 %291 }
 0x141   :  { %v296_v41 = vpop.permute.xlu1 %295 }
 0x143   :  { %v300_v63 = vpop.permute.xlu0 %299 }
 0x145   :  { %v302_v57 = vpop.permute.xlu1 %301 }
 0x18d   :  { %v421_v34 = vpop.f32.mrf.mxu1 }
 0x18e   :  { %v262_v35 = vadd.f32 %v421_v34, %v376_v32 }
 0x18f   :  { %v256_v36 = vpop.f32.mrf.mxu1 }
 0x190   :  { %v310_v37 = vadd.f32 %v294_v31, %v262_v35  ;;  %v257_v38 = vadd.f32 %v376_v32, %v256_v36 }
 0x191   :  { %v424_v40 = vpop.f32.mrf.mxu1 }
 0x192   :  { %v322_v42 = vsub.f32 %v310_v37, %v310_v37  ;;  %v309_v43 = vadd.f32 %v292_v39, %v257_v38  ;;  %v272_v44 = vadd.f32 %v424_v40, %v376_v32 }
 0x193   :  { %v266_v45 = vpop.f32.mrf.mxu1 }
 0x194   :  { %v328_v46 = vmul.f32 %v322_v42, %v322_v42  ;;  %v321_v47 = vsub.f32 %v309_v43, %v309_v43  ;;  %v312_v48 = vadd.f32 %v298_v33, %v272_v44  ;;  %v267_v49 = vadd.f32 %v376_v32, %v266_v45 }
 0x195   :  { %v427_v50 = vpop.f32.mrf.mxu1 }
 0x196   :  { %v340_v51 = vadd.f32 1e-05, %v328_v46  ;;  %v327_v52 = vmul.f32 %v321_v47, %v321_v47  ;;  %v324_v53 = vsub.f32 %v312_v48, %v312_v48  ;;  %v311_v54 = vadd.f32 %v296_v41, %v267_v49 }
 0x197   :  { %v282_v55 = vadd.f32 %v427_v50, %v376_v32  ;;  %v276_v56 = vpop.f32.mrf.mxu1 }
 0x198   :  { %429 = vrsqrt.f32 %v340_v51  ;;  %v339_v58 = vadd.f32 1e-05, %v327_v52  ;;  %v330_v59 = vmul.f32 %v324_v53, %v324_v53  ;;  %v323_v60 = vsub.f32 %v311_v54, %v311_v54 }
 0x199   :  { %v314_v61 = vadd.f32 %v302_v57, %v282_v55  ;;  %v277_v62 = vadd.f32 %v376_v32, %v276_v56 }
 0x19a   :  { %431 = vrsqrt.f32 %v339_v58  ;;  %v342_v0 = vadd.f32 1e-05, %v330_v59  ;;  %v329_v1 = vmul.f32 %v323_v60, %v323_v60 }
 0x19b   :  { %v326_v2 = vsub.f32 %v314_v61, %v314_v61  ;;  %v313_v3 = vadd.f32 %v300_v63, %v277_v62 }
 0x19c   :  { %433 = vrsqrt.f32 %v342_v0  ;;  %v341_v4 = vadd.f32 1e-05, %v329_v1 }
 0x19d   :  { %v332_v5 = vmul.f32 %v326_v2, %v326_v2  ;;  %v325_v6 = vsub.f32 %v313_v3, %v313_v3 }
 0x19e   :  { %435 = vrsqrt.f32 %v341_v4 }
 0x19f   :  { %v344_v7 = vadd.f32 1e-05, %v332_v5  ;;  %v331_v8 = vmul.f32 %v325_v6, %v325_v6 }
 0x1a1   :  { %437 = vrsqrt.f32 %v344_v7  ;;  %v343_v9 = vadd.f32 1e-05, %v331_v8 }
 0x1a3   :  { %439 = vrsqrt.f32 %v343_v9 }
 0x1a5   :  { %v430_v10 = vpop.eup %429 }
 0x1a6   :  { %v352_v11 = vmul.f32 %v430_v10, %v322_v42 }
 0x1a7   :  { %v432_v12 = vpop.eup %431 }
 0x1a8   :  { %359 = vst.msk [vmem:[%s546_s5 + $0x8] sm:$0xff] %vm357_vm3, %v352_v11  ;;  %v351_v13 = vmul.f32 %v432_v12, %v321_v47 }
 0x1a9   :  { %v434_v14 = vpop.eup %433 }
 0x1aa   :  { %358 = vst.msk [vmem:[%s546_s5] sm:$0xff] %vm357_vm3, %v351_v13  ;;  %v354_v15 = vmul.f32 %v434_v14, %v324_v53 }
 0x1ab   :  { %v436_v16 = vpop.eup %435 }
 0x1ac   :  { %361 = vst.msk [vmem:[%s546_s5 + $0x18] sm:$0xff] %vm357_vm3, %v354_v15  ;;  %v353_v17 = vmul.f32 %v436_v16, %v323_v60 }
 0x1ae   :  { %v438_v18 = vpop.eup %437  ;;  %360 = vst.msk [vmem:[%s546_s5 + $0x10] sm:$0xff] %vm357_vm3, %v353_v17 }
 0x1af   :  { %v356_v19 = vmul.f32 %v438_v18, %v326_v2 }
 0x1b0   :  { %v440_v20 = vpop.eup %439 }
 0x1b1   :  { %363 = vst.msk [vmem:[%s546_s5 + $0x28] sm:$0xff] %vm357_vm3, %v356_v19  ;;  %v355_v21 = vmul.f32 %v440_v20, %v325_v6 }
 0x1b3   :  { %362 = vst.msk [vmem:[%s546_s5 + $0x20] sm:$0xff] %vm357_vm3, %v355_v21 }

</bundles_post_ra>
